<compile_context>
chip_gen: v7x
topology: tpu7x:2x2x1
jax: 0.10.0
libtpu: 0.0.40
codegen_flags: <defaults>
</compile_context>

<pallas_src>
import functools

import jax
import jax.numpy as jnp
from jax import lax
from jax.experimental import pallas as pl
from jax.experimental.pallas import tpu as pltpu


# ----------------------------------------------------------------------------
# Pass 1: fused im2col + K-packed conv matmul + per-tile BN partial statistics.
# Grid = (N, HT); each step produces rows = TH*Wo output rows.
# ----------------------------------------------------------------------------
def _conv_stats_kernel(x_ref, w_ref, y_ref, stats_ref, *,
                       TH, Wo, Cin, KH, KW, stride, pack_k):
    # x_ref:     (1, Hp, Wp, Cin)       padded NHWC image (bf16), resident per image
    # w_ref:     (KH*KW*Cin, Cpad)      packed conv weight (bf16), resident
    # y_ref:     (rows, Cpad)           conv output tile (bf16)
    # stats_ref: (1, 2, Cpad)           per-tile [sum, sumsq] over the tile's rows (f32)
    hi = pl.program_id(1)
    row0 = pl.multiple_of(hi * (TH * stride), TH * stride)
    rows = TH * Wo
    Cpad = y_ref.shape[-1]

    def tap_slice(kh, kw):
        if stride == 1:
            xs = x_ref[0, pl.ds(row0 + kh, TH), pl.ds(kw, Wo), :]
        else:
            # Strided dynamic slices: load only the needed rows/cols (no
            # load-then-subsample relayout).
            xs = x_ref[0, pl.ds(row0 + kh, TH, stride),
                       pl.ds(kw, Wo, stride), :]
        return xs.reshape(rows, Cin)                        # bf16 (rows, Cin)

    if pack_k:
        # One matmul with K = KH*KW*Cin (much better MXU fill for small Cin).
        patches = jnp.concatenate(
            [tap_slice(kh, kw) for kh in range(KH) for kw in range(KW)],
            axis=-1)                                         # (rows, KH*KW*Cin)
        acc = jnp.dot(patches, w_ref[...],
                      preferred_element_type=jnp.float32)    # (rows, Cpad) f32
    else:
        # Cin already large: per-tap matmuls avoid the lane-concat shuffle.
        acc = jnp.zeros((rows, Cpad), jnp.float32)
        for kh in range(KH):
            for kw in range(KW):
                tap = (kh * KW + kw) * Cin
                acc = acc + jnp.dot(tap_slice(kh, kw),
                                    w_ref[pl.ds(tap, Cin), :],
                                    preferred_element_type=jnp.float32)

    # BN partial statistics from the f32 accumulator, then bf16 writeback.
    s = jnp.sum(acc, axis=0, keepdims=True)                  # (1, Cpad)
    ss = jnp.sum(acc * acc, axis=0, keepdims=True)           # (1, Cpad)
    stats_ref[0] = jnp.concatenate([s, ss], axis=0)          # (2, Cpad)
    y_ref[...] = acc.astype(y_ref.dtype)


# ----------------------------------------------------------------------------
# Pass 2: pure streaming BN apply: out = y * scale + shift  (scale/shift are
# precomputed outside the kernel from the reduced batch statistics).
# ----------------------------------------------------------------------------
def _bn_apply_kernel(y_ref, scale_ref, shift_ref, o_ref):
    # y_ref: (rows, Cpad) bf16; scale/shift: (1, Cpad) f32; o_ref: (rows, Cpad) f32
    o_ref[...] = y_ref[...].astype(jnp.float32) * scale_ref[...] + shift_ref[...]


# ----------------------------------------------------------------------------
# Host-side wrapper.
# ----------------------------------------------------------------------------
def _choose_th(Ho, Wo, target_rows):
    """Pick TH (output rows per tile): a divisor of Ho with TH*Wo % 8 == 0."""
    divs = [d for d in range(1, Ho + 1) if Ho % d == 0]
    ok = [d for d in divs if (d * Wo) % 8 == 0]
    if not ok:
        # TODO(synk): support ragged/masked M-tiles when no divisor of Ho gives
        # a sublane-aligned tile; current shapes (Wo multiple of 8) never hit this.
        raise ValueError(f"No sublane-aligned row tile for Ho={Ho}, Wo={Wo}")
    under = [d for d in ok if d * Wo <= target_rows]
    return max(under) if under else min(ok)


def _pad_vec(v, cpad, fill=0.0):
    c = v.shape[0]
    if cpad > c:
        v = jnp.pad(v, (0, cpad - c), constant_values=fill)
    return v.astype(jnp.float32)


def conv_block_forward(x_nchw, params, *, stride, padding, eps=1e-5,
                       target_rows=256):
    w = params["conv_w"]          # (Cout, Cin, KH, KW)
    gamma = params["bn_gamma"]    # (Cout,)
    beta = params["bn_beta"]      # (Cout,)
    # params["conv_b"] is intentionally unused: a constant per-channel bias is
    # exactly cancelled by training-mode BatchNorm (mean subtraction).

    Cout, Cin, KH, KW = w.shape
    N, Cin_x, H, W = x_nchw.shape
    assert Cin_x == Cin
    Ho = (H + 2 * padding - KH) // stride + 1
    Wo = (W + 2 * padding - KW) // stride + 1

    TH = _choose_th(Ho, Wo, target_rows)     # output rows per tile
    HT = Ho // TH                            # row-tiles per image
    rows = TH * Wo                           # matmul rows per grid step
    G = N * HT                               # number of M-tiles
    M = N * Ho * Wo
    Cpad = ((Cout + 127) // 128) * 128       # lane-dense output channels
    Kpack = KH * KW * Cin
    pack_k = Cin < 128                       # per-tap fallback for large Cin

    # Padded NHWC input: single jnp.pad, no zeros().at[].set() copy. Strided
    # in-kernel slices never read past H+2p / W+2p.
    Hp, Wp = H + 2 * padding, W + 2 * padding
    x_nhwc = jnp.transpose(x_nchw, (0, 2, 3, 1)).astype(jnp.bfloat16)
    x_pad = jnp.pad(x_nhwc, ((0, 0), (padding, padding),
                             (padding, padding), (0, 0)))

    # Packed weight: (KH, KW, Cin, Cout) -> (KH*KW*Cin, Cpad), bf16.
    w_t = jnp.transpose(w, (2, 3, 1, 0))                     # (KH, KW, Cin, Cout)
    if Cpad > Cout:
        w_t = jnp.pad(w_t, ((0, 0), (0, 0), (0, 0), (0, Cpad - Cout)))
    w_packed = w_t.reshape(Kpack, Cpad).astype(jnp.bfloat16)

    # VMEM budget (explicit: v5e default scoped limit is 16 MiB, v7x physical
    # VMEM is 64 MiB). Double-buffered blocks + in-kernel f32 temporaries.
    x_blk = Hp * Wp * Cin * 2
    w_blk = Kpack * Cpad * 2
    y_blk = rows * Cpad * 2
    o_blk = rows * Cpad * 4
    pass1 = 2 * (x_blk + w_blk + y_blk + 2 * Cpad * 4) + 3 * rows * Cpad * 4
    pass2 = 2 * (y_blk + o_blk + 2 * Cpad * 4)
    vmem_bytes = int(min(64 * 1024 * 1024,
                         max(32 * 1024 * 1024, 2 * max(pass1, pass2))))

    # ---- Pass 1: fused conv + BN partial stats --------------------------------
    conv_kernel = functools.partial(
        _conv_stats_kernel, TH=TH, Wo=Wo, Cin=Cin, KH=KH, KW=KW,
        stride=stride, pack_k=pack_k)
    y, stats = pl.pallas_call(
        conv_kernel,
        out_shape=(jax.ShapeDtypeStruct((M, Cpad), jnp.bfloat16),
                   jax.ShapeDtypeStruct((G, 2, Cpad), jnp.float32)),
        grid_spec=pltpu.PrefetchScalarGridSpec(
            num_scalar_prefetch=0,
            # Batch axis first so a v7x 2-TC split lands on n (independent
            # image DMAs per core); both axes are parallel.
            grid=(N, HT),
            in_specs=[
                pl.BlockSpec((1, Hp, Wp, Cin), lambda n, hi: (n, 0, 0, 0)),
                pl.BlockSpec((Kpack, Cpad), lambda n, hi: (0, 0)),
            ],
            out_specs=(
                pl.BlockSpec((rows, Cpad), lambda n, hi: (n * HT + hi, 0)),
                pl.BlockSpec((1, 2, Cpad), lambda n, hi: (n * HT + hi, 0, 0)),
            ),
        ),
        compiler_params=pltpu.CompilerParams(
            dimension_semantics=("parallel", "parallel"),
            vmem_limit_bytes=vmem_bytes),
    )(x_pad, w_packed)

    # ---- BN finalization: tiny (G, 2, Cpad) reduce + scale/shift in plain JAX --
    tot = jnp.sum(stats, axis=0)                              # (2, Cpad)
    inv_m = 1.0 / float(M)
    mean = tot[0] * inv_m                                     # (Cpad,)
    var = jnp.maximum(tot[1] * inv_m - mean * mean, 0.0)      # biased, clamped
    gamma_p = _pad_vec(gamma, Cpad, 0.0)                      # zero pad lanes
    beta_p = _pad_vec(beta, Cpad, 0.0)
    inv_std = lax.rsqrt(var + eps)
    scale = (gamma_p * inv_std).reshape(1, Cpad).astype(jnp.float32)
    shift = (beta_p - mean * gamma_p * inv_std).reshape(1, Cpad).astype(jnp.float32)

    # ---- Pass 2: streaming BN apply, tiled over M ------------------------------
    out = pl.pallas_call(
        _bn_apply_kernel,
        out_shape=jax.ShapeDtypeStruct((M, Cpad), jnp.float32),
        grid_spec=pltpu.PrefetchScalarGridSpec(
            num_scalar_prefetch=0,
            grid=(G,),
            in_specs=[
                pl.BlockSpec((rows, Cpad), lambda i: (i, 0)),
                pl.BlockSpec((1, Cpad), lambda i: (0, 0)),
                pl.BlockSpec((1, Cpad), lambda i: (0, 0)),
            ],
            out_specs=pl.BlockSpec((rows, Cpad), lambda i: (i, 0)),
        ),
        compiler_params=pltpu.CompilerParams(
            dimension_semantics=("parallel",),
            vmem_limit_bytes=vmem_bytes),
    )(y, scale, shift)

    # (M, Cpad) -> (N, Ho, Wo, Cout) -> NCHW
    out = out[:, :Cout].reshape(N, Ho, Wo, Cout).transpose(0, 3, 1, 2)
    return out


# ----------------------------------------------------------------------------
# Pure-JAX reference (f32, includes the conv bias — BN cancels it exactly).
# ----------------------------------------------------------------------------
def reference_forward(x, params, *, stride, padding, eps=1e-5):
    w, b = params["conv_w"], params["conv_b"]
    gamma, beta = params["bn_gamma"], params["bn_beta"]
    y = lax.conv_general_dilated(
        x, w, window_strides=(stride, stride),
        padding=((padding, padding), (padding, padding)),
        dimension_numbers=("NCHW", "OIHW", "NCHW"))
    y = y + b[None, :, None, None]
    mean = jnp.mean(y, axis=(0, 2, 3), keepdims=True)
    var = jnp.mean((y - mean) ** 2, axis=(0, 2, 3), keepdims=True)
    y = (y - mean) * lax.rsqrt(var + eps)
    return y * gamma[None, :, None, None] + beta[None, :, None, None]


if __name__ == "__main__":
    # Small shapes consistent with the module: ConvBlock(4, 8, 3, 1, 1)
    N, Cin, H, W = 2, 4, 16, 16
    Cout, K, stride, padding = 8, 3, 1, 1

    key = jax.random.PRNGKey(0)
    kx, kw, kb, kg, kbt = jax.random.split(key, 5)
    x = jax.random.normal(kx, (N, Cin, H, W), dtype=jnp.float32)
    params = {
        "conv_w": 0.1 * jax.random.normal(kw, (Cout, Cin, K, K), jnp.float32),
        "conv_b": 0.1 * jax.random.normal(kb, (Cout,), jnp.float32),
        "bn_gamma": 1.0 + 0.1 * jax.random.normal(kg, (Cout,), jnp.float32),
        "bn_beta": 0.1 * jax.random.normal(kbt, (Cout,), jnp.float32),
    }

    out = conv_block_forward(x, params, stride=stride, padding=padding)
    out = jax.block_until_ready(out)

    ref = reference_forward(x, params, stride=stride, padding=padding)
    assert out.shape == (N, Cout, H, W), out.shape
    max_err = float(jnp.max(jnp.abs(out - ref)))
    # bf16 MXU operands + bf16 intermediate (f32 stats/accum) vs f32 reference.
    assert jnp.allclose(out, ref, atol=3e-2, rtol=3e-2), max_err

    print("KERNEL_OK")
</pallas_src>

<mosaic_0001>
module attributes {stable_mosaic.version = 11 : i64} {
  func.func @_conv_stats_kernel(%arg0: i32, %arg1: i32, %arg2: memref<1x18x18x4xbf16, #tpu.memory_space<vmem>>, %arg3: memref<36x128xbf16, #tpu.memory_space<vmem>>, %arg4: memref<256x128xbf16, #tpu.memory_space<vmem>>, %arg5: memref<1x2x128xf32, #tpu.memory_space<vmem>>) attributes {dimension_semantics = [#tpu.dimension_semantics<parallel>, #tpu.dimension_semantics<parallel>], iteration_bounds = array<i64: 2, 1>, scalar_prefetch = 0 : i64, scratch_operands = 0 : i64, tpu.core_type = #tpu.core_type<tc>, window_params = [{transform_indices = @transform_0, window_bounds = array<i64: 1, 18, 18, 4>}, {pipeline_mode = #tpu.pipeline_mode<synchronous>, transform_indices = @transform_1, window_bounds = array<i64: 36, 128>}, {transform_indices = @transform_2, window_bounds = array<i64: 256, 128>}, {transform_indices = @transform_3, window_bounds = array<i64: 1, 2, 128>}]} {
    %c16_i32 = arith.constant 16 : i32
    %0 = arith.muli %arg1, %c16_i32 : i32
    %1 = tpu.assume_multiple %0, 16 : i32
    %c0_i32 = arith.constant 0 : i32
    %2 = arith.addi %1, %c0_i32 : i32
    %c0 = arith.constant 0 : index
    %3 = arith.index_cast %2 : i32 to index
    %c0_0 = arith.constant 0 : index
    %c0_1 = arith.constant 0 : index
    %4 = vector.load %arg2[%c0, %3, %c0_0, %c0_1] : memref<1x18x18x4xbf16, #tpu.memory_space<vmem>>, vector<1x16x16x4xbf16>
    %5 = vector.shape_cast %4 : vector<1x16x16x4xbf16> to vector<16x16x4xbf16>
    %6 = vector.shape_cast %5 : vector<16x16x4xbf16> to vector<256x4xbf16>
    %c0_i32_2 = arith.constant 0 : i32
    %7 = arith.addi %1, %c0_i32_2 : i32
    %c0_3 = arith.constant 0 : index
    %8 = arith.index_cast %7 : i32 to index
    %c1 = arith.constant 1 : index
    %c0_4 = arith.constant 0 : index
    %9 = vector.load %arg2[%c0_3, %8, %c1, %c0_4] : memref<1x18x18x4xbf16, #tpu.memory_space<vmem>>, vector<1x16x16x4xbf16>
    %10 = vector.shape_cast %9 : vector<1x16x16x4xbf16> to vector<16x16x4xbf16>
    %11 = vector.shape_cast %10 : vector<16x16x4xbf16> to vector<256x4xbf16>
    %c0_i32_5 = arith.constant 0 : i32
    %12 = arith.addi %1, %c0_i32_5 : i32
    %c0_6 = arith.constant 0 : index
    %13 = arith.index_cast %12 : i32 to index
    %c2 = arith.constant 2 : index
    %c0_7 = arith.constant 0 : index
    %14 = vector.load %arg2[%c0_6, %13, %c2, %c0_7] : memref<1x18x18x4xbf16, #tpu.memory_space<vmem>>, vector<1x16x16x4xbf16>
    %15 = vector.shape_cast %14 : vector<1x16x16x4xbf16> to vector<16x16x4xbf16>
    %16 = vector.shape_cast %15 : vector<16x16x4xbf16> to vector<256x4xbf16>
    %c1_i32 = arith.constant 1 : i32
    %17 = arith.addi %1, %c1_i32 : i32
    %c0_8 = arith.constant 0 : index
    %18 = arith.index_cast %17 : i32 to index
    %c0_9 = arith.constant 0 : index
    %c0_10 = arith.constant 0 : index
    %19 = vector.load %arg2[%c0_8, %18, %c0_9, %c0_10] : memref<1x18x18x4xbf16, #tpu.memory_space<vmem>>, vector<1x16x16x4xbf16>
    %20 = vector.shape_cast %19 : vector<1x16x16x4xbf16> to vector<16x16x4xbf16>
    %21 = vector.shape_cast %20 : vector<16x16x4xbf16> to vector<256x4xbf16>
    %c1_i32_11 = arith.constant 1 : i32
    %22 = arith.addi %1, %c1_i32_11 : i32
    %c0_12 = arith.constant 0 : index
    %23 = arith.index_cast %22 : i32 to index
    %c1_13 = arith.constant 1 : index
    %c0_14 = arith.constant 0 : index
    %24 = vector.load %arg2[%c0_12, %23, %c1_13, %c0_14] : memref<1x18x18x4xbf16, #tpu.memory_space<vmem>>, vector<1x16x16x4xbf16>
    %25 = vector.shape_cast %24 : vector<1x16x16x4xbf16> to vector<16x16x4xbf16>
    %26 = vector.shape_cast %25 : vector<16x16x4xbf16> to vector<256x4xbf16>
    %c1_i32_15 = arith.constant 1 : i32
    %27 = arith.addi %1, %c1_i32_15 : i32
    %c0_16 = arith.constant 0 : index
    %28 = arith.index_cast %27 : i32 to index
    %c2_17 = arith.constant 2 : index
    %c0_18 = arith.constant 0 : index
    %29 = vector.load %arg2[%c0_16, %28, %c2_17, %c0_18] : memref<1x18x18x4xbf16, #tpu.memory_space<vmem>>, vector<1x16x16x4xbf16>
    %30 = vector.shape_cast %29 : vector<1x16x16x4xbf16> to vector<16x16x4xbf16>
    %31 = vector.shape_cast %30 : vector<16x16x4xbf16> to vector<256x4xbf16>
    %c2_i32 = arith.constant 2 : i32
    %32 = arith.addi %1, %c2_i32 : i32
    %c0_19 = arith.constant 0 : index
    %33 = arith.index_cast %32 : i32 to index
    %c0_20 = arith.constant 0 : index
    %c0_21 = arith.constant 0 : index
    %34 = vector.load %arg2[%c0_19, %33, %c0_20, %c0_21] : memref<1x18x18x4xbf16, #tpu.memory_space<vmem>>, vector<1x16x16x4xbf16>
    %35 = vector.shape_cast %34 : vector<1x16x16x4xbf16> to vector<16x16x4xbf16>
    %36 = vector.shape_cast %35 : vector<16x16x4xbf16> to vector<256x4xbf16>
    %c2_i32_22 = arith.constant 2 : i32
    %37 = arith.addi %1, %c2_i32_22 : i32
    %c0_23 = arith.constant 0 : index
    %38 = arith.index_cast %37 : i32 to index
    %c1_24 = arith.constant 1 : index
    %c0_25 = arith.constant 0 : index
    %39 = vector.load %arg2[%c0_23, %38, %c1_24, %c0_25] : memref<1x18x18x4xbf16, #tpu.memory_space<vmem>>, vector<1x16x16x4xbf16>
    %40 = vector.shape_cast %39 : vector<1x16x16x4xbf16> to vector<16x16x4xbf16>
    %41 = vector.shape_cast %40 : vector<16x16x4xbf16> to vector<256x4xbf16>
    %c2_i32_26 = arith.constant 2 : i32
    %42 = arith.addi %1, %c2_i32_26 : i32
    %c0_27 = arith.constant 0 : index
    %43 = arith.index_cast %42 : i32 to index
    %c2_28 = arith.constant 2 : index
    %c0_29 = arith.constant 0 : index
    %44 = vector.load %arg2[%c0_27, %43, %c2_28, %c0_29] : memref<1x18x18x4xbf16, #tpu.memory_space<vmem>>, vector<1x16x16x4xbf16>
    %45 = vector.shape_cast %44 : vector<1x16x16x4xbf16> to vector<16x16x4xbf16>
    %46 = vector.shape_cast %45 : vector<16x16x4xbf16> to vector<256x4xbf16>
    %47 = tpu.concatenate %6, %11, %16, %21, %26, %31, %36, %41, %46 in 1 : vector<256x4xbf16>, vector<256x4xbf16>, vector<256x4xbf16>, vector<256x4xbf16>, vector<256x4xbf16>, vector<256x4xbf16>, vector<256x4xbf16>, vector<256x4xbf16>, vector<256x4xbf16> -> vector<256x36xbf16>
    %c0_30 = arith.constant 0 : index
    %c0_31 = arith.constant 0 : index
    %48 = vector.load %arg3[%c0_30, %c0_31] : memref<36x128xbf16, #tpu.memory_space<vmem>>, vector<36x128xbf16>
    %cst = arith.constant dense<0.000000e+00> : vector<256x128xf32>
    %49 = tpu.matmul %47, %48, %cst {dimension_numbers = #tpu.dot_dimension_numbers<[1], [0], [0], [1], [0, 0, 1, 1], [], []>} : vector<256x36xbf16>, vector<36x128xbf16>, vector<256x128xf32> -> vector<256x128xf32>
    %cst_32 = arith.constant dense<0.000000e+00> : vector<128xf32>
    %50 = vector.multi_reduction <add>, %49, %cst_32 [0] : vector<256x128xf32> to vector<128xf32>
    %51 = vector.shape_cast %50 : vector<128xf32> to vector<1x128xf32>
    %52 = arith.mulf %49, %49 : vector<256x128xf32>
    %cst_33 = arith.constant dense<0.000000e+00> : vector<128xf32>
    %53 = vector.multi_reduction <add>, %52, %cst_33 [0] : vector<256x128xf32> to vector<128xf32>
    %54 = vector.shape_cast %53 : vector<128xf32> to vector<1x128xf32>
    %55 = tpu.concatenate %51, %54 in 0 : vector<1x128xf32>, vector<1x128xf32> -> vector<2x128xf32>
    %c0_34 = arith.constant 0 : index
    %c0_35 = arith.constant 0 : index
    %c0_36 = arith.constant 0 : index
    %56 = vector.load %arg5[%c0_34, %c0_35, %c0_36] : memref<1x2x128xf32, #tpu.memory_space<vmem>>, vector<1x2x128xf32>
    %57 = vector.shape_cast %56 : vector<1x2x128xf32> to vector<2x128xf32>
    %58 = vector.shape_cast %55 : vector<2x128xf32> to vector<1x2x128xf32>
    tpu.vector_store %arg5[%c0_34, %c0_35, %c0_36], %58 {strides = array<i32>} : memref<1x2x128xf32, #tpu.memory_space<vmem>>, vector<1x2x128xf32>,
    %59 = arith.truncf %49 : vector<256x128xf32> to vector<256x128xbf16>
    %c0_37 = arith.constant 0 : index
    %c0_38 = arith.constant 0 : index
    %60 = vector.load %arg4[%c0_37, %c0_38] : memref<256x128xbf16, #tpu.memory_space<vmem>>, vector<256x128xbf16>
    tpu.vector_store %arg4[%c0_37, %c0_38], %59 {strides = array<i32>} : memref<256x128xbf16, #tpu.memory_space<vmem>>, vector<256x128xbf16>,
    return
  }
  func.func @transform_0(%arg0: i32, %arg1: i32) -> (i32, i32, i32, i32) {
    %c0_i32 = arith.constant 0 : i32
    %c0_i32_0 = arith.constant 0 : i32
    %c0_i32_1 = arith.constant 0 : i32
    %c0_i32_2 = arith.constant 0 : i32
    return %arg0, %c0_i32, %c0_i32_0, %c0_i32_1 : i32, i32, i32, i32
  }
  func.func @transform_1(%arg0: i32, %arg1: i32) -> (i32, i32) {
    %c0_i32 = arith.constant 0 : i32
    %c0_i32_0 = arith.constant 0 : i32
    %c0_i32_1 = arith.constant 0 : i32
    return %c0_i32, %c0_i32_0 : i32, i32
  }
  func.func @transform_2(%arg0: i32, %arg1: i32) -> (i32, i32) {
    %c1_i32 = arith.constant 1 : i32
    %0 = arith.muli %arg0, %c1_i32 : i32
    %1 = arith.addi %0, %arg1 : i32
    %c0_i32 = arith.constant 0 : i32
    %c0_i32_0 = arith.constant 0 : i32
    return %1, %c0_i32 : i32, i32
  }
  func.func @transform_3(%arg0: i32, %arg1: i32) -> (i32, i32, i32) {
    %c1_i32 = arith.constant 1 : i32
    %0 = arith.muli %arg0, %c1_i32 : i32
    %1 = arith.addi %0, %arg1 : i32
    %c0_i32 = arith.constant 0 : i32
    %c0_i32_0 = arith.constant 0 : i32
    %c0_i32_1 = arith.constant 0 : i32
    return %1, %c0_i32, %c0_i32_0 : i32, i32, i32
  }
}

</mosaic_0001>

<bundles_post_ra>
// kernel: tpu_custom_call.1
= control target key start
LH: loop header
LB: loop body
LE: loop exit
PB: predicated region body
PF: predicated region fallthrough
CT: control target
= control target key end

     0   :  { %9 = vsyncpa [#allocation3], 0  ;;  %s6326_s0 = inlined_call_operand.vmem [shape: bf16[2,18,18,4], index: 0, kind: input, shape index: {}]   ;;  %s6327_s1 = inlined_call_operand.vmem [shape: bf16[36,128], index: 1, kind: input, shape index: {}]   ;;  %s6328_s2 = inlined_call_operand.hbm [shape: bf16[512,128], index: 2, kind: output, shape index: {0}]   ;;  %s6329_s3 = inlined_call_operand.hbm [shape: f32[2,2,128], index: 3, kind: output, shape index: {1}]  }
   0x1   :  { %11 = vsyncpa [#allocation3 + $0x1], 0 }
   0x2   :  { %12 = vsyncpa [#allocation5], 0 }
   0x3   :  { %14 = vsyncpa [#allocation5 + $0x1], 0  ;;  %s4564_s12 = smov 0   ;;  %s4566_s13 = smov 0  }
   0x4   :  { %s4568_s14 = smov 0   ;;  %s4570_s15 = smov 0  }
   0x5   :  { %s4572_s16 = smov 0   ;;  %s4574_s17 = smov 0  }
   0x6 LB: > { %s3693_s18 = sadd.s32 4294967295, %s4531_s17   ;;  %s3694_s19 = sadd.s32 4294967294, %s4531_s17   ;;  %s4531_s17 = sphi %s4574_s17, %s20_s17   ;;  %s4527_s16 = sphi %s4572_s16, %s6340_s16   ;;  %s4523_s15 = sphi %s4570_s15, %s6339_s15   ;;  %s4519_s14 = sphi %s4568_s14, %s6338_s14   ;;  %s4515_s13 = sphi %s4566_s13, %s6337_s13   ;;  %s4511_s12 = sphi %s4564_s12, %s6336_s12  }
   0x7   : > { %s32_s20 = sadd.s32 1, %s4527_s16  ;;  %s88_s21 = sadd.s32 1, %s4519_s14 }
   0x8   : > { %p34_p0 = scmp.ge.s32.totalorder %s32_s20, 2  ;;  %p98_p1 = scmp.ne.s32.totalorder %s4519_s14, %s4515_s13 }
   0x9   : > { %p99_p2 = scmp.eq.s32.totalorder %s3693_s18, 1  ;;  %p104_p3 = scmp.ne.s32.totalorder %s4515_s13, %s4511_s12 }
   0xa   : > { %s6342_s20 = smov (%p34_p0, %s32_s20), 0  ;;  %p105_p5 = scmp.eq.s32.totalorder %s3694_s19, 1 }
   0xb   : > { %p4604_p4 = por %p99_p2, %p98_p1  ;;  %s85_s23 = ssub.s32 %s4527_s16, %s6342_s20 }
   0xc   : > { %p3697_p6 = scmp.ge.s32.totalorder %s4531_s17, 1  ;;  %p86_p7 = scmp.eq.s32.totalorder %s85_s23, 0 }
   0xd   : > { %p4611_p8 = por %p105_p5, %p104_p3  ;;  %p162_p9 = scmp.lt.s32.totalorder %s4531_s17, 3 }
   0xe   : > { %s4617_s25 = scalar_select %p86_p7, %s4519_s14, %s88_s21  }
   0xf   : > { %p163_p10 = pnand %p3697_p6, %p162_p9 }
  0x10   : > { %p191_p11 = scmp.lt.s32.totalorder (!%p163_p10), %s4523_s15, 1  ;;  %vm703_vm0 = vcmask (!%p163_p10), 1042432   ;;  %vm704_vm1 = vcmask (!%p163_p10), 1046532   ;;  %s4533_s4 = smov (!%p163_p10), 12   ;;  %vm252_vm3 = vsmask.f32 (!%p163_p10), 3328 }
  0x11   : > { %166 = sbr.rel (%p163_p10) target bundleno = 730 (0x2da), region = 28  ;;  %vm4648_vm2 = vmor (!%p163_p10), %vm703_vm0, %vm704_vm1  ;;  %vm253_vm4 = vsmask.f32 (!%p163_p10), 7440  ;;  %s4534_s5 = smov (!%p163_p10), 20   ;;  %vm2778_vm6 = vcmask (!%p163_p10), 31744   ;;  %vm2827_vm7 = vcmask (!%p163_p10), 64512  }
  0x12   : > { %s4535_s6 = smov (!%p163_p10), 8   ;;  %vm4692_vm5 = vmor (!%p163_p10), %vm252_vm3, %vm253_vm4  ;;  %s4536_s7 = smov (!%p163_p10), 4   ;;  %vm2860_vm8 = vcmask (!%p163_p10), 97280   ;;  %vm2893_vm9 = vcmask (!%p163_p10), 130048   ;;  %vm2926_vm10 = vcmask (!%p163_p10), 162816   ;;  %vm2959_vm11 = vcmask (!%p163_p10), 195584  }
  0x13   : > { %s4537_s8 = smov (!%p163_p10), 16   ;;  %s4538_s9 = smov (!%p163_p10), 24   ;;  %vm2992_vm12 = vcmask (!%p163_p10), 228352   ;;  %vm3111_vm13 = vcmask (!%p163_p10), 1041408   ;;  %vm3025_vm14 = vcmask (!%p163_p10), 261120   ;;  %vm3078_vm15 = vcmask (!%p163_p10), 293888  }
  0x14   : > { %s4539_s10 = smov (!%p163_p10), 28   ;;  %s4540_s19 = smov (!%p163_p10), 32  }
  0x15   : > { %s6174_s28 = sand.u32 (!%p163_p10), 1, %s4515_s13   ;;  %s4541_s18 = smov (!%p163_p10), [#allocation2]  }
  0x16   : > { %s3698_s29 = sshll.u32 (!%p163_p10), %s6174_s28, 7 }
  0x18   : > { %s192_s26 = scalar_select %p191_p11, %s4523_s15, 1 }
  0x1a   : > { %s4272_s27 = smul.u32 216, %s192_s26 }
  0x1c   : > { %s4624_s30 = scalar_lea.vmem %s6326_s0, %s4272_s27 }
  0x1d   : > { %v3719_v0 = vld [vmem:[%s4624_s30 + $0x18] sm:$0xf]  ;;  %v4628_v1 = vld [vmem:[%s4624_s30 + $0x1c] sm:$0xf]  ;;  %v3717_v2 = vld [vmem:[%s4624_s30 + $0xc] sm:$0xf] }
  0x1e   : > { %v904_v3 = vshll.u32 %v4628_v1, 16  ;;  %v908_v4 = vshrl.u32 %v4628_v1, 16  ;;  %v3926_v5 = vcombine.low %v3719_v0, %v4628_v1  ;;  %v895_v6 = vshrl.u32 %v3719_v0, 16  ;;  %v4635_v7 = vld [vmem:[%s4624_s30 + $0x10] sm:$0xf] }
  0x1f   : > { %v898_v8 = vshll.u32 %v3719_v0, 16  ;;  %v880_v9 = vshll.u32 %v4635_v7, 16  ;;  %v884_v10 = vshrl.u32 %v4635_v7, 16  ;;  %v3925_v11 = vcombine.low %v3717_v2, %v4635_v7  ;;  %v4641_v12 = vld [vmem:[%s4624_s30 + $0x14] sm:$0x1] }
  0x20   : > { %v4643_v13 = vrot.slane %v908_v4, 4  ;;  %2332 = vrot.lane.b32.xlu1 %v3926_v5, %s4533_s4  ;;  %v897_v14 = vrot.slane %v895_v6, 4  ;;  %v871_v15 = vshrl.u32 %v3717_v2, 16  ;;  %v874_v16 = vshll.u32 %v3717_v2, 16  ;;  %v3765_v18 = vld [vmem:[%s4624_s30 + $0xc] sm:$0xe] }
  0x21   : > { %v900_v19 = vrot.slane %v898_v8, 5  ;;  %v4653_v20 = vrot.slane %v884_v10, 4  ;;  %2330 = vrot.lane.b32.xlu0 %v3925_v11, %s4533_s4  ;;  %v3781_v21 = vrot.slane %v3765_v18, 9  ;;  %v1320_v22 = vrot.slane %v4635_v7, 5  ;;  %v205_v23 = vld [vmem:[%s4624_s30 + $0x4] sm:$0xf] }
  0x22   : > { %v873_v24 = vrot.slane %v871_v15, 4  ;;  %v876_v25 = vrot.slane %v874_v16, 5  ;;  %v1323_v26 = vrot.slane %v4641_v12, 5  ;;  %v236_v27 = vld [vmem:[%s4624_s30 + $0x8] sm:$0x1]  ;;  %v708_v28 = vrot.slane %v205_v23, 5 }
  0x23   : > { %v901_v29 = vor.u32 %v900_v19, %v897_v14  ;;  %v1321_v30 = vsel %vm4648_vm2, %v3781_v21, %v1320_v22  ;;  %v1322_v31 = vrot.slane %v1320_v22, 4  ;;  %v639_v32 = vld [vmem:[%s4624_s30] sm:$0xe]  ;;  %v711_v33 = vrot.slane %v236_v27, 5  ;;  %v207_v34 = vld [vmem:[%s4624_s30 + $0x10] sm:$0xf] }
  0x24   : > { %v877_v35 = vor.u32 %v876_v25, %v873_v24  ;;  %v3701_v36 = vrot.slane %v639_v32, 9  ;;  %v710_v37 = vrot.slane %v708_v28, 4  ;;  %v237_v38 = vld [vmem:[%s4624_s30 + $0x14] sm:$0x1]  ;;  %v640_v39 = vld [vmem:[%s4624_s30 + $0xc] sm:$0xe] }
  0x25   : > { %v4666_v40 = vrot.slane %v901_v29, 4  ;;  %v1324_v41 = vsel %vm4648_vm2, %v1322_v31, %v1323_v26  ;;  %v3702_v42 = vrot.slane %v640_v39, 9  ;;  %v715_v43 = vrot.slane %v207_v34, 5  ;;  %v204_v44 = vld [vmem:[%s4624_s30] sm:$0xf] }
  0x26   : > { %v4671_v45 = vrot.slane %v877_v35, 4  ;;  %v3957_v46 = vcombine.low %v1321_v30, %v1324_v41  ;;  %v709_v47 = vsel %vm4648_vm2, %v3701_v36, %v708_v28  ;;  %v712_v48 = vsel %vm4648_vm2, %v710_v37, %v711_v33  ;;  %v3766_v49 = vld [vmem:[%s4624_s30 + $0x18] sm:$0xe]  ;;  %v3750_v58 = vld [vmem:[%s4624_s30 + $0x20] sm:$0x1] }
  0x27   : > { %v3909_v50 = vcombine.low %v709_v47, %v712_v48  ;;  %v716_v51 = vsel %vm4648_vm2, %v3702_v42, %v715_v43  ;;  %v717_v52 = vrot.slane %v715_v43, 4  ;;  %v718_v53 = vrot.slane %v237_v38, 5  ;;  %v206_v63 = vld [vmem:[%s4624_s30 + $0xc] sm:$0xf]  ;;  %v3799_v42 = vld [vmem:[%s4624_s30 + $0x24] sm:$0xf] }
  0x28   : > { %2490 = vrot.lane.b32.xlu0 %v3957_v46, %s4534_s5  ;;  %v256_v54 = vshrl.u32 %v204_v44, 16  ;;  %v259_v55 = vshll.u32 %v204_v44, 16  ;;  %v265_v56 = vshll.u32 %v205_v23, 16  ;;  %v269_v57 = vshrl.u32 %v205_v23, 16 }
  0x29   : > { %2234 = vrot.lane.b32.xlu1 %v3909_v50, %s4535_s6  ;;  %v719_v59 = vsel %vm4648_vm2, %v717_v52, %v718_v53  ;;  %v275_v60 = vshll.u32 %v236_v27, 16  ;;  %v3782_v61 = vrot.slane %v3766_v49, 9  ;;  %v1327_v62 = vrot.slane %v4628_v1, 5 }
  0x2a   : > { %v3910_v0 = vcombine.low %v716_v51, %v719_v59  ;;  %v258_v2 = vrot.slane %v256_v54, 4  ;;  %v261_v4 = vrot.slane %v259_v55, 5  ;;  %v267_v5 = vrot.slane %v265_v56, 5  ;;  %v3797_v51 = vld [vmem:[%s4624_s30 + $0x18] sm:$0xf] }
  0x2b   : > { %v271_v6 = vrot.slane %v269_v57, 4  ;;  %v277_v8 = vrot.slane %v275_v60, 5  ;;  %v1328_v10 = vsel %vm4648_vm2, %v3782_v61, %v1327_v62  ;;  %v1329_v11 = vrot.slane %v1327_v62, 4  ;;  %v4734_v62 = vld [vmem:[%s4624_s30 + $0x2c] sm:$0x1] }
  0x2c   : > { %v262_v14 = vor.u32 %v261_v4, %v258_v2  ;;  %v1330_v15 = vrot.slane %v3750_v58, 5  ;;  %v280_v16 = vshrl.u32 %v206_v63, 16  ;;  %v283_v18 = vshll.u32 %v206_v63, 16 }
  0x2d   : > { %2236 = vrot.lane.b32.xlu1 %v3910_v0, %s4535_s6  ;;  %v272_v21 = vor.u32 %v271_v6, %v267_v5  ;;  %v289_v22 = vshll.u32 %v207_v34, 16  ;;  %v293_v23 = vshrl.u32 %v207_v34, 16  ;;  %v299_v24 = vshll.u32 %v237_v38, 16 }
  0x2e   : > { %v263_v25 = vrot.slane %v262_v14, 4  ;;  %v1331_v26 = vsel %vm4648_vm2, %v1329_v11, %v1330_v15  ;;  %v282_v27 = vrot.slane %v280_v16, 4  ;;  %v285_v28 = vrot.slane %v283_v18, 5  ;;  %v208_v14 = vld [vmem:[%s4624_s30 + $0x18] sm:$0xf] }
  0x2f   : > { %v273_v29 = vrot.slane %v272_v21, 4  ;;  %v3958_v30 = vcombine.low %v1328_v10, %v1331_v26  ;;  %v291_v31 = vrot.slane %v289_v22, 5  ;;  %v295_v32 = vrot.slane %v293_v23, 4  ;;  %v4751_v26 = vld [vmem:[%s4624_s30 + $0x1c] sm:$0xf] }
  0x30   : > { %v268_v33 = vsel %vm4692_vm5, %v263_v25, %v267_v5  ;;  %v286_v35 = vor.u32 %v285_v28, %v282_v27  ;;  %v301_v36 = vrot.slane %v299_v24, 5  ;;  %v906_v34 = vrot.slane %v904_v3, 5  ;;  %v4713_v3 = vld [vmem:[%s4624_s30 + $0x28] sm:$0xf]  ;;  %v4742_v5 = vld [vmem:[%s4624_s30 + $0x20] sm:$0x1] }
  0x31   : > { %v278_v37 = vsel %vm4692_vm5, %v273_v29, %v277_v8  ;;  %2492 = vrot.lane.b32.xlu1 %v3958_v30, %s4534_s5  ;;  %v296_v38 = vor.u32 %v295_v32, %v291_v31  ;;  %v914_v39 = vshll.u32 %v3750_v58, 16  ;;  %v882_v41 = vrot.slane %v880_v9, 5  ;;  %v4755_v30 = vld [vmem:[%s4624_s30 + $0x20] sm:$0x1] }
  0x32   : > { %v3893_v43 = vcombine.low %v268_v33, %v278_v37  ;;  %v287_v44 = vrot.slane %v286_v35, 4  ;;  %v907_v46 = vsel %vm4692_vm5, %v4666_v40, %v906_v34  ;;  %v911_v1 = vor.u32 %v4643_v13, %v906_v34  ;;  %v3845_v34 = vld [vmem:[%s4624_s30 + $0x18] sm:$0xe] }
  0x33   : > { %v297_v47 = vrot.slane %v296_v38, 4  ;;  %v916_v48 = vrot.slane %v914_v39, 5  ;;  %v883_v7 = vsel %vm4692_vm5, %v4671_v45, %v882_v41  ;;  %v887_v9 = vor.u32 %v4653_v20, %v882_v41  ;;  %v4728_v20 = vld [vmem:[%s4624_s30 + $0x1c] sm:$0xf] }
  0x34   : > { %2154 = vrot.lane.b32.xlu0 %v3893_v43, %s4536_s7  ;;  %v292_v49 = vsel %vm4692_vm5, %v287_v44, %v291_v31  ;;  %v912_v40 = vrot.slane %v911_v1, 4  ;;  %v890_v13 = vshll.u32 %v4641_v12, 16  ;;  %v1507_v50 = vshrl.u32 %v3799_v42, 16 }
  0x35   : > { %v302_v52 = vsel %vm4692_vm5, %v297_v47, %v301_v36  ;;  %v888_v53 = vrot.slane %v887_v9, 4  ;;  %v1510_v54 = vshll.u32 %v3799_v42, 16  ;;  %v1520_v45 = vshrl.u32 %v4713_v3, 16  ;;  %v210_v9 = vld [vmem:[%s4624_s30 + $0x24] sm:$0xf] }
  0x36   : > { %v3894_v55 = vcombine.low %v292_v49, %v302_v52  ;;  %v917_v56 = vsel %vm4692_vm5, %v912_v40, %v916_v48  ;;  %v892_v57 = vrot.slane %v890_v13, 5  ;;  %v1509_v58 = vrot.slane %v1507_v50, 4 }
  0x37   : > { %v3942_v12 = vcombine.low %v907_v46, %v917_v56  ;;  %v1512_v59 = vrot.slane %v1510_v54, 5  ;;  %v3974_v60 = vcombine.low %v3799_v42, %v4713_v3  ;;  %v1483_v61 = vshrl.u32 %v3797_v51, 16 }
  0x38   : > { %2156 = vrot.lane.b32.xlu0 %v3894_v55, %s4536_s7  ;;  %v893_v63 = vsel %vm4692_vm5, %v888_v53, %v892_v57  ;;  %v1486_v0 = vshll.u32 %v3797_v51, 16  ;;  %v1496_v2 = vshrl.u32 %v4728_v20, 16  ;;  %v3973_v4 = vcombine.low %v3797_v51, %v4728_v20  ;;  %v211_v51 = vld [vmem:[%s4624_s30 + $0x28] sm:$0xf] }
  0x39   : > { %2412 = vrot.lane.b32.xlu1 %v3942_v12, %s4537_s8  ;;  %v3941_v6 = vcombine.low %v883_v7, %v893_v63  ;;  %v1485_v8 = vrot.slane %v1483_v61, 4  ;;  %v1513_v10 = vor.u32 %v1512_v59, %v1509_v58  ;;  %v1516_v11 = vshll.u32 %v4713_v3, 16  ;;  %v239_v58 = vld [vmem:[%s4624_s30 + $0x2c] sm:$0x1] }
  0x3a   : > { %v1488_v15 = vrot.slane %v1486_v0, 5  ;;  %v1522_v16 = vrot.slane %v1520_v45, 4  ;;  %v1526_v18 = vshll.u32 %v4734_v62, 16  ;;  %v1492_v21 = vshll.u32 %v4728_v20, 16  ;;  %v3846_v0 = vld [vmem:[%s4624_s30 + $0x24] sm:$0xe] }
  0x3b   : > { %v1514_v22 = vrot.slane %v1513_v10, 4  ;;  %v1518_v23 = vrot.slane %v1516_v11, 5  ;;  %v1498_v24 = vrot.slane %v1496_v2, 4  ;;  %v1502_v25 = vshll.u32 %v4742_v5, 16 }
  0x3c   : > { %2410 = vrot.lane.b32.xlu0 %v3941_v6, %s4537_s8  ;;  %v1528_v27 = vrot.slane %v1526_v18, 5  ;;  %v1489_v28 = vor.u32 %v1488_v15, %v1485_v8  ;;  %v1494_v29 = vrot.slane %v1492_v21, 5  ;;  %v304_v31 = vshrl.u32 %v208_v14, 16  ;;  %v4360_v15 = vld [vmem:[%s6327_s1] sm:$0xff]  }
  0x3d   : > { %2588 = vrot.lane.b32.xlu1 %v3974_v60, %s4538_s9  ;;  %v1519_v32 = vsel %vm4692_vm5, %v1514_v22, %v1518_v23  ;;  %v1523_v33 = vor.u32 %v1522_v16, %v1518_v23  ;;  %v1504_v35 = vrot.slane %v1502_v25, 5  ;;  %v307_v36 = vshll.u32 %v208_v14, 16  ;;  %v642_v14 = vld [vmem:[%s4624_s30 + $0x24] sm:$0xe]  ;;  %4226 = vmatprep.subr.bf16.mxu0 %v4360_v15 }
  0x3e   : > { %v1490_v37 = vrot.slane %v1489_v28, 4  ;;  %v1499_v38 = vor.u32 %v1498_v24, %v1494_v29  ;;  %v306_v39 = vrot.slane %v304_v31, 4  ;;  %v313_v41 = vshll.u32 %v4751_v26, 16  ;;  %v641_v28 = vld [vmem:[%s4624_s30 + $0x18] sm:$0xe]  ;;  %4264 = vmatprep.subr.bf16.mxu1 %v4360_v15  ;;  %4227 = vmatpush3.bf16.msra.mxu0 %v4360_v15 }
  0x3f   : > { %v1524_v42 = vrot.slane %v1523_v33, 4  ;;  %v309_v43 = vrot.slane %v307_v36, 5  ;;  %v317_v44 = vshrl.u32 %v4751_v26, 16  ;;  %v323_v46 = vshll.u32 %v4755_v30, 16  ;;  %4267 = vmatpush3.bf16.msra.mxu1 %v4360_v15  ;;  %v3767_v15 = vld [vmem:[%s4624_s30 + $0x24] sm:$0xe] }
  0x40   : > { %2586 = vrot.lane.b32.xlu0 %v3973_v4, %s4538_s9  ;;  %v1495_v1 = vsel %vm4692_vm5, %v1490_v37, %v1494_v29  ;;  %v1500_v47 = vrot.slane %v1499_v38, 4  ;;  %v315_v48 = vrot.slane %v313_v41, 5  ;;  %v3861_v7 = vrot.slane %v3845_v34, 9  ;;  %v4799_v37 = vld [vmem:[%s4624_s30 + $0x30] sm:$0xf]  ;;  %v4363_v38 = vld [vmem:[%s6327_s1 + $0x8] sm:$0xff]  }
  0x41   : > { %v1529_v49 = vsel %vm4692_vm5, %v1524_v42, %v1528_v27  ;;  %v310_v40 = vor.u32 %v309_v43, %v306_v39  ;;  %v319_v13 = vrot.slane %v317_v44, 4  ;;  %v325_v50 = vrot.slane %v323_v46, 5  ;;  %4228 = vmatprep.subr.bf16.mxu0 %v4363_v38  ;;  %4265 = vmatprep.subr.bf16.mxu1 %v4363_v38 }
  0x42   : > { %v3990_v52 = vcombine.low %v1519_v32, %v1529_v49  ;;  %v1505_v53 = vsel %vm4692_vm5, %v1500_v47, %v1504_v35  ;;  %v1932_v54 = vrot.slane %v4728_v20, 5  ;;  %v1935_v45 = vrot.slane %v4742_v5, 5  ;;  %v4813_v47 = vld [vmem:[%s4624_s30 + $0x34] sm:$0xf]  ;;  %4229 = vmatpush3.bf16.msra.mxu0 %v4363_v38 }
  0x43   : > { %v3989_v55 = vcombine.low %v1495_v1, %v1505_v53  ;;  %v311_v56 = vrot.slane %v310_v40, 4  ;;  %v320_v57 = vor.u32 %v319_v13, %v315_v48  ;;  %v328_v12 = vshrl.u32 %v210_v9, 16  ;;  %v3721_v40 = vld [vmem:[%s4624_s30 + $0x24] sm:$0xf]  ;;  %v4822_v13 = vld [vmem:[%s4624_s30 + $0x28] sm:$0xf]  ;;  %4268 = vmatpush3.bf16.msra.mxu1 %v4363_v38 }
  0x44   : > { %2668 = vrot.lane.b32.xlu1 %v3990_v52, %s4539_s10  ;;  %v1933_v59 = vsel %vm4648_vm2, %v3861_v7, %v1932_v54  ;;  %v1934_v60 = vrot.slane %v1932_v54, 4  ;;  %v331_v61 = vshll.u32 %v210_v9, 16  ;;  %v337_v63 = vshll.u32 %v211_v51, 16 }
  0x45   : > { %2666 = vrot.lane.b32.xlu0 %v3989_v55, %s4539_s10  ;;  %v316_v20 = vsel %vm4692_vm5, %v311_v56, %v315_v48  ;;  %v321_v2 = vrot.slane %v320_v57, 4  ;;  %v330_v4 = vrot.slane %v328_v12, 4  ;;  %v341_v5 = vshrl.u32 %v211_v51, 16  ;;  %v3752_v55 = vld [vmem:[%s4624_s30 + $0x38] sm:$0x1] }
  0x46   : > { %v1936_v6 = vsel %vm4648_vm2, %v1934_v60, %v1935_v45  ;;  %v333_v8 = vrot.slane %v331_v61, 5  ;;  %v339_v10 = vrot.slane %v337_v63, 5  ;;  %v347_v11 = vshll.u32 %v239_v58, 16 }
  0x47   : > { %v326_v16 = vsel %vm4692_vm5, %v321_v2, %v325_v50  ;;  %v4005_v18 = vcombine.low %v1933_v59, %v1936_v6  ;;  %v343_v21 = vrot.slane %v341_v5, 4  ;;  %v3862_v22 = vrot.slane %v3846_v0, 9  ;;  %v3751_v0 = vld [vmem:[%s4624_s30 + $0x2c] sm:$0x1] }
  0x48   : > { %v3895_v23 = vcombine.low %v316_v20, %v326_v16  ;;  %v334_v24 = vor.u32 %v333_v8, %v330_v4  ;;  %v349_v25 = vrot.slane %v347_v11, 5  ;;  %v1939_v27 = vrot.slane %v4713_v3, 5  ;;  %v3768_v20 = vld [vmem:[%s4624_s30 + $0x30] sm:$0xe] }
  0x49   : > { %2746 = vrot.lane.b32.xlu0 %v4005_v18, %s4540_s19  ;;  %v344_v29 = vor.u32 %v343_v21, %v339_v10  ;;  %v1942_v31 = vrot.slane %v4734_v62, 5  ;;  %v3704_v32 = vrot.slane %v642_v14, 9  ;;  %v729_v33 = vrot.slane %v211_v51, 5 }
  0x4a   : > { %2158 = vrot.lane.b32.xlu1 %v3895_v23, %s4536_s7  ;;  %v335_v35 = vrot.slane %v334_v24, 4  ;;  %v1940_v3 = vsel %vm4648_vm2, %v3862_v22, %v1939_v27  ;;  %v1941_v36 = vrot.slane %v1939_v27, 4  ;;  %v732_v34 = vrot.slane %v239_v58, 5 }
  0x4b   : > { %v345_v62 = vrot.slane %v344_v29, 4  ;;  %v730_v39 = vsel %vm4648_vm2, %v3704_v32, %v729_v33  ;;  %v731_v41 = vrot.slane %v729_v33, 4  ;;  %v3703_v42 = vrot.slane %v641_v28, 9  ;;  %v4846_v33 = vld [vmem:[%s4624_s30 + $0x3c] sm:$0xf] }
  0x4c   : > { %v340_v43 = vsel %vm4692_vm5, %v335_v35, %v339_v10  ;;  %v1943_v44 = vsel %vm4648_vm2, %v1941_v36, %v1942_v31  ;;  %v722_v46 = vrot.slane %v4751_v26, 5  ;;  %v725_v1 = vrot.slane %v4755_v30, 5 }
  0x4d   : > { %v350_v48 = vsel %vm4692_vm5, %v345_v62, %v349_v25  ;;  %v4006_v7 = vcombine.low %v1940_v3, %v1943_v44  ;;  %v733_v9 = vsel %vm4648_vm2, %v731_v41, %v732_v34  ;;  %v943_v49 = vshrl.u32 %v4799_v37, 16 }
  0x4e   : > { %v3896_v26 = vcombine.low %v340_v43, %v350_v48  ;;  %v3912_v30 = vcombine.low %v730_v39, %v733_v9  ;;  %v723_v50 = vsel %vm4648_vm2, %v3703_v42, %v722_v46  ;;  %v724_v51 = vrot.slane %v722_v46, 4  ;;  %v4860_v43 = vld [vmem:[%s4624_s30 + $0x40] sm:$0xf]  ;;  %v3801_v9 = vld [vmem:[%s4624_s30 + $0x30] sm:$0xf] }
  0x4f   : > { %2748 = vrot.lane.b32.xlu0 %v4006_v7, %s4540_s19  ;;  %v945_v52 = vrot.slane %v943_v49, 4  ;;  %v946_v53 = vshll.u32 %v4799_v37, 16  ;;  %v956_v54 = vshrl.u32 %v4813_v47, 16  ;;  %v3928_v45 = vcombine.low %v4799_v37, %v4813_v47  ;;  %v4870_v49 = vld [vmem:[%s4624_s30 + $0x34] sm:$0xf] }
  0x50   : > { %2160 = vrot.lane.b32.xlu1 %v3896_v26, %s4536_s7  ;;  %v726_v56 = vsel %vm4648_vm2, %v724_v51, %v725_v1  ;;  %v919_v57 = vshrl.u32 %v3721_v40, 16  ;;  %v922_v58 = vshll.u32 %v3721_v40, 16  ;;  %v932_v12 = vshrl.u32 %v4822_v13, 16 }
  0x51   : > { %v3911_v59 = vcombine.low %v723_v50, %v726_v56  ;;  %v948_v60 = vrot.slane %v946_v53, 5  ;;  %v3927_v61 = vcombine.low %v3721_v40, %v4822_v13  ;;  %v952_v63 = vshll.u32 %v4813_v47, 16 }
  0x52   : > { %v921_v2 = vrot.slane %v919_v57, 4  ;;  %v924_v4 = vrot.slane %v922_v58, 5  ;;  %v958_v5 = vrot.slane %v956_v54, 4  ;;  %v962_v6 = vshll.u32 %v3752_v55, 16  ;;  %v4881_v54 = vld [vmem:[%s4624_s30 + $0x44] sm:$0x1] }
  0x53   : > { %2238 = vrot.lane.b32.xlu0 %v3911_v59, %s4535_s6  ;;  %v949_v8 = vor.u32 %v948_v60, %v945_v52  ;;  %v954_v10 = vrot.slane %v952_v63, 5  ;;  %v928_v11 = vshll.u32 %v4822_v13, 16  ;;  %v934_v14 = vrot.slane %v932_v12, 4  ;;  %v4885_v58 = vld [vmem:[%s4624_s30 + $0x38] sm:$0x1] }
  0x54   : > { %2240 = vrot.lane.b32.xlu1 %v3912_v30, %s4535_s6  ;;  %v964_v16 = vrot.slane %v962_v6, 5  ;;  %v925_v18 = vor.u32 %v924_v4, %v921_v2  ;;  %v938_v21 = vshll.u32 %v3751_v0, 16  ;;  %v3784_v22 = vrot.slane %v3768_v20, 9  ;;  %v212_v63 = vld [vmem:[%s4624_s30 + $0x30] sm:$0xf] }
  0x55   : > { %v950_v23 = vrot.slane %v949_v8, 4  ;;  %v959_v24 = vor.u32 %v958_v5, %v954_v10  ;;  %v930_v25 = vrot.slane %v928_v11, 5  ;;  %v1341_v27 = vrot.slane %v4813_v47, 5  ;;  %v4896_v11 = vld [vmem:[%s4624_s30 + $0x34] sm:$0xf] }
  0x56   : > { %v926_v28 = vrot.slane %v925_v18, 4  ;;  %v940_v29 = vrot.slane %v938_v21, 5  ;;  %v1344_v31 = vrot.slane %v3752_v55, 5  ;;  %v3783_v32 = vrot.slane %v3767_v15, 9  ;;  %v4899_v18 = vld [vmem:[%s4624_s30 + $0x38] sm:$0x1] }
  0x57   : > { %2334 = vrot.lane.b32.xlu0 %v3927_v61, %s4533_s4  ;;  %v955_v35 = vsel %vm4692_vm5, %v950_v23, %v954_v10  ;;  %v960_v3 = vrot.slane %v959_v24, 4  ;;  %v935_v36 = vor.u32 %v934_v14, %v930_v25  ;;  %v1342_v34 = vsel %vm4648_vm2, %v3784_v22, %v1341_v27 }
  0x58   : > { %2336 = vrot.lane.b32.xlu1 %v3928_v45, %s4533_s4  ;;  %v931_v37 = vsel %vm4692_vm5, %v926_v28, %v930_v25  ;;  %v1343_v38 = vrot.slane %v1341_v27, 4  ;;  %v1334_v62 = vrot.slane %v4822_v13, 5  ;;  %v1337_v39 = vrot.slane %v3751_v0, 5  ;;  %v3847_v27 = vld [vmem:[%s4624_s30 + $0x30] sm:$0xe] }
  0x59   : > { %v965_v41 = vsel %vm4692_vm5, %v960_v3, %v964_v16  ;;  %v936_v42 = vrot.slane %v935_v36, 4  ;;  %v1555_v44 = vshrl.u32 %v4846_v33, 16  ;;  %v1558_v46 = vshll.u32 %v4846_v33, 16 }
  0x5a   : > { %v3944_v1 = vcombine.low %v955_v35, %v965_v41  ;;  %v1345_v47 = vsel %vm4648_vm2, %v1343_v38, %v1344_v31  ;;  %v1335_v48 = vsel %vm4648_vm2, %v3783_v32, %v1334_v62  ;;  %v1336_v7 = vrot.slane %v1334_v62, 4 }
  0x5b   : > { %v941_v40 = vsel %vm4692_vm5, %v936_v42, %v940_v29  ;;  %v3960_v13 = vcombine.low %v1342_v34, %v1345_v47  ;;  %v1557_v26 = vrot.slane %v1555_v44, 4  ;;  %v1560_v30 = vrot.slane %v1558_v46, 5 }
  0x5c   : > { %2416 = vrot.lane.b32.xlu1 %v3944_v1, %s4537_s8  ;;  %v3943_v50 = vcombine.low %v931_v37, %v941_v40  ;;  %v1338_v51 = vsel %vm4648_vm2, %v1336_v7, %v1337_v39  ;;  %v1568_v52 = vshrl.u32 %v4860_v43, 16  ;;  %v3976_v53 = vcombine.low %v4846_v33, %v4860_v43  ;;  %v214_v39 = vld [vmem:[%s4624_s30 + $0x3c] sm:$0xf]  ;;  %v215_v1 = vld [vmem:[%s4624_s30 + $0x40] sm:$0xf] }
  0x5d   : > { %v3959_v45 = vcombine.low %v1335_v48, %v1338_v51  ;;  %v1531_v55 = vshrl.u32 %v3801_v9, 16  ;;  %v1534_v56 = vshll.u32 %v3801_v9, 16  ;;  %v1544_v57 = vshrl.u32 %v4870_v49, 16 }
  0x5e   : > { %2414 = vrot.lane.b32.xlu0 %v3943_v50, %s4537_s8  ;;  %v3975_v12 = vcombine.low %v3801_v9, %v4870_v49  ;;  %v1561_v59 = vor.u32 %v1560_v30, %v1557_v26  ;;  %v1564_v60 = vshll.u32 %v4860_v43, 16  ;;  %v1570_v61 = vrot.slane %v1568_v52, 4  ;;  %v241_v30 = vld [vmem:[%s4624_s30 + $0x44] sm:$0x1] }
  0x5f   : > { %v1533_v0 = vrot.slane %v1531_v55, 4  ;;  %v1536_v20 = vrot.slane %v1534_v56, 5  ;;  %v1574_v2 = vshll.u32 %v4881_v54, 16  ;;  %v1540_v4 = vshll.u32 %v4870_v49, 16  ;;  %v3848_v55 = vld [vmem:[%s4624_s30 + $0x3c] sm:$0xe] }
  0x60   : > { %2496 = vrot.lane.b32.xlu1 %v3960_v13, %s4534_s5  ;;  %v1562_v5 = vrot.slane %v1561_v59, 4  ;;  %v1566_v6 = vrot.slane %v1564_v60, 5  ;;  %v1546_v8 = vrot.slane %v1544_v57, 4  ;;  %v1550_v10 = vshll.u32 %v4885_v58, 16 }
  0x61   : > { %v1576_v14 = vrot.slane %v1574_v2, 5  ;;  %v1537_v15 = vor.u32 %v1536_v20, %v1533_v0  ;;  %v1542_v16 = vrot.slane %v1540_v4, 5  ;;  %v352_v21 = vshrl.u32 %v212_v63, 16 }
  0x62   : > { %2494 = vrot.lane.b32.xlu0 %v3959_v45, %s4534_s5  ;;  %v1567_v22 = vsel %vm4692_vm5, %v1562_v5, %v1566_v6  ;;  %v1571_v23 = vor.u32 %v1570_v61, %v1566_v6  ;;  %v1552_v24 = vrot.slane %v1550_v10, 5  ;;  %v355_v25 = vshll.u32 %v212_v63, 16  ;;  %v644_v63 = vld [vmem:[%s4624_s30 + $0x3c] sm:$0xe] }
  0x63   : > { %v1538_v28 = vrot.slane %v1537_v15, 4  ;;  %v1547_v29 = vor.u32 %v1546_v8, %v1542_v16  ;;  %v354_v31 = vrot.slane %v352_v21, 4  ;;  %v361_v32 = vshll.u32 %v4896_v11, 16 }
  0x64   : > { %2592 = vrot.lane.b32.xlu1 %v3976_v53, %s4538_s9  ;;  %v1572_v33 = vrot.slane %v1571_v23, 4  ;;  %v357_v35 = vrot.slane %v355_v25, 5  ;;  %v365_v3 = vshrl.u32 %v4896_v11, 16  ;;  %v371_v36 = vshll.u32 %v4899_v18, 16 }
  0x65   : > { %v1543_v34 = vsel %vm4692_vm5, %v1538_v28, %v1542_v16  ;;  %v1548_v37 = vrot.slane %v1547_v29, 4  ;;  %v363_v38 = vrot.slane %v361_v32, 5  ;;  %v3863_v62 = vrot.slane %v3847_v27, 9 }
  0x66   : > { %2590 = vrot.lane.b32.xlu0 %v3975_v12, %s4538_s9  ;;  %v1577_v41 = vsel %vm4692_vm5, %v1572_v33, %v1576_v14  ;;  %v358_v42 = vor.u32 %v357_v35, %v354_v31  ;;  %v367_v44 = vrot.slane %v365_v3, 4  ;;  %v373_v46 = vrot.slane %v371_v36, 5  ;;  %v643_v14 = vld [vmem:[%s4624_s30 + $0x30] sm:$0xe]  ;;  %v3728_v36 = vld [vmem:[%s4624_s30 + $0x4c] sm:$0xf] }
  0x67   : > { %v3992_v47 = vcombine.low %v1567_v22, %v1577_v41  ;;  %v1553_v48 = vsel %vm4692_vm5, %v1548_v37, %v1552_v24  ;;  %v1946_v7 = vrot.slane %v4870_v49, 5  ;;  %v1949_v9 = vrot.slane %v4885_v58, 5  ;;  %v4959_v41 = vld [vmem:[%s4624_s30 + $0x40] sm:$0xf] }
  0x68   : > { %v3991_v40 = vcombine.low %v1543_v34, %v1553_v48  ;;  %v359_v13 = vrot.slane %v358_v42, 4  ;;  %v368_v26 = vor.u32 %v367_v44, %v363_v38  ;;  %v376_v50 = vshrl.u32 %v214_v39, 16 }
  0x69   : > { %2672 = vrot.lane.b32.xlu1 %v3992_v47, %s4539_s10  ;;  %v1947_v51 = vsel %vm4648_vm2, %v3863_v62, %v1946_v7  ;;  %v1948_v52 = vrot.slane %v1946_v7, 4  ;;  %v379_v53 = vshll.u32 %v214_v39, 16  ;;  %v385_v45 = vshll.u32 %v215_v1, 16  ;;  %v3725_v39 = vld [vmem:[%s4624_s30 + $0x3c] sm:$0xf] }
  0x6a   : > { %2670 = vrot.lane.b32.xlu0 %v3991_v40, %s4539_s10  ;;  %v364_v49 = vsel %vm4692_vm5, %v359_v13, %v363_v38  ;;  %v369_v56 = vrot.slane %v368_v26, 4  ;;  %v378_v57 = vrot.slane %v376_v50, 4  ;;  %v389_v58 = vshrl.u32 %v215_v1, 16  ;;  %v3754_v7 = vld [vmem:[%s4624_s30 + $0x50] sm:$0x1] }
  0x6b   : > { %v1950_v12 = vsel %vm4648_vm2, %v1948_v52, %v1949_v9  ;;  %v381_v59 = vrot.slane %v379_v53, 5  ;;  %v387_v60 = vrot.slane %v385_v45, 5  ;;  %v395_v61 = vshll.u32 %v241_v30, 16  ;;  %v3753_v53 = vld [vmem:[%s4624_s30 + $0x44] sm:$0x1] }
  0x6c   : > { %v374_v0 = vsel %vm4692_vm5, %v369_v56, %v373_v46  ;;  %v4007_v20 = vcombine.low %v1947_v51, %v1950_v12  ;;  %v391_v2 = vrot.slane %v389_v58, 4  ;;  %v3864_v4 = vrot.slane %v3848_v55, 9  ;;  %v3770_v45 = vld [vmem:[%s4624_s30 + $0x48] sm:$0xe] }
  0x6d   : > { %v3897_v5 = vcombine.low %v364_v49, %v374_v0  ;;  %v382_v6 = vor.u32 %v381_v59, %v378_v57  ;;  %v397_v8 = vrot.slane %v395_v61, 5  ;;  %v1953_v10 = vrot.slane %v4860_v43, 5  ;;  %v4941_v43 = vld [vmem:[%s4624_s30 + $0x48] sm:$0xf]  ;;  %v3769_v61 = vld [vmem:[%s4624_s30 + $0x3c] sm:$0xe] }
  0x6e   : > { %2750 = vrot.lane.b32.xlu0 %v4007_v20, %s4540_s19  ;;  %v392_v15 = vor.u32 %v391_v2, %v387_v60  ;;  %v1956_v16 = vrot.slane %v4881_v54, 5  ;;  %v3706_v21 = vrot.slane %v644_v63, 9  ;;  %v743_v22 = vrot.slane %v215_v1, 5 }
  0x6f   : > { %2162 = vrot.lane.b32.xlu1 %v3897_v5, %s4536_s7  ;;  %v383_v23 = vrot.slane %v382_v6, 4  ;;  %v1954_v24 = vsel %vm4648_vm2, %v3864_v4, %v1953_v10  ;;  %v1955_v25 = vrot.slane %v1953_v10, 4  ;;  %v746_v27 = vrot.slane %v241_v30, 5 }
  0x70   : > { %v393_v28 = vrot.slane %v392_v15, 4  ;;  %v744_v29 = vsel %vm4648_vm2, %v3706_v21, %v743_v22  ;;  %v745_v54 = vrot.slane %v743_v22, 4  ;;  %v3705_v31 = vrot.slane %v643_v14, 9  ;;  %v4979_v21 = vld [vmem:[%s4624_s30 + $0x54] sm:$0xf] }
  0x71   : > { %v388_v32 = vsel %vm4692_vm5, %v383_v23, %v387_v60  ;;  %v1957_v33 = vsel %vm4648_vm2, %v1955_v25, %v1956_v16  ;;  %v736_v35 = vrot.slane %v4896_v11, 5  ;;  %v739_v3 = vrot.slane %v4899_v18, 5 }
  0x72   : > { %v398_v34 = vsel %vm4692_vm5, %v393_v28, %v397_v8  ;;  %v4008_v37 = vcombine.low %v1954_v24, %v1957_v33  ;;  %v747_v38 = vsel %vm4648_vm2, %v745_v54, %v746_v27  ;;  %v991_v62 = vshrl.u32 %v4941_v43, 16 }
  0x73   : > { %v3898_v42 = vcombine.low %v388_v32, %v398_v34  ;;  %v3914_v44 = vcombine.low %v744_v29, %v747_v38  ;;  %v737_v11 = vsel %vm4648_vm2, %v3705_v31, %v736_v35  ;;  %v738_v18 = vrot.slane %v736_v35, 4  ;;  %v4993_v32 = vld [vmem:[%s4624_s30 + $0x58] sm:$0xf]  ;;  %v3805_v38 = vld [vmem:[%s4624_s30 + $0x48] sm:$0xf] }
  0x74   : > { %2752 = vrot.lane.b32.xlu0 %v4008_v37, %s4540_s19  ;;  %v993_v46 = vrot.slane %v991_v62, 4  ;;  %v994_v1 = vshll.u32 %v4941_v43, 16  ;;  %v1004_v47 = vshrl.u32 %v3728_v36, 16  ;;  %v3930_v48 = vcombine.low %v4941_v43, %v3728_v36  ;;  %v5003_v62 = vld [vmem:[%s4624_s30 + $0x4c] sm:$0xf] }
  0x75   : > { %2164 = vrot.lane.b32.xlu1 %v3898_v42, %s4536_s7  ;;  %v740_v9 = vsel %vm4648_vm2, %v738_v18, %v739_v3  ;;  %v967_v40 = vshrl.u32 %v3725_v39, 16  ;;  %v970_v13 = vshll.u32 %v3725_v39, 16  ;;  %v980_v26 = vshrl.u32 %v4959_v41, 16 }
  0x76   : > { %v3913_v30 = vcombine.low %v737_v11, %v740_v9  ;;  %v996_v50 = vrot.slane %v994_v1, 5  ;;  %v3929_v51 = vcombine.low %v3725_v39, %v4959_v41  ;;  %v1000_v52 = vshll.u32 %v3728_v36, 16 }
  0x77   : > { %v969_v55 = vrot.slane %v967_v40, 4  ;;  %v972_v49 = vrot.slane %v970_v13, 5  ;;  %v1006_v56 = vrot.slane %v1004_v47, 4  ;;  %v1010_v57 = vshll.u32 %v3754_v7, 16  ;;  %v5014_v47 = vld [vmem:[%s4624_s30 + $0x5c] sm:$0x1] }
  0x78   : > { %2242 = vrot.lane.b32.xlu0 %v3913_v30, %s4535_s6  ;;  %v997_v58 = vor.u32 %v996_v50, %v993_v46  ;;  %v1002_v12 = vrot.slane %v1000_v52, 5  ;;  %v976_v59 = vshll.u32 %v4959_v41, 16  ;;  %v982_v60 = vrot.slane %v980_v26, 4  ;;  %v5018_v13 = vld [vmem:[%s4624_s30 + $0x50] sm:$0x1] }
  0x79   : > { %2244 = vrot.lane.b32.xlu1 %v3914_v44, %s4535_s6  ;;  %v1012_v63 = vrot.slane %v1010_v57, 5  ;;  %v973_v0 = vor.u32 %v972_v49, %v969_v55  ;;  %v986_v20 = vshll.u32 %v3753_v53, 16  ;;  %v3786_v2 = vrot.slane %v3770_v45, 9  ;;  %v216_v52 = vld [vmem:[%s4624_s30 + $0x48] sm:$0xf] }
  0x7a   : > { %v998_v4 = vrot.slane %v997_v58, 4  ;;  %v1007_v5 = vor.u32 %v1006_v56, %v1002_v12  ;;  %v978_v6 = vrot.slane %v976_v59, 5  ;;  %v1355_v8 = vrot.slane %v3728_v36, 5  ;;  %v5029_v59 = vld [vmem:[%s4624_s30 + $0x4c] sm:$0xf] }
  0x7b   : > { %v974_v10 = vrot.slane %v973_v0, 4  ;;  %v988_v14 = vrot.slane %v986_v20, 5  ;;  %v1358_v15 = vrot.slane %v3754_v7, 5  ;;  %v3785_v16 = vrot.slane %v3769_v61, 9  ;;  %v5032_v0 = vld [vmem:[%s4624_s30 + $0x50] sm:$0x1] }
  0x7c   : > { %2338 = vrot.lane.b32.xlu0 %v3929_v51, %s4533_s4  ;;  %v1003_v22 = vsel %vm4692_vm5, %v998_v4, %v1002_v12  ;;  %v1008_v23 = vrot.slane %v1007_v5, 4  ;;  %v983_v24 = vor.u32 %v982_v60, %v978_v6  ;;  %v1356_v25 = vsel %vm4648_vm2, %v3786_v2, %v1355_v8 }
  0x7d   : > { %2340 = vrot.lane.b32.xlu1 %v3930_v48, %s4533_s4  ;;  %v979_v27 = vsel %vm4692_vm5, %v974_v10, %v978_v6  ;;  %v1357_v43 = vrot.slane %v1355_v8, 4  ;;  %v1348_v28 = vrot.slane %v4959_v41, 5  ;;  %v1351_v29 = vrot.slane %v3753_v53, 5  ;;  %v3849_v8 = vld [vmem:[%s4624_s30 + $0x48] sm:$0xe] }
  0x7e   : > { %v1013_v54 = vsel %vm4692_vm5, %v1008_v23, %v1012_v63  ;;  %v984_v31 = vrot.slane %v983_v24, 4  ;;  %v1603_v33 = vshrl.u32 %v4979_v21, 16  ;;  %v1606_v35 = vshll.u32 %v4979_v21, 16 }
  0x7f   : > { %v3946_v3 = vcombine.low %v1003_v22, %v1013_v54  ;;  %v1359_v36 = vsel %vm4648_vm2, %v1357_v43, %v1358_v15  ;;  %v1349_v34 = vsel %vm4648_vm2, %v3785_v16, %v1348_v28  ;;  %v1350_v37 = vrot.slane %v1348_v28, 4 }
  0x80   : > { %v989_v39 = vsel %vm4692_vm5, %v984_v31, %v988_v14  ;;  %v3962_v41 = vcombine.low %v1356_v25, %v1359_v36  ;;  %v1605_v42 = vrot.slane %v1603_v33, 4  ;;  %v1608_v44 = vrot.slane %v1606_v35, 5 }
  0x81   : > { %2420 = vrot.lane.b32.xlu1 %v3946_v3, %s4537_s8  ;;  %v3945_v11 = vcombine.low %v979_v27, %v989_v39  ;;  %v1352_v18 = vsel %vm4648_vm2, %v1350_v37, %v1351_v29  ;;  %v1616_v46 = vshrl.u32 %v4993_v32, 16  ;;  %v3978_v1 = vcombine.low %v4979_v21, %v4993_v32  ;;  %v218_v29 = vld [vmem:[%s4624_s30 + $0x54] sm:$0xf]  ;;  %v219_v3 = vld [vmem:[%s4624_s30 + $0x58] sm:$0xf] }
  0x82   : > { %v3961_v48 = vcombine.low %v1349_v34, %v1352_v18  ;;  %v1579_v7 = vshrl.u32 %v3805_v38, 16  ;;  %v1582_v9 = vshll.u32 %v3805_v38, 16  ;;  %v1592_v40 = vshrl.u32 %v5003_v62, 16 }
  0x83   : > { %2418 = vrot.lane.b32.xlu0 %v3945_v11, %s4537_s8  ;;  %v3977_v26 = vcombine.low %v3805_v38, %v5003_v62  ;;  %v1609_v30 = vor.u32 %v1608_v44, %v1605_v42  ;;  %v1612_v50 = vshll.u32 %v4993_v32, 16  ;;  %v1618_v51 = vrot.slane %v1616_v46, 4  ;;  %v243_v44 = vld [vmem:[%s4624_s30 + $0x5c] sm:$0x1] }
  0x84   : > { %v1581_v53 = vrot.slane %v1579_v7, 4  ;;  %v1584_v45 = vrot.slane %v1582_v9, 5  ;;  %v1622_v55 = vshll.u32 %v5014_v47, 16  ;;  %v1588_v49 = vshll.u32 %v5003_v62, 16  ;;  %v3850_v7 = vld [vmem:[%s4624_s30 + $0x54] sm:$0xe] }
  0x85   : > { %2500 = vrot.lane.b32.xlu1 %v3962_v41, %s4534_s5  ;;  %v1610_v56 = vrot.slane %v1609_v30, 4  ;;  %v1614_v57 = vrot.slane %v1612_v50, 5  ;;  %v1594_v58 = vrot.slane %v1592_v40, 4  ;;  %v1598_v12 = vshll.u32 %v5018_v13, 16 }
  0x86   : > { %v1624_v60 = vrot.slane %v1622_v55, 5  ;;  %v1585_v61 = vor.u32 %v1584_v45, %v1581_v53  ;;  %v1590_v63 = vrot.slane %v1588_v49, 5  ;;  %v400_v20 = vshrl.u32 %v216_v52, 16 }
  0x87   : > { %2498 = vrot.lane.b32.xlu0 %v3961_v48, %s4534_s5  ;;  %v1615_v2 = vsel %vm4692_vm5, %v1610_v56, %v1614_v57  ;;  %v1619_v4 = vor.u32 %v1618_v51, %v1614_v57  ;;  %v1600_v5 = vrot.slane %v1598_v12, 5  ;;  %v403_v6 = vshll.u32 %v216_v52, 16  ;;  %v646_v52 = vld [vmem:[%s4624_s30 + $0x54] sm:$0xe] }
  0x88   : > { %v1586_v10 = vrot.slane %v1585_v61, 4  ;;  %v1595_v14 = vor.u32 %v1594_v58, %v1590_v63  ;;  %v402_v15 = vrot.slane %v400_v20, 4  ;;  %v409_v16 = vshll.u32 %v5029_v59, 16 }
  0x89   : > { %2596 = vrot.lane.b32.xlu1 %v3978_v1, %s4538_s9  ;;  %v1620_v21 = vrot.slane %v1619_v4, 4  ;;  %v405_v22 = vrot.slane %v403_v6, 5  ;;  %v413_v23 = vshrl.u32 %v5029_v59, 16  ;;  %v419_v24 = vshll.u32 %v5032_v0, 16 }
  0x8a   : > { %v1591_v25 = vsel %vm4692_vm5, %v1586_v10, %v1590_v63  ;;  %v1596_v27 = vrot.slane %v1595_v14, 4  ;;  %v411_v43 = vrot.slane %v409_v16, 5  ;;  %v3865_v28 = vrot.slane %v3849_v8, 9  ;;  %v5074_v10 = vld [vmem:[%s4624_s30 + $0x60] sm:$0xf] }
  0x8b   : > { %2594 = vrot.lane.b32.xlu0 %v3977_v26, %s4538_s9  ;;  %v1625_v54 = vsel %vm4692_vm5, %v1620_v21, %v1624_v60  ;;  %v406_v31 = vor.u32 %v405_v22, %v402_v15  ;;  %v415_v33 = vrot.slane %v413_v23, 4  ;;  %v421_v35 = vrot.slane %v419_v24, 5  ;;  %v645_v60 = vld [vmem:[%s4624_s30 + $0x48] sm:$0xe] }
  0x8c   : > { %v3994_v36 = vcombine.low %v1615_v2, %v1625_v54  ;;  %v1601_v34 = vsel %vm4692_vm5, %v1596_v27, %v1600_v5  ;;  %v1960_v37 = vrot.slane %v5003_v62, 5  ;;  %v1963_v38 = vrot.slane %v5018_v13, 5  ;;  %v3729_v54 = vld [vmem:[%s4624_s30 + $0x54] sm:$0xf] }
  0x8d   : > { %v3993_v39 = vcombine.low %v1591_v25, %v1601_v34  ;;  %v407_v41 = vrot.slane %v406_v31, 4  ;;  %v416_v42 = vor.u32 %v415_v33, %v411_v43  ;;  %v424_v11 = vshrl.u32 %v218_v29, 16  ;;  %v5087_v25 = vld [vmem:[%s4624_s30 + $0x64] sm:$0xf]  ;;  %v5096_v31 = vld [vmem:[%s4624_s30 + $0x58] sm:$0xf] }
  0x8e   : > { %2676 = vrot.lane.b32.xlu1 %v3994_v36, %s4539_s10  ;;  %v1961_v18 = vsel %vm4648_vm2, %v3865_v28, %v1960_v37  ;;  %v1962_v46 = vrot.slane %v1960_v37, 4  ;;  %v427_v1 = vshll.u32 %v218_v29, 16  ;;  %v433_v48 = vshll.u32 %v219_v3, 16 }
  0x8f   : > { %2674 = vrot.lane.b32.xlu0 %v3993_v39, %s4539_s10  ;;  %v412_v62 = vsel %vm4692_vm5, %v407_v41, %v411_v43  ;;  %v417_v9 = vrot.slane %v416_v42, 4  ;;  %v426_v40 = vrot.slane %v424_v11, 4  ;;  %v437_v13 = vshrl.u32 %v219_v3, 16 }
  0x90   : > { %v1964_v26 = vsel %vm4648_vm2, %v1962_v46, %v1963_v38  ;;  %v429_v30 = vrot.slane %v427_v1, 5  ;;  %v435_v50 = vrot.slane %v433_v48, 5  ;;  %v443_v51 = vshll.u32 %v243_v44, 16  ;;  %v3756_v38 = vld [vmem:[%s4624_s30 + $0x68] sm:$0x1] }
  0x91   : > { %v422_v53 = vsel %vm4692_vm5, %v417_v9, %v421_v35  ;;  %v4009_v45 = vcombine.low %v1961_v18, %v1964_v26  ;;  %v439_v55 = vrot.slane %v437_v13, 4  ;;  %v3866_v49 = vrot.slane %v3850_v7, 9  ;;  %v3755_v7 = vld [vmem:[%s4624_s30 + $0x5c] sm:$0x1] }
  0x92   : > { %v3899_v56 = vcombine.low %v412_v62, %v422_v53  ;;  %v430_v57 = vor.u32 %v429_v30, %v426_v40  ;;  %v445_v58 = vrot.slane %v443_v51, 5  ;;  %v1967_v12 = vrot.slane %v4993_v32, 5  ;;  %v5078_v16 = vpop.permute.xlu1 %2332  ;;  %v3772_v62 = vld [vmem:[%s4624_s30 + $0x60] sm:$0xe] }
  0x93   : > { %2754 = vrot.lane.b32.xlu0 %v4009_v45, %s4540_s19  ;;  %v440_v61 = vor.u32 %v439_v55, %v435_v50  ;;  %v1970_v63 = vrot.slane %v5014_v47, 5  ;;  %v3708_v20 = vrot.slane %v646_v52, 9  ;;  %v757_v2 = vrot.slane %v219_v3, 5  ;;  %v5110_v11 = vpop.permute.xlu0 %2330  ;;  %v3771_v45 = vld [vmem:[%s4624_s30 + $0x54] sm:$0xe] }
  0x94   : > { %2166 = vrot.lane.b32.xlu1 %v3899_v56, %s4536_s7  ;;  %v431_v4 = vrot.slane %v430_v57, 4  ;;  %v1968_v5 = vsel %vm4648_vm2, %v3866_v49, %v1967_v12  ;;  %v1969_v6 = vrot.slane %v1967_v12, 4  ;;  %v760_v8 = vrot.slane %v243_v44, 5 }
  0x95   : > { %v441_v32 = vrot.slane %v440_v61, 4  ;;  %v758_v14 = vsel %vm4648_vm2, %v3708_v20, %v757_v2  ;;  %v759_v47 = vrot.slane %v757_v2, 4  ;;  %v3707_v15 = vrot.slane %v645_v60, 9 }
  0x96   : > { %v436_v21 = vsel %vm4692_vm5, %v431_v4, %v435_v50  ;;  %v1971_v22 = vsel %vm4648_vm2, %v1969_v6, %v1970_v63  ;;  %v750_v23 = vrot.slane %v5029_v59, 5  ;;  %v753_v24 = vrot.slane %v5032_v0, 5  ;;  %v5126_v6 = vld [vmem:[%s4624_s30 + $0x6c] sm:$0xf] }
  0x97   : > { %v446_v27 = vsel %vm4692_vm5, %v441_v32, %v445_v58  ;;  %v4010_v43 = vcombine.low %v1968_v5, %v1971_v22  ;;  %v761_v28 = vsel %vm4648_vm2, %v759_v47, %v760_v8  ;;  %v1039_v29 = vshrl.u32 %v5074_v10, 16 }
  0x98   : > { %v3900_v33 = vcombine.low %v436_v21, %v446_v27  ;;  %v3916_v35 = vcombine.low %v758_v14, %v761_v28  ;;  %v751_v59 = vsel %vm4648_vm2, %v3707_v15, %v750_v23  ;;  %v752_v0 = vrot.slane %v750_v23, 4  ;;  %v5142_v27 = vld [vmem:[%s4624_s30 + $0x70] sm:$0xf] }
  0x99   : > { %2756 = vrot.lane.b32.xlu0 %v4010_v43, %s4540_s19  ;;  %v1041_v3 = vrot.slane %v1039_v29, 4  ;;  %v1042_v36 = vshll.u32 %v5074_v10, 16  ;;  %v1052_v34 = vshrl.u32 %v5087_v25, 16  ;;  %v3932_v37 = vcombine.low %v5074_v10, %v5087_v25 }
  0x9a   : > { %2168 = vrot.lane.b32.xlu1 %v3900_v33, %s4536_s7  ;;  %v754_v39 = vsel %vm4648_vm2, %v752_v0, %v753_v24  ;;  %v1015_v41 = vshrl.u32 %v3729_v54, 16  ;;  %v1018_v42 = vshll.u32 %v3729_v54, 16  ;;  %v1028_v44 = vshrl.u32 %v5096_v31, 16  ;;  %v5128_v8 = vpop.permute.xlu0 %2490 }
  0x9b   : > { %v3915_v18 = vcombine.low %v751_v59, %v754_v39  ;;  %v1044_v46 = vrot.slane %v1042_v36, 5  ;;  %v3931_v1 = vcombine.low %v3729_v54, %v5096_v31  ;;  %v1048_v48 = vshll.u32 %v5087_v25, 16  ;;  %v5116_v9 = vpop.permute.xlu1 %2234  ;;  %v5154_v59 = vld [vmem:[%s4624_s30 + $0x64] sm:$0xf] }
  0x9c   : > { %v1017_v40 = vrot.slane %v1015_v41, 4  ;;  %v1020_v13 = vrot.slane %v1018_v42, 5  ;;  %v1054_v26 = vrot.slane %v1052_v34, 4  ;;  %v1058_v30 = vshll.u32 %v3756_v38, 16 }
  0x9d   : > { %2246 = vrot.lane.b32.xlu0 %v3915_v18, %s4535_s6  ;;  %v1045_v50 = vor.u32 %v1044_v46, %v1041_v3  ;;  %v1050_v51 = vrot.slane %v1048_v48, 5  ;;  %v1024_v52 = vshll.u32 %v5096_v31, 16  ;;  %v1030_v53 = vrot.slane %v1028_v44, 4  ;;  %v5167_v44 = vld [vmem:[%s4624_s30 + $0x74] sm:$0x1] }
  0x9e   : > { %2248 = vrot.lane.b32.xlu1 %v3916_v35, %s4535_s6  ;;  %v1060_v55 = vrot.slane %v1058_v30, 5  ;;  %v1021_v49 = vor.u32 %v1020_v13, %v1017_v40  ;;  %v1034_v56 = vshll.u32 %v3755_v7, 16  ;;  %v3788_v57 = vrot.slane %v3772_v62, 9  ;;  %v5151_v35 = vld [vmem:[%s4624_s30 + $0x60] sm:$0xf] }
  0x9f   : > { %v1046_v58 = vrot.slane %v1045_v50, 4  ;;  %v1055_v12 = vor.u32 %v1054_v26, %v1050_v51  ;;  %v1026_v60 = vrot.slane %v1024_v52, 5  ;;  %v1369_v61 = vrot.slane %v5087_v25, 5  ;;  %v5123_v63 = vpop.permute.xlu1 %2236  ;;  %v5173_v62 = vld [vmem:[%s4624_s30 + $0x68] sm:$0x1] }
  0xa0   : > { %v1022_v20 = vrot.slane %v1021_v49, 4  ;;  %v1036_v2 = vrot.slane %v1034_v56, 5  ;;  %v1372_v4 = vrot.slane %v3756_v38, 5  ;;  %v3787_v5 = vrot.slane %v3771_v45, 9 }
  0xa1   : > { %2342 = vrot.lane.b32.xlu0 %v3931_v1, %s4533_s4  ;;  %v1051_v10 = vsel %vm4692_vm5, %v1046_v58, %v1050_v51  ;;  %v1056_v32 = vrot.slane %v1055_v12, 4  ;;  %v1031_v14 = vor.u32 %v1030_v53, %v1026_v60  ;;  %v1370_v47 = vsel %vm4648_vm2, %v3788_v57, %v1369_v61 }
  0xa2   : > { %2344 = vrot.lane.b32.xlu1 %v3932_v37, %s4533_s4  ;;  %v1027_v15 = vsel %vm4692_vm5, %v1022_v20, %v1026_v60  ;;  %v1371_v21 = vrot.slane %v1369_v61, 4  ;;  %v1362_v22 = vrot.slane %v5096_v31, 5  ;;  %v1365_v23 = vrot.slane %v3755_v7, 5  ;;  %v4393_v61 = vld [vmem:[%s4624_s30 + $0x4] sm:$0xf] }
  0xa3   : > { %v1061_v24 = vsel %vm4692_vm5, %v1056_v32, %v1060_v55  ;;  %v1032_v25 = vrot.slane %v1031_v14, 4  ;;  %v1651_v43 = vshrl.u32 %v5126_v6, 16  ;;  %v1654_v28 = vshll.u32 %v5126_v6, 16  ;;  %v5158_v37 = vpop.permute.xlu1 %2492  ;;  %v4394_v20 = vld [vmem:[%s4624_s30] sm:$0xf] }
  0xa4   : > { %v3948_v29 = vcombine.low %v1051_v10, %v1061_v24  ;;  %v1373_v54 = vsel %vm4648_vm2, %v1371_v21, %v1372_v4  ;;  %v1363_v33 = vsel %vm4648_vm2, %v3787_v5, %v1362_v22  ;;  %v1364_v31 = vrot.slane %v1362_v22, 4  ;;  %v220_v4 = vld [vmem:[%s4624_s30 + $0x60] sm:$0xf]  ;;  %v5194_v14 = vld [vmem:[%s4624_s30 + $0x64] sm:$0xf] }
  0xa5   : > { %v1037_v0 = vsel %vm4692_vm5, %v1032_v25, %v1036_v2  ;;  %v3964_v3 = vcombine.low %v1370_v47, %v1373_v54  ;;  %v1653_v36 = vrot.slane %v1651_v43, 4  ;;  %v1656_v34 = vrot.slane %v1654_v28, 5  ;;  %v5198_v22 = vld [vmem:[%s4624_s30 + $0x68] sm:$0x1] }
  0xa6   : > { %2424 = vrot.lane.b32.xlu1 %v3948_v29, %s4537_s8  ;;  %v3947_v38 = vcombine.low %v1027_v15, %v1037_v0  ;;  %v1366_v39 = vsel %vm4648_vm2, %v1364_v31, %v1365_v23  ;;  %v1664_v41 = vshrl.u32 %v5142_v27, 16  ;;  %v3980_v42 = vcombine.low %v5126_v6, %v5142_v27  ;;  %v2155_v18 = vpop.permute.xlu0 %2154 }
  0xa7   : > { %v3963_v46 = vcombine.low %v1363_v33, %v1366_v39  ;;  %v1627_v1 = vshrl.u32 %v5151_v35, 16  ;;  %v1630_v48 = vshll.u32 %v5151_v35, 16  ;;  %v1640_v7 = vshrl.u32 %v5154_v59, 16 }
  0xa8   : > { %2422 = vrot.lane.b32.xlu0 %v3947_v38, %s4537_s8  ;;  %v3979_v40 = vcombine.low %v5151_v35, %v5154_v59  ;;  %v1657_v13 = vor.u32 %v1656_v34, %v1653_v36  ;;  %v1660_v26 = vshll.u32 %v5142_v27, 16  ;;  %v1666_v30 = vrot.slane %v1664_v41, 4  ;;  %v3851_v35 = vld [vmem:[%s4624_s30 + $0x60] sm:$0xe] }
  0xa9   : > { %v1629_v50 = vrot.slane %v1627_v1, 4  ;;  %v1632_v51 = vrot.slane %v1630_v48, 5  ;;  %v1670_v52 = vshll.u32 %v5167_v44, 16  ;;  %v1636_v53 = vshll.u32 %v5154_v59, 16 }
  0xaa   : > { %2504 = vrot.lane.b32.xlu1 %v3964_v3, %s4534_s5  ;;  %v1658_v45 = vrot.slane %v1657_v13, 4  ;;  %v1662_v55 = vrot.slane %v1660_v26, 5  ;;  %v1642_v49 = vrot.slane %v1640_v7, 4  ;;  %v1646_v56 = vshll.u32 %v5173_v62, 16  ;;  %v5183_v57 = vpop.permute.xlu0 %2156 }
  0xab   : > { %v1672_v58 = vrot.slane %v1670_v52, 5  ;;  %v1633_v12 = vor.u32 %v1632_v51, %v1629_v50  ;;  %v1638_v60 = vrot.slane %v1636_v53, 5  ;;  %v3877_v2 = vcombine.low %v4394_v20, %v4393_v61  ;;  %v5188_v5 = vpop.permute.xlu1 %2412  ;;  %v4395_v51 = vld [vmem:[%s4624_s30 + $0x10] sm:$0xf]  ;;  %v4396_v52 = vld [vmem:[%s4624_s30 + $0xc] sm:$0xf] }
  0xac   : > { %2502 = vrot.lane.b32.xlu0 %v3963_v46, %s4534_s5  ;;  %v1663_v6 = vsel %vm4692_vm5, %v1658_v45, %v1662_v55  ;;  %v1667_v10 = vor.u32 %v1666_v30, %v1662_v55  ;;  %v1648_v32 = vrot.slane %v1646_v56, 5  ;;  %v448_v25 = vshrl.u32 %v220_v4, 16  ;;  %v5222_v46 = vld [vmem:[%s4624_s30 + $0x70] sm:$0xf] }
  0xad   : > { %v1634_v47 = vrot.slane %v1633_v12, 4  ;;  %v1643_v15 = vor.u32 %v1642_v49, %v1638_v60  ;;  %v2781_v21 = vsel %vm2778_vm6, %v3877_v2, %v2155_v18  ;;  %v451_v43 = vshll.u32 %v220_v4, 16  ;;  %v222_v18 = vld [vmem:[%s4624_s30 + $0x6c] sm:$0xf] }
  0xae   : > { %2600 = vrot.lane.b32.xlu1 %v3980_v42, %s4538_s9  ;;  %v1668_v23 = vrot.slane %v1667_v10, 4  ;;  %v5203_v24 = vsel %vm2827_vm7, %v2781_v21, %v5116_v9  ;;  %v5205_v28 = vpop.permute.xlu0 %2410  ;;  %v457_v33 = vshll.u32 %v5194_v14, 16  ;;  %v461_v31 = vshrl.u32 %v5194_v14, 16 }
  0xaf   : > { %v1639_v29 = vsel %vm4692_vm5, %v1634_v47, %v1638_v60  ;;  %v1644_v54 = vrot.slane %v1643_v15, 4  ;;  %v450_v0 = vrot.slane %v448_v25, 4  ;;  %v453_v3 = vrot.slane %v451_v43, 5  ;;  %v5216_v34 = vpop.permute.xlu1 %2588 }
  0xb0   : > { %2598 = vrot.lane.b32.xlu0 %v3979_v40, %s4538_s9  ;;  %v1673_v9 = vsel %vm4692_vm5, %v1668_v23, %v1672_v58  ;;  %v467_v36 = vshll.u32 %v5198_v22, 16  ;;  %v459_v41 = vrot.slane %v457_v33, 5  ;;  %v463_v42 = vrot.slane %v461_v31, 4 }
  0xb1   : > { %v3996_v38 = vcombine.low %v1663_v6, %v1673_v9  ;;  %v1649_v39 = vsel %vm4692_vm5, %v1644_v54, %v1648_v32  ;;  %v454_v48 = vor.u32 %v453_v3, %v450_v0  ;;  %v3867_v40 = vrot.slane %v3851_v35, 9  ;;  %v3852_v6 = vld [vmem:[%s4624_s30 + $0x6c] sm:$0xe] }
  0xb2   : > { %v3995_v1 = vcombine.low %v1639_v29, %v1649_v39  ;;  %v469_v7 = vrot.slane %v467_v36, 5  ;;  %v5224_v13 = vpop.permute.xlu0 %2586  ;;  %v464_v26 = vor.u32 %v463_v42, %v459_v41  ;;  %v1974_v30 = vrot.slane %v5154_v59, 5  ;;  %v648_v35 = vld [vmem:[%s4624_s30 + $0x6c] sm:$0xe] }
  0xb3   : > { %2680 = vrot.lane.b32.xlu1 %v3996_v38, %s4539_s10  ;;  %v1977_v50 = vrot.slane %v5173_v62, 5  ;;  %v3878_v53 = vcombine.low %v4396_v52, %v4395_v51  ;;  %v455_v45 = vrot.slane %v454_v48, 4  ;;  %v472_v55 = vshrl.u32 %v222_v18, 16  ;;  %v245_v62 = vld [vmem:[%s4624_s30 + $0x74] sm:$0x1] }
  0xb4   : > { %2678 = vrot.lane.b32.xlu0 %v3995_v1, %s4539_s10  ;;  %v475_v49 = vshll.u32 %v222_v18, 16  ;;  %v481_v56 = vshll.u32 %v5222_v46, 16  ;;  %v465_v58 = vrot.slane %v464_v26, 4  ;;  %v1975_v12 = vsel %vm4648_vm2, %v3867_v40, %v1974_v30 }
  0xb5   : > { %v1976_v60 = vrot.slane %v1974_v30, 4  ;;  %v2784_v59 = vsel %vm2778_vm6, %v3878_v53, %v5183_v57  ;;  %v460_v61 = vsel %vm4692_vm5, %v455_v45, %v459_v41  ;;  %v474_v2 = vrot.slane %v472_v55, 4  ;;  %v3735_v55 = vld [vmem:[%s4624_s30 + $0x78] sm:$0xf] }
  0xb6   : > { %v2831_v20 = vsel %vm2827_vm7, %v2784_v59, %v5123_v63  ;;  %v477_v4 = vrot.slane %v475_v49, 5  ;;  %v5243_v10 = vpop.permute.xlu1 %2668  ;;  %v470_v32 = vsel %vm4692_vm5, %v465_v58, %v469_v7  ;;  %v483_v57 = vrot.slane %v481_v56, 5  ;;  %v3733_v58 = vld [vmem:[%s4624_s30 + $0x6c] sm:$0xf] }
  0xb7   : > { %v1978_v47 = vsel %vm4648_vm2, %v1976_v60, %v1977_v50  ;;  %v485_v15 = vshrl.u32 %v5222_v46, 16  ;;  %v5250_v21 = vpop.permute.xlu0 %2666  ;;  %v3901_v23 = vcombine.low %v460_v61, %v470_v32  ;;  %v491_v43 = vshll.u32 %v245_v62, 16 }
  0xb8   : > { %v4011_v25 = vcombine.low %v1975_v12, %v1978_v47  ;;  %v478_v63 = vor.u32 %v477_v4, %v474_v2  ;;  %v3868_v54 = vrot.slane %v3852_v6, 9  ;;  %v1981_v33 = vrot.slane %v5142_v27, 5  ;;  %v647_v27 = vld [vmem:[%s4624_s30 + $0x60] sm:$0xe] }
  0xb9   : > { %v487_v29 = vrot.slane %v485_v15, 4  ;;  %v1984_v31 = vrot.slane %v5167_v44, 5  ;;  %2170 = vrot.lane.b32.xlu1 %v3901_v23, %s4536_s7  ;;  %v493_v0 = vrot.slane %v491_v43, 5  ;;  %v2864_v39 = vsel %vm2860_vm8, %v2831_v20, %v5078_v16  ;;  %v5315_v23 = vld [vmem:[%s4624_s30 + $0x80] sm:$0x1] }
  0xba   : > { %2758 = vrot.lane.b32.xlu0 %v4011_v25, %s4540_s19  ;;  %v479_v9 = vrot.slane %v478_v63, 4  ;;  %v1982_v36 = vsel %vm4648_vm2, %v3868_v54, %v1981_v33  ;;  %v1983_v38 = vrot.slane %v1981_v33, 4  ;;  %v2897_v42 = vsel %vm2893_vm9, %v2864_v39, %v5188_v5  ;;  %v5320_v63 = vld [vmem:[%s4624_s30 + $0x74] sm:$0x1] }
  0xbb   : > { %v488_v3 = vor.u32 %v487_v29, %v483_v57  ;;  %v5262_v41 = vpop.permute.xlu0 %2746  ;;  %v2862_v18 = vsel %vm2860_vm8, %v5203_v24, %v5110_v11  ;;  %v3710_v1 = vrot.slane %v648_v35, 9  ;;  %v771_v26 = vrot.slane %v5222_v46, 5 }
  0xbc   : > { %v484_v44 = vsel %vm4692_vm5, %v479_v9, %v483_v57  ;;  %v5271_v48 = vpop.permute.xlu1 %2158  ;;  %v1985_v16 = vsel %vm4648_vm2, %v1983_v38, %v1984_v31  ;;  %v2895_v40 = vsel %vm2893_vm9, %v2862_v18, %v5205_v28  ;;  %v774_v5 = vrot.slane %v245_v62, 5 }
  0xbd   : > { %v489_v7 = vrot.slane %v488_v3, 4  ;;  %v4012_v30 = vcombine.low %v1982_v36, %v1985_v16  ;;  %v3709_v50 = vrot.slane %v647_v27, 9  ;;  %v764_v11 = vrot.slane %v5194_v14, 5  ;;  %v5289_v14 = vld [vmem:[%s4624_s30 + $0x7c] sm:$0xf] }
  0xbe   : > { %v772_v51 = vsel %vm4648_vm2, %v3710_v1, %v771_v26  ;;  %v773_v52 = vrot.slane %v771_v26, 4  ;;  %v767_v53 = vrot.slane %v5198_v22, 5  ;;  %v2930_v56 = vsel %vm2926_vm10, %v2897_v42, %v5158_v37  ;;  %v5297_v22 = vld [vmem:[%s4624_s30 + $0x70] sm:$0xf]  ;;  %v4397_v26 = vld [vmem:[%s4624_s30 + $0x18] sm:$0xf] }
  0xbf   : > { %v494_v24 = vsel %vm4692_vm5, %v489_v7, %v493_v0  ;;  %2760 = vrot.lane.b32.xlu0 %v4012_v30, %s4540_s19  ;;  %v765_v46 = vsel %vm4648_vm2, %v3709_v50, %v764_v11  ;;  %v766_v45 = vrot.slane %v764_v11, 4  ;;  %v2963_v62 = vsel %vm2959_vm11, %v2930_v56, %v5216_v34  ;;  %v4365_v36 = vld [vmem:[%s6327_s1 + $0x10] ss:$0 sps:$4 sm:$0x33]   ;;  %v4398_v30 = vld [vmem:[%s4624_s30 + $0x1c] sm:$0xf] }
  0xc0   : > { %v3902_v28 = vcombine.low %v484_v44, %v494_v24  ;;  %v775_v49 = vsel %vm4648_vm2, %v773_v52, %v774_v5  ;;  %v2928_v61 = vsel %vm2926_vm10, %v2895_v40, %v5128_v8  ;;  %v1087_v2 = vshrl.u32 %v3735_v55, 16  ;;  %v3774_v44 = vld [vmem:[%s4624_s30 + $0x78] sm:$0xe]  ;;  %v3773_v50 = vld [vmem:[%s4624_s30 + $0x6c] sm:$0xe]  ;;  %4270 = vmatprep.subr.msk.bf16.mxu0 %vm3111_vm13, %v4365_v36  ;;  %4271 = vmatprep.subr.msk.bf16.mxu1 %vm3111_vm13, %v4365_v36 }
  0xc1   : > { %v5299_v12 = vpop.permute.xlu0 %2748  ;;  %v3918_v60 = vcombine.low %v772_v51, %v775_v49  ;;  %v768_v59 = vsel %vm4648_vm2, %v766_v45, %v767_v53  ;;  %v1090_v4 = vshll.u32 %v3735_v55, 16  ;;  %v1100_v6 = vshrl.u32 %v5289_v14, 16 }
  0xc2   : > { %2172 = vrot.lane.b32.xlu1 %v3902_v28, %s4536_s7  ;;  %v5308_v37 = vpop.permute.xlu1 %2160  ;;  %v3917_v20 = vcombine.low %v765_v46, %v768_v59  ;;  %v2961_v32 = vsel %vm2959_vm11, %v2928_v61, %v5224_v13  ;;  %v1063_v47 = vshrl.u32 %v3733_v58, 16  ;;  %v1066_v57 = vshll.u32 %v3733_v58, 16 }
  0xc3   : > { %v1076_v15 = vshrl.u32 %v5297_v22, 16  ;;  %v1089_v8 = vrot.slane %v1087_v2, 4  ;;  %v1092_v34 = vrot.slane %v1090_v4, 5  ;;  %v3933_v25 = vcombine.low %v3733_v58, %v5297_v22 }
  0xc4   : > { %2250 = vrot.lane.b32.xlu0 %v3917_v20, %s4535_s6  ;;  %v3934_v13 = vcombine.low %v3735_v55, %v5289_v14  ;;  %v1065_v29 = vrot.slane %v1063_v47, 4  ;;  %v1068_v54 = vrot.slane %v1066_v57, 5  ;;  %v5328_v33 = vsel %vm2992_vm12, %v2963_v62, %v5243_v10 }
  0xc5   : > { %v5322_v43 = vpop.permute.xlu0 %2238  ;;  %v1093_v35 = vor.u32 %v1092_v34, %v1089_v8  ;;  %v1096_v9 = vshll.u32 %v5289_v14, 16  ;;  %v1102_v0 = vrot.slane %v1100_v6, 4  ;;  %v1106_v3 = vshll.u32 %v5315_v23, 16  ;;  %v5372_v6 = vld [vmem:[%s4624_s30 + $0x84] sm:$0xf] }
  0xc6   : > { %2252 = vrot.lane.b32.xlu1 %v3918_v60, %s4535_s6  ;;  %v5330_v31 = vpop.permute.xlu1 %2240  ;;  %v1069_v38 = vor.u32 %v1068_v54, %v1065_v29  ;;  %v1072_v39 = vshll.u32 %v5297_v22, 16  ;;  %v1078_v10 = vrot.slane %v1076_v15, 4  ;;  %v1082_v27 = vshll.u32 %v5320_v63, 16  ;;  %v5379_v15 = vld [vmem:[%s4624_s30 + $0x88] sm:$0xf] }
  0xc7   : > { %v2994_v42 = vsel %vm2992_vm12, %v2961_v32, %v5250_v21  ;;  %v1094_v18 = vrot.slane %v1093_v35, 4  ;;  %v1098_v1 = vrot.slane %v1096_v9, 5  ;;  %v1108_v7 = vrot.slane %v1106_v3, 5  ;;  %v4399_v54 = vld [vmem:[%s4624_s30 + $0x24] sm:$0xf] }
  0xc8   : > { %2346 = vrot.lane.b32.xlu0 %v3933_v25, %s4533_s4  ;;  %v1070_v16 = vrot.slane %v1069_v38, 4  ;;  %v1074_v40 = vrot.slane %v1072_v39, 5  ;;  %v3879_v5 = vcombine.low %v4397_v26, %v4398_v30  ;;  %v1084_v52 = vrot.slane %v1082_v27, 5  ;;  %v4400_v35 = vld [vmem:[%s4624_s30 + $0x28] sm:$0xf] }
  0xc9   : > { %v5349_v24 = vpop.permute.xlu0 %2334  ;;  %v1099_v51 = vsel %vm4692_vm5, %v1094_v18, %v1098_v1  ;;  %v1103_v21 = vor.u32 %v1102_v0, %v1098_v1  ;;  %v3790_v53 = vrot.slane %v3774_v44, 9  ;;  %v1383_v45 = vrot.slane %v5289_v14, 5  ;;  %v5423_v26 = vld [vmem:[%s4624_s30 + $0x80] sm:$0x1] }
  0xca   : > { %2348 = vrot.lane.b32.xlu1 %v3934_v13, %s4533_s4  ;;  %v5347_v11 = vpop.permute.xlu1 %2336  ;;  %v1075_v28 = vsel %vm4692_vm5, %v1070_v16, %v1074_v40  ;;  %v1079_v46 = vor.u32 %v1078_v10, %v1074_v40  ;;  %v1386_v55 = vrot.slane %v5315_v23, 5  ;;  %v3789_v56 = vrot.slane %v3773_v50, 9  ;;  %v5382_v23 = vld [vmem:[%s4624_s30 + $0x78] sm:$0xf]  ;;  %v5393_v13 = vld [vmem:[%s4624_s30 + $0x7c] sm:$0xf] }
  0xcb   : > { %v1104_v49 = vrot.slane %v1103_v21, 4  ;;  %v1376_v58 = vrot.slane %v5297_v22, 5  ;;  %v1379_v60 = vrot.slane %v5320_v63, 5  ;;  %v1384_v62 = vsel %vm4648_vm2, %v3790_v53, %v1383_v45 }
  0xcc   : > { %v1080_v59 = vrot.slane %v1079_v46, 4  ;;  %v1385_v61 = vrot.slane %v1383_v45, 4  ;;  %v3027_v4 = vsel %vm3025_vm14, %v2994_v42, %v5262_v41  ;;  %v2787_v41 = vsel %vm2778_vm6, %v3879_v5, %v5271_v48  ;;  %v5413_v42 = vld [vmem:[%s4624_s30 + $0x8c] sm:$0x1]  ;;  %v224_v46 = vld [vmem:[%s4624_s30 + $0x78] sm:$0xf] }
  0xcd   : > { %v1109_v14 = vsel %vm4692_vm5, %v1104_v49, %v1108_v7  ;;  %v1377_v2 = vsel %vm4648_vm2, %v3789_v56, %v1376_v58  ;;  %v1378_v22 = vrot.slane %v1376_v58, 4  ;;  %4232 = vmatprep.mubr.msk.bf16.mxu0 %vm3078_vm15, %v3027_v4  ;;  %v3113_v63 = vsel %vm3111_vm13, %v4365_v36, 0  ;;  %v5439_v56 = vld [vmem:[%s4624_s30 + $0x7c] sm:$0xf] }
  0xce   : > { %v5363_v20 = vpop.permute.xlu1 %2416  ;;  %v3950_v32 = vcombine.low %v1099_v51, %v1109_v14  ;;  %v1085_v47 = vsel %vm4692_vm5, %v1080_v59, %v1084_v52  ;;  %v1387_v57 = vsel %vm4648_vm2, %v1385_v61, %v1386_v55  ;;  %4231 = vmatpush3.bf16.msra.mxu0 %v3113_v63  ;;  %v3880_v9 = vcombine.low %v4399_v54, %v4400_v35 }
  0xcf   : > { %v3949_v34 = vcombine.low %v1075_v28, %v1085_v47  ;;  %v1380_v25 = vsel %vm4648_vm2, %v1378_v22, %v1379_v60  ;;  %v3966_v29 = vcombine.low %v1384_v62, %v1387_v57  ;;  %v3029_v48 = vsel %vm3025_vm14, %v5328_v33, %v5299_v12  ;;  %4269 = vmatpush3.bf16.msra.mxu1 %v3113_v63  ;;  %v5447_v22 = vld [vmem:[%s4624_s30 + $0x80] sm:$0x1] }
  0xd0   : > { %v5384_v8 = vpop.permute.xlu0 %2414  ;;  %2428 = vrot.lane.b32.xlu1 %v3950_v32, %s4537_s8  ;;  %v1699_v0 = vshrl.u32 %v5372_v6, 16  ;;  %v3965_v36 = vcombine.low %v1377_v2, %v1380_v25  ;;  %v1702_v38 = vshll.u32 %v5372_v6, 16  ;;  %v1712_v39 = vshrl.u32 %v5379_v15, 16 }
  0xd1   : > { %2426 = vrot.lane.b32.xlu0 %v3949_v34, %s4537_s8  ;;  %v1675_v10 = vshrl.u32 %v5382_v23, 16  ;;  %v3982_v44 = vcombine.low %v5372_v6, %v5379_v15  ;;  %v1678_v12 = vshll.u32 %v5382_v23, 16  ;;  %v1688_v33 = vshrl.u32 %v5393_v13, 16  ;;  %4233 = vmatmul.mubr.msk.bf16.vlgmr.msra.gmra.mrb[0].mxu0 %vm3078_vm15, %v3029_v48 }
  0xd2   : > { %v5402_v3 = vpop.permute.xlu1 %2496  ;;  %v1701_v27 = vrot.slane %v1699_v0, 4  ;;  %v2790_v1 = vsel %vm2778_vm6, %v3880_v9, %v5308_v37  ;;  %v1704_v7 = vrot.slane %v1702_v38, 5  ;;  %v3981_v40 = vcombine.low %v5382_v23, %v5393_v13  ;;  %v3853_v23 = vld [vmem:[%s4624_s30 + $0x78] sm:$0xe] }
  0xd3   : > { %v1677_v16 = vrot.slane %v1675_v10, 4  ;;  %v1680_v30 = vrot.slane %v1678_v12, 5  ;;  %v2835_v5 = vsel %vm2827_vm7, %v2790_v1, %v5330_v31  ;;  %v1708_v50 = vshll.u32 %v5379_v15, 16  ;;  %v227_v1 = vld [vmem:[%s4624_s30 + $0x88] sm:$0xf] }
  0xd4   : > { %v5415_v18 = vpop.permute.xlu0 %2494  ;;  %2508 = vrot.lane.b32.xlu1 %v3966_v29, %s4534_s5  ;;  %v1714_v37 = vrot.slane %v1712_v39, 4  ;;  %v1705_v21 = vor.u32 %v1704_v7, %v1701_v27  ;;  %v1718_v52 = vshll.u32 %v5413_v42, 16  ;;  %v1684_v53 = vshll.u32 %v5393_v13, 16 }
  0xd5   : > { %2506 = vrot.lane.b32.xlu0 %v3965_v36, %s4534_s5  ;;  %v1690_v28 = vrot.slane %v1688_v33, 4  ;;  %v2833_v45 = vsel %vm2827_vm7, %v2787_v41, %v5322_v43  ;;  %v1710_v55 = vrot.slane %v1708_v50, 5  ;;  %v1681_v31 = vor.u32 %v1680_v30, %v1677_v16  ;;  %v226_v33 = vld [vmem:[%s4624_s30 + $0x84] sm:$0xf] }
  0xd6   : > { %v5429_v51 = vpop.permute.xlu1 %2592  ;;  %v1694_v49 = vshll.u32 %v5423_v26, 16  ;;  %v1706_v60 = vrot.slane %v1705_v21, 4  ;;  %v1720_v59 = vrot.slane %v1718_v52, 5  ;;  %v1686_v62 = vrot.slane %v1684_v53, 5 }
  0xd7   : > { %v2868_v61 = vsel %vm2860_vm8, %v2835_v5, %v5347_v11  ;;  %v1715_v14 = vor.u32 %v1714_v37, %v1710_v55  ;;  %v1682_v2 = vrot.slane %v1681_v31, 4  ;;  %v496_v4 = vshrl.u32 %v224_v46, 16  ;;  %v5472_v5 = vld [vmem:[%s4624_s30 + $0x8c] sm:$0x1] }
  0xd8   : > { %v5441_v58 = vpop.permute.xlu0 %2590  ;;  %2604 = vrot.lane.b32.xlu1 %v3982_v44, %s4538_s9  ;;  %v1696_v43 = vrot.slane %v1694_v49, 5  ;;  %v1711_v6 = vsel %vm4692_vm5, %v1706_v60, %v1710_v55  ;;  %v1691_v32 = vor.u32 %v1690_v28, %v1686_v62  ;;  %v499_v47 = vshll.u32 %v224_v46, 16 }
  0xd9   : > { %2602 = vrot.lane.b32.xlu0 %v3981_v40, %s4538_s9  ;;  %v505_v57 = vshll.u32 %v5439_v56, 16  ;;  %v1716_v11 = vrot.slane %v1715_v14, 4  ;;  %v1687_v41 = vsel %vm4692_vm5, %v1682_v2, %v1686_v62  ;;  %v498_v25 = vrot.slane %v496_v4, 4  ;;  %v650_v14 = vld [vmem:[%s4624_s30 + $0x84] sm:$0xe] }
  0xda   : > { %v509_v63 = vshrl.u32 %v5439_v56, 16  ;;  %v1692_v54 = vrot.slane %v1691_v32, 4  ;;  %v501_v35 = vrot.slane %v499_v47, 5  ;;  %v515_v48 = vshll.u32 %v5447_v22, 16 }
  0xdb   : > { %v5454_v34 = vpop.permute.xlu1 %2672  ;;  %v507_v9 = vrot.slane %v505_v57, 5  ;;  %v1721_v0 = vsel %vm4692_vm5, %v1716_v11, %v1720_v59  ;;  %v3869_v38 = vrot.slane %v3853_v23, 9  ;;  %v1988_v39 = vrot.slane %v5393_v13, 5  ;;  %v649_v11 = vld [vmem:[%s4624_s30 + $0x78] sm:$0xe] }
  0xdc   : > { %v5459_v29 = vpop.permute.xlu0 %2670  ;;  %v511_v36 = vrot.slane %v509_v63, 4  ;;  %v3998_v10 = vcombine.low %v1711_v6, %v1721_v0  ;;  %v1697_v27 = vsel %vm4692_vm5, %v1692_v54, %v1696_v43  ;;  %v2866_v44 = vsel %vm2860_vm8, %v2833_v45, %v5349_v24 }
  0xdd   : > { %v502_v12 = vor.u32 %v501_v35, %v498_v25  ;;  %v3997_v7 = vcombine.low %v1687_v41, %v1697_v27  ;;  %v517_v40 = vrot.slane %v515_v48, 5  ;;  %v1990_v30 = vrot.slane %v1988_v39, 4 }
  0xde   : > { %v512_v16 = vor.u32 %v511_v36, %v507_v9  ;;  %2684 = vrot.lane.b32.xlu1 %v3998_v10, %s4539_s10  ;;  %v1989_v37 = vsel %vm4648_vm2, %v3869_v38, %v1988_v39  ;;  %v1991_v24 = vrot.slane %v5423_v26, 5  ;;  %v2901_v21 = vsel %vm2893_vm9, %v2868_v61, %v5363_v20  ;;  %v3854_v20 = vld [vmem:[%s4624_s30 + $0x84] sm:$0xe] }
  0xdf   : > { %v503_v13 = vrot.slane %v502_v12, 4  ;;  %2682 = vrot.lane.b32.xlu0 %v3997_v7, %s4539_s10  ;;  %v520_v28 = vshrl.u32 %v226_v33, 16  ;;  %v523_v46 = vshll.u32 %v226_v33, 16  ;;  %v529_v45 = vshll.u32 %v227_v1, 16  ;;  %v5518_v12 = vld [vmem:[%s4624_s30 + $0x90] sm:$0xf] }
  0xe0   : > { %v5474_v50 = vpop.permute.xlu0 %2750  ;;  %v513_v53 = vrot.slane %v512_v16, 4  ;;  %v1992_v31 = vsel %vm4648_vm2, %v1990_v30, %v1991_v24  ;;  %v533_v49 = vshrl.u32 %v227_v1, 16  ;;  %v539_v26 = vshll.u32 %v5472_v5, 16  ;;  %v3737_v30 = vld [vmem:[%s4624_s30 + $0x84] sm:$0xf] }
  0xe1   : > { %v5482_v52 = vpop.permute.xlu1 %2162  ;;  %v508_v55 = vsel %vm4692_vm5, %v503_v13, %v507_v9  ;;  %v4013_v59 = vcombine.low %v1989_v37, %v1992_v31  ;;  %v522_v62 = vrot.slane %v520_v28, 4  ;;  %v525_v61 = vrot.slane %v523_v46, 5 }
  0xe2   : > { %v518_v60 = vsel %vm4692_vm5, %v513_v53, %v517_v40  ;;  %v2899_v43 = vsel %vm2893_vm9, %v2866_v44, %v5384_v8  ;;  %v531_v4 = vrot.slane %v529_v45, 5  ;;  %v535_v6 = vrot.slane %v533_v49, 4  ;;  %v5527_v40 = vld [vmem:[%s4624_s30 + $0x94] sm:$0xf]  ;;  %v5543_v45 = vld [vmem:[%s4624_s30 + $0x88] sm:$0xf] }
  0xe3   : > { %v3903_v2 = vcombine.low %v508_v55, %v518_v60  ;;  %2762 = vrot.lane.b32.xlu0 %v4013_v59, %s4540_s19  ;;  %v526_v32 = vor.u32 %v525_v61, %v522_v62  ;;  %v3870_v47 = vrot.slane %v3854_v20, 9  ;;  %v1995_v57 = vrot.slane %v5379_v15, 5  ;;  %v5552_v59 = vld [vmem:[%s4624_s30 + $0x98] sm:$0x1] }
  0xe4   : > { %v1998_v23 = vrot.slane %v5413_v42, 5  ;;  %v536_v25 = vor.u32 %v535_v6, %v531_v4  ;;  %v541_v63 = vrot.slane %v539_v26, 5  ;;  %v2934_v8 = vsel %vm2926_vm10, %v2901_v21, %v5402_v3 }
  0xe5   : > { %2174 = vrot.lane.b32.xlu1 %v3903_v2, %s4536_s7  ;;  %v3712_v54 = vrot.slane %v650_v14, 9  ;;  %v527_v9 = vrot.slane %v526_v32, 4  ;;  %v1996_v15 = vsel %vm4648_vm2, %v3870_v47, %v1995_v57  ;;  %v1997_v48 = vrot.slane %v1995_v57, 4 }
  0xe6   : > { %v5500_v41 = vpop.permute.xlu0 %2752  ;;  %v785_v42 = vrot.slane %v227_v1, 5  ;;  %v537_v0 = vrot.slane %v536_v25, 4  ;;  %v788_v36 = vrot.slane %v5472_v5, 5  ;;  %v3711_v38 = vrot.slane %v649_v11, 9 }
  0xe7   : > { %v5505_v35 = vpop.permute.xlu1 %2164  ;;  %v778_v39 = vrot.slane %v5439_v56, 5  ;;  %v532_v3 = vsel %vm4692_vm5, %v527_v9, %v531_v4  ;;  %v1999_v10 = vsel %vm4648_vm2, %v1997_v48, %v1998_v23  ;;  %v2932_v56 = vsel %vm2926_vm10, %v2899_v43, %v5415_v18  ;;  %v5563_v4 = vld [vmem:[%s4624_s30 + $0x8c] sm:$0x1] }
  0xe8   : > { %v786_v27 = vsel %vm4648_vm2, %v3712_v54, %v785_v42  ;;  %v787_v44 = vrot.slane %v785_v42, 4  ;;  %v542_v1 = vsel %vm4692_vm5, %v537_v0, %v541_v63  ;;  %v4014_v7 = vcombine.low %v1996_v15, %v1999_v10 }
  0xe9   : > { %v780_v16 = vrot.slane %v778_v39, 4  ;;  %v3904_v13 = vcombine.low %v532_v3, %v542_v1  ;;  %v779_v24 = vsel %vm4648_vm2, %v3711_v38, %v778_v39  ;;  %v781_v21 = vrot.slane %v5447_v22, 5  ;;  %v3775_v39 = vld [vmem:[%s4624_s30 + $0x84] sm:$0xe] }
  0xea   : > { %v5520_v33 = vpop.permute.xlu0 %2242  ;;  %v789_v37 = vsel %vm4648_vm2, %v787_v44, %v788_v36  ;;  %2764 = vrot.lane.b32.xlu0 %v4014_v7, %s4540_s19  ;;  %v2967_v18 = vsel %vm2959_vm11, %v2934_v8, %v5429_v51  ;;  %v1135_v28 = vshrl.u32 %v5518_v12, 16  ;;  %v1138_v46 = vshll.u32 %v5518_v12, 16  ;;  %v4401_v44 = vld [vmem:[%s4624_s30 + $0x30] sm:$0xf] }
  0xeb   : > { %v5530_v5 = vpop.permute.xlu1 %2244  ;;  %v3920_v53 = vcombine.low %v786_v27, %v789_v37  ;;  %2176 = vrot.lane.b32.xlu1 %v3904_v13, %s4536_s7  ;;  %v782_v55 = vsel %vm4648_vm2, %v780_v16, %v781_v21  ;;  %v2965_v22 = vsel %vm2959_vm11, %v2932_v56, %v5441_v58  ;;  %v1148_v31 = vshrl.u32 %v5527_v40, 16 }
  0xec   : > { %v1111_v49 = vshrl.u32 %v3737_v30, 16  ;;  %v3919_v26 = vcombine.low %v779_v24, %v782_v55  ;;  %v1137_v51 = vrot.slane %v1135_v28, 4  ;;  %v1140_v20 = vrot.slane %v1138_v46, 5 }
  0xed   : > { %v1114_v60 = vshll.u32 %v3737_v30, 16  ;;  %v3936_v14 = vcombine.low %v5518_v12, %v5527_v40  ;;  %v1124_v43 = vshrl.u32 %v5543_v45, 16  ;;  %v3935_v58 = vcombine.low %v3737_v30, %v5543_v45  ;;  %v4402_v12 = vld [vmem:[%s4624_s30 + $0x34] sm:$0xf] }
  0xee   : > { %v5556_v61 = vpop.permute.xlu0 %2338  ;;  %v1113_v2 = vrot.slane %v1111_v49, 4  ;;  %2254 = vrot.lane.b32.xlu0 %v3919_v26, %s4535_s6  ;;  %v2998_v32 = vsel %vm2992_vm12, %v2965_v22, %v5459_v29  ;;  %v1141_v47 = vor.u32 %v1140_v20, %v1137_v51  ;;  %v1144_v57 = vshll.u32 %v5527_v40, 16  ;;  %v3776_v29 = vld [vmem:[%s4624_s30 + $0x90] sm:$0xe]  ;;  %v4403_v22 = vld [vmem:[%s4624_s30 + $0x3c] sm:$0xf] }
  0xef   : > { %v5554_v62 = vpop.permute.xlu1 %2340  ;;  %v1116_v6 = vrot.slane %v1114_v60, 5  ;;  %2256 = vrot.lane.b32.xlu1 %v3920_v53, %s4535_s6  ;;  %v1150_v23 = vrot.slane %v1148_v31, 4  ;;  %v1154_v11 = vshll.u32 %v5552_v59, 16  ;;  %v1120_v25 = vshll.u32 %v5543_v45, 16  ;;  %v4404_v31 = vld [vmem:[%s4624_s30 + $0x40] sm:$0xf] }
  0xf0   : > { %v1126_v63 = vrot.slane %v1124_v43, 4  ;;  %v1142_v8 = vrot.slane %v1141_v47, 4  ;;  %v1146_v54 = vrot.slane %v1144_v57, 5  ;;  %v1130_v15 = vshll.u32 %v5563_v4, 16  ;;  %v3819_v51 = vld [vmem:[%s4624_s30 + $0x9c] sm:$0xf] }
  0xf1   : > { %v1117_v9 = vor.u32 %v1116_v6, %v1113_v2  ;;  %v3000_v42 = vsel %vm2992_vm12, %v2967_v18, %v5454_v34  ;;  %v1156_v0 = vrot.slane %v1154_v11, 5  ;;  %v1122_v36 = vrot.slane %v1120_v25, 5  ;;  %v5608_v20 = vld [vmem:[%s4624_s30 + $0xa0] sm:$0xf]  ;;  %v3817_v43 = vld [vmem:[%s4624_s30 + $0x90] sm:$0xf] }
  0xf2   : > { %v3031_v38 = vsel %vm3025_vm14, %v2998_v32, %v5474_v50  ;;  %2350 = vrot.lane.b32.xlu0 %v3935_v58, %s4533_s4  ;;  %v1147_v3 = vsel %vm4692_vm5, %v1142_v8, %v1146_v54  ;;  %v1151_v10 = vor.u32 %v1150_v23, %v1146_v54  ;;  %v3881_v1 = vcombine.low %v4401_v44, %v4402_v12  ;;  %v5620_v58 = vld [vmem:[%s4624_s30 + $0x94] sm:$0xf] }
  0xf3   : > { %v5574_v48 = vpop.permute.xlu1 %2420  ;;  %v1118_v27 = vrot.slane %v1117_v9, 4  ;;  %4236 = vmatprep.mubr.msk.bf16.mxu0 %vm3078_vm15, %v3031_v38  ;;  %2352 = vrot.lane.b32.xlu1 %v3936_v14, %s4533_s4  ;;  %v1127_v34 = vor.u32 %v1126_v63, %v1122_v36  ;;  %v1132_v50 = vrot.slane %v1130_v15, 5  ;;  %v3792_v56 = vrot.slane %v3776_v29, 9  ;;  %v5636_v9 = vld [vmem:[%s4624_s30 + $0xa4] sm:$0x1] }
  0xf4   : > { %v1397_v16 = vrot.slane %v5527_v40, 5  ;;  %v1152_v30 = vrot.slane %v1151_v10, 4  ;;  %v1400_v37 = vrot.slane %v5552_v59, 5  ;;  %v3791_v24 = vrot.slane %v3775_v39, 9 }
  0xf5   : > { %v5587_v7 = vpop.permute.xlu0 %2418  ;;  %v1123_v13 = vsel %vm4692_vm5, %v1118_v27, %v1122_v36  ;;  %v1128_v53 = vrot.slane %v1127_v34, 4  ;;  %v1390_v40 = vrot.slane %v5543_v45, 5  ;;  %v1393_v55 = vrot.slane %v5563_v4, 5  ;;  %v5642_v36 = vld [vmem:[%s4624_s30 + $0x98] sm:$0x1] }
  0xf6   : > { %v1398_v18 = vsel %vm4648_vm2, %v3792_v56, %v1397_v16  ;;  %v1399_v28 = vrot.slane %v1397_v16, 4  ;;  %v1157_v46 = vsel %vm4692_vm5, %v1152_v30, %v1156_v0  ;;  %v3882_v49 = vcombine.low %v4403_v22, %v4404_v31  ;;  %v228_v30 = vld [vmem:[%s4624_s30 + $0x90] sm:$0xf]  ;;  %v5666_v31 = vld [vmem:[%s4624_s30 + $0x98] sm:$0x1] }
  0xf7   : > { %v5594_v21 = vpop.permute.xlu1 %2500  ;;  %v3033_v26 = vsel %vm3025_vm14, %v3000_v42, %v5500_v41  ;;  %v3952_v59 = vcombine.low %v1147_v3, %v1157_v46  ;;  %v1133_v45 = vsel %vm4692_vm5, %v1128_v53, %v1132_v50  ;;  %v2793_v14 = vsel %vm2778_vm6, %v3881_v1, %v5482_v52 }
  0xf8   : > { %v1401_v2 = vsel %vm4648_vm2, %v1399_v28, %v1400_v37  ;;  %4237 = vmatmul.mubr.msk.bf16.gmra.mrb[4].mxu0 %vm3078_vm15, %v3033_v26  ;;  %v3951_v41 = vcombine.low %v1123_v13, %v1133_v45  ;;  %v1391_v6 = vsel %vm4648_vm2, %v3791_v24, %v1390_v40  ;;  %v1392_v32 = vrot.slane %v1390_v40, 4  ;;  %v5661_v28 = vld [vmem:[%s4624_s30 + $0x94] sm:$0xf] }
  0xf9   : > { %v5610_v60 = vpop.permute.xlu0 %2498  ;;  %v3968_v4 = vcombine.low %v1398_v18, %v1401_v2  ;;  %2432 = vrot.lane.b32.xlu1 %v3952_v59, %s4537_s8  ;;  %v2796_v52 = vsel %vm2778_vm6, %v3882_v49, %v5505_v35  ;;  %v1747_v57 = vshrl.u32 %v3819_v51, 16  ;;  %v1750_v23 = vshll.u32 %v3819_v51, 16  ;;  %v3855_v2 = vld [vmem:[%s4624_s30 + $0x90] sm:$0xe] }
  0xfa   : > { %v1760_v11 = vshrl.u32 %v5608_v20, 16  ;;  %2430 = vrot.lane.b32.xlu0 %v3951_v41, %s4537_s8  ;;  %v1394_v25 = vsel %vm4648_vm2, %v1392_v32, %v1393_v55  ;;  %v1723_v63 = vshrl.u32 %v3817_v43, 16  ;;  %v1726_v8 = vshll.u32 %v3817_v43, 16 }
  0xfb   : > { %v5625_v47 = vpop.permute.xlu1 %2596  ;;  %v1736_v54 = vshrl.u32 %v5620_v58, 16  ;;  %v3967_v29 = vcombine.low %v1391_v6, %v1394_v25  ;;  %v1749_v42 = vrot.slane %v1747_v57, 4  ;;  %v1752_v35 = vrot.slane %v1750_v23, 5 }
  0xfc   : > { %v3984_v0 = vcombine.low %v3819_v51, %v5608_v20  ;;  %v1725_v38 = vrot.slane %v1723_v63, 4  ;;  %v1728_v39 = vrot.slane %v1726_v8, 5  ;;  %v3983_v3 = vcombine.low %v3817_v43, %v5620_v58 }
  0xfd   : > { %v5638_v15 = vpop.permute.xlu0 %2594  ;;  %v2839_v10 = vsel %vm2827_vm7, %v2796_v52, %v5530_v5  ;;  %2512 = vrot.lane.b32.xlu1 %v3968_v4, %s4534_s5  ;;  %v1753_v27 = vor.u32 %v1752_v35, %v1749_v42  ;;  %v1756_v44 = vshll.u32 %v5608_v20, 16  ;;  %v1762_v12 = vrot.slane %v1760_v11, 4 }
  0xfe   : > { %v1766_v1 = vshll.u32 %v5636_v9, 16  ;;  %2510 = vrot.lane.b32.xlu0 %v3967_v29, %s4534_s5  ;;  %v1729_v50 = vor.u32 %v1728_v39, %v1725_v38  ;;  %v1732_v56 = vshll.u32 %v5620_v58, 16  ;;  %v1738_v16 = vrot.slane %v1736_v54, 4  ;;  %v230_v38 = vld [vmem:[%s4624_s30 + $0x9c] sm:$0xf] }
  0xff   : > { %v1742_v5 = vshll.u32 %v5642_v36, 16  ;;  %v2837_v37 = vsel %vm2827_vm7, %v2793_v14, %v5520_v33  ;;  %v1754_v24 = vrot.slane %v1753_v27, 4  ;;  %v1758_v53 = vrot.slane %v1756_v44, 5  ;;  %v231_v39 = vld [vmem:[%s4624_s30 + $0xa0] sm:$0xf] }
 0x100   : > { %v5650_v34 = vpop.permute.xlu1 %2676  ;;  %v1768_v18 = vrot.slane %v1766_v1, 5  ;;  %v1730_v40 = vrot.slane %v1729_v50, 4  ;;  %v1734_v46 = vrot.slane %v1732_v56, 5  ;;  %v2872_v22 = vsel %vm2860_vm8, %v2839_v10, %v5554_v62 }
 0x101   : > { %v5656_v13 = vpop.permute.xlu0 %2674  ;;  %v1744_v55 = vrot.slane %v1742_v5, 5  ;;  %2608 = vrot.lane.b32.xlu1 %v3984_v0, %s4538_s9  ;;  %v1763_v49 = vor.u32 %v1762_v12, %v1758_v53  ;;  %v2870_v33 = vsel %vm2860_vm8, %v2837_v37, %v5556_v61  ;;  %v544_v26 = vshrl.u32 %v228_v30, 16  ;;  %v5694_v12 = vld [vmem:[%s4624_s30 + $0xa4] sm:$0x1] }
 0x102   : > { %v547_v51 = vshll.u32 %v228_v30, 16  ;;  %2606 = vrot.lane.b32.xlu0 %v3983_v3, %s4538_s9  ;;  %v1759_v59 = vsel %vm4692_vm5, %v1754_v24, %v1758_v53  ;;  %v1739_v45 = vor.u32 %v1738_v16, %v1734_v46  ;;  %v553_v14 = vshll.u32 %v5661_v28, 16 }
 0x103   : > { %v557_v62 = vshrl.u32 %v5661_v28, 16  ;;  %v1764_v41 = vrot.slane %v1763_v49, 4  ;;  %v546_v4 = vrot.slane %v544_v26, 4  ;;  %v563_v61 = vshll.u32 %v5666_v31, 16 }
 0x104   : > { %v549_v6 = vrot.slane %v547_v51, 5  ;;  %v1735_v52 = vsel %vm4692_vm5, %v1730_v40, %v1734_v46  ;;  %v1740_v57 = vrot.slane %v1739_v45, 4  ;;  %v555_v23 = vrot.slane %v553_v14, 5  ;;  %v3856_v46 = vld [vmem:[%s4624_s30 + $0x9c] sm:$0xe] }
 0x105   : > { %v5677_v43 = vpop.permute.xlu0 %2754  ;;  %v559_v11 = vrot.slane %v557_v62, 4  ;;  %v1769_v25 = vsel %vm4692_vm5, %v1764_v41, %v1768_v18  ;;  %v565_v8 = vrot.slane %v563_v61, 5  ;;  %v3871_v54 = vrot.slane %v3855_v2, 9  ;;  %v652_v51 = vld [vmem:[%s4624_s30 + $0x9c] sm:$0xe] }
 0x106   : > { %v5680_v32 = vpop.permute.xlu1 %2166  ;;  %v550_v63 = vor.u32 %v549_v6, %v546_v4  ;;  %v4000_v29 = vcombine.low %v1759_v59, %v1769_v25  ;;  %v1745_v42 = vsel %vm4692_vm5, %v1740_v57, %v1744_v55  ;;  %v2002_v0 = vrot.slane %v5620_v58, 5 }
 0x107   : > { %v560_v35 = vor.u32 %v559_v11, %v555_v23  ;;  %v3999_v3 = vcombine.low %v1735_v52, %v1745_v42  ;;  %v795_v27 = vrot.slane %v5666_v31, 5  ;;  %v2005_v44 = vrot.slane %v5642_v36, 5  ;;  %v651_v52 = vld [vmem:[%s4624_s30 + $0x90] sm:$0xe] }
 0x108   : > { %v551_v10 = vrot.slane %v550_v63, 4  ;;  %2688 = vrot.lane.b32.xlu1 %v4000_v29, %s4539_s10  ;;  %v2003_v50 = vsel %vm4648_vm2, %v3871_v54, %v2002_v0  ;;  %v2004_v56 = vrot.slane %v2002_v0, 4  ;;  %v2905_v58 = vsel %vm2893_vm9, %v2872_v22, %v5574_v48 }
 0x109   : > { %v561_v1 = vrot.slane %v560_v35, 4  ;;  %2686 = vrot.lane.b32.xlu0 %v3999_v3, %s4539_s10  ;;  %v568_v5 = vshrl.u32 %v230_v38, 16  ;;  %v571_v30 = vshll.u32 %v230_v38, 16  ;;  %v577_v37 = vshll.u32 %v231_v39, 16  ;;  %v5735_v35 = vld [vmem:[%s4624_s30 + $0xa8] sm:$0xf] }
 0x10a   : > { %v556_v36 = vsel %vm4692_vm5, %v551_v10, %v555_v23  ;;  %v2006_v18 = vsel %vm4648_vm2, %v2004_v56, %v2005_v44  ;;  %v581_v48 = vshrl.u32 %v231_v39, 16  ;;  %v587_v40 = vshll.u32 %v5694_v12, 16  ;;  %v5744_v3 = vld [vmem:[%s4624_s30 + $0xac] sm:$0xf] }
 0x10b   : > { %v5701_v16 = vpop.permute.xlu0 %2756  ;;  %v566_v53 = vsel %vm4692_vm5, %v561_v1, %v565_v8  ;;  %v4015_v22 = vcombine.low %v2003_v50, %v2006_v18  ;;  %v570_v49 = vrot.slane %v568_v5, 4  ;;  %v573_v26 = vrot.slane %v571_v30, 5  ;;  %v3741_v50 = vld [vmem:[%s4624_s30 + $0x9c] sm:$0xf]  ;;  %v5761_v30 = vld [vmem:[%s4624_s30 + $0xa0] sm:$0xf] }
 0x10c   : > { %v5706_v24 = vpop.permute.xlu1 %2168  ;;  %v3905_v55 = vcombine.low %v556_v36, %v566_v53  ;;  %v2903_v59 = vsel %vm2893_vm9, %v2870_v33, %v5587_v7  ;;  %v579_v45 = vrot.slane %v577_v37, 5  ;;  %v583_v14 = vrot.slane %v581_v48, 4 }
 0x10d   : > { %v589_v62 = vrot.slane %v587_v40, 5  ;;  %2766 = vrot.lane.b32.xlu0 %v4015_v22, %s4540_s19  ;;  %v574_v41 = vor.u32 %v573_v26, %v570_v49  ;;  %v3872_v4 = vrot.slane %v3856_v46, 9  ;;  %v2009_v6 = vrot.slane %v5608_v20, 5  ;;  %v5774_v22 = vld [vmem:[%s4624_s30 + $0xb0] sm:$0x1] }
 0x10e   : > { %2178 = vrot.lane.b32.xlu1 %v3905_v55, %s4536_s7  ;;  %v2012_v61 = vrot.slane %v5636_v9, 5  ;;  %v584_v7 = vor.u32 %v583_v14, %v579_v45  ;;  %v802_v33 = vrot.slane %v5694_v12, 5  ;;  %v2938_v23 = vsel %vm2926_vm10, %v2905_v58, %v5594_v21 }
 0x10f   : > { %v5717_v2 = vpop.permute.xlu0 %2246  ;;  %v3714_v11 = vrot.slane %v652_v51, 9  ;;  %v575_v25 = vrot.slane %v574_v41, 4  ;;  %v2010_v63 = vsel %vm4648_vm2, %v3872_v4, %v2009_v6  ;;  %v2011_v8 = vrot.slane %v2009_v6, 4  ;;  %v5782_v51 = vld [vmem:[%s4624_s30 + $0xa4] sm:$0x1] }
 0x110   : > { %v5724_v57 = vpop.permute.xlu1 %2248  ;;  %v799_v20 = vrot.slane %v231_v39, 5  ;;  %v585_v54 = vrot.slane %v584_v7, 4  ;;  %v2936_v9 = vsel %vm2926_vm10, %v2903_v59, %v5610_v60  ;;  %v3713_v29 = vrot.slane %v651_v52, 9 }
 0x111   : > { %v792_v42 = vrot.slane %v5661_v28, 5  ;;  %v580_v21 = vsel %vm4692_vm5, %v575_v25, %v579_v45  ;;  %v2013_v0 = vsel %vm4648_vm2, %v2011_v8, %v2012_v61  ;;  %v2971_v36 = vsel %vm2959_vm11, %v2938_v23, %v5625_v47 }
 0x112   : > { %v800_v38 = vsel %vm4648_vm2, %v3714_v11, %v799_v20  ;;  %v801_v39 = vrot.slane %v799_v20, 4  ;;  %v590_v28 = vsel %vm4692_vm5, %v585_v54, %v589_v62  ;;  %v4016_v44 = vcombine.low %v2010_v63, %v2013_v0  ;;  %v3778_v11 = vld [vmem:[%s4624_s30 + $0xa8] sm:$0xe] }
 0x113   : > { %v5748_v60 = vpop.permute.xlu0 %2342  ;;  %v793_v12 = vsel %vm4648_vm2, %v3713_v29, %v792_v42  ;;  %v794_v1 = vrot.slane %v792_v42, 4  ;;  %v3906_v56 = vcombine.low %v580_v21, %v590_v28  ;;  %v1183_v5 = vshrl.u32 %v5735_v35, 16  ;;  %v4405_v42 = vld [vmem:[%s4624_s30 + $0x48] sm:$0xf] }
 0x114   : > { %v5746_v10 = vpop.permute.xlu1 %2344  ;;  %v803_v58 = vsel %vm4648_vm2, %v801_v39, %v802_v33  ;;  %2768 = vrot.lane.b32.xlu0 %v4016_v44, %s4540_s19  ;;  %v2969_v53 = vsel %vm2959_vm11, %v2936_v9, %v5638_v15  ;;  %v1186_v18 = vshll.u32 %v5735_v35, 16  ;;  %v1196_v48 = vshrl.u32 %v5744_v3, 16 }
 0x115   : > { %v796_v37 = vsel %vm4648_vm2, %v794_v1, %v795_v27  ;;  %2180 = vrot.lane.b32.xlu1 %v3906_v56, %s4536_s7  ;;  %v3922_v47 = vcombine.low %v800_v38, %v803_v58  ;;  %v1185_v46 = vrot.slane %v1183_v5, 4  ;;  %v1159_v55 = vshrl.u32 %v3741_v50, 16  ;;  %v3777_v38 = vld [vmem:[%s4624_s30 + $0x9c] sm:$0xe] }
 0x116   : > { %v3921_v40 = vcombine.low %v793_v12, %v796_v37  ;;  %v1188_v49 = vrot.slane %v1186_v18, 5  ;;  %v3938_v27 = vcombine.low %v5735_v35, %v5744_v3  ;;  %v1162_v26 = vshll.u32 %v3741_v50, 16  ;;  %v4406_v35 = vld [vmem:[%s4624_s30 + $0x4c] sm:$0xf] }
 0x117   : > { %v1172_v15 = vshrl.u32 %v5761_v30, 16  ;;  %v1161_v59 = vrot.slane %v1159_v55, 4  ;;  %v3937_v45 = vcombine.low %v3741_v50, %v5761_v30  ;;  %v3004_v14 = vsel %vm2992_vm12, %v2971_v36, %v5650_v34 }
 0x118   : > { %v5776_v31 = vpop.permute.xlu1 %2424  ;;  %v1192_v62 = vshll.u32 %v5744_v3, 16  ;;  %2258 = vrot.lane.b32.xlu0 %v3921_v40, %s4535_s6  ;;  %v1164_v4 = vrot.slane %v1162_v26, 5  ;;  %v1189_v6 = vor.u32 %v1188_v49, %v1185_v46  ;;  %v1198_v61 = vrot.slane %v1196_v48, 4  ;;  %v4407_v49 = vld [vmem:[%s4624_s30 + $0x54] sm:$0xf] }
 0x119   : > { %v1202_v52 = vshll.u32 %v5774_v22, 16  ;;  %2260 = vrot.lane.b32.xlu1 %v3922_v47, %s4535_s6  ;;  %v1168_v33 = vshll.u32 %v5761_v30, 16  ;;  %v1174_v34 = vrot.slane %v1172_v15, 4  ;;  %v1178_v23 = vshll.u32 %v5782_v51, 16  ;;  %v5834_v15 = vld [vmem:[%s4624_s30 + $0xb8] sm:$0xf] }
 0x11a   : > { %v5788_v41 = vpop.permute.xlu0 %2422  ;;  %v1194_v7 = vrot.slane %v1192_v62, 5  ;;  %v3002_v63 = vsel %vm2992_vm12, %v2969_v53, %v5656_v13  ;;  %v1190_v8 = vrot.slane %v1189_v6, 4  ;;  %v1165_v54 = vor.u32 %v1164_v4, %v1161_v59  ;;  %v5819_v53 = vld [vmem:[%s4624_s30 + $0xb4] sm:$0xf]  ;;  %v3821_v4 = vld [vmem:[%s4624_s30 + $0xa8] sm:$0xf] }
 0x11b   : > { %v1204_v20 = vrot.slane %v1202_v52, 5  ;;  %v1170_v29 = vrot.slane %v1168_v33, 5  ;;  %v3883_v21 = vcombine.low %v4405_v42, %v4406_v35  ;;  %v3035_v0 = vsel %vm3025_vm14, %v3002_v63, %v5677_v43  ;;  %v5845_v6 = vld [vmem:[%s4624_s30 + $0xac] sm:$0xf]  ;;  %v5870_v35 = vld [vmem:[%s4624_s30 + $0xb0] sm:$0x1] }
 0x11c   : > { %v5796_v25 = vpop.permute.xlu1 %2504  ;;  %v1199_v9 = vor.u32 %v1198_v61, %v1194_v7  ;;  %2354 = vrot.lane.b32.xlu0 %v3937_v45, %s4533_s4  ;;  %v1195_v13 = vsel %vm4692_vm5, %v1190_v8, %v1194_v7  ;;  %v1166_v28 = vrot.slane %v1165_v54, 4  ;;  %v1180_v44 = vrot.slane %v1178_v23, 5  ;;  %4240 = vmatprep.mubr.msk.bf16.mxu0 %vm3078_vm15, %v3035_v0 }
 0x11d   : > { %v3794_v12 = vrot.slane %v3778_v11, 9  ;;  %2356 = vrot.lane.b32.xlu1 %v3938_v27, %s4533_s4  ;;  %v1175_v50 = vor.u32 %v1174_v34, %v1170_v29  ;;  %v1411_v43 = vrot.slane %v5744_v3, 5  ;;  %v1414_v56 = vrot.slane %v5774_v22, 5  ;;  %v4408_v27 = vld [vmem:[%s4624_s30 + $0x58] sm:$0xf] }
 0x11e   : > { %v5805_v39 = vpop.permute.xlu0 %2502  ;;  %v1200_v1 = vrot.slane %v1199_v9, 4  ;;  %v1171_v58 = vsel %vm4692_vm5, %v1166_v28, %v1170_v29  ;;  %v3793_v36 = vrot.slane %v3777_v38, 9  ;;  %v1404_v5 = vrot.slane %v5761_v30, 5 }
 0x11f   : > { %v1407_v37 = vrot.slane %v5782_v51, 5  ;;  %v1176_v48 = vrot.slane %v1175_v50, 4  ;;  %v1412_v3 = vsel %vm4648_vm2, %v3794_v12, %v1411_v43  ;;  %v1413_v47 = vrot.slane %v1411_v43, 4 }
 0x120   : > { %v1205_v18 = vsel %vm4692_vm5, %v1200_v1, %v1204_v20  ;;  %v5825_v40 = vpop.permute.xlu1 %2600  ;;  %v1405_v30 = vsel %vm4648_vm2, %v3793_v36, %v1404_v5  ;;  %v1406_v22 = vrot.slane %v1404_v5, 4  ;;  %v3884_v26 = vcombine.low %v4407_v49, %v4408_v27  ;;  %v5860_v20 = vld [vmem:[%s4624_s30 + $0xbc] sm:$0x1]  ;;  %v5886_v5 = vld [vmem:[%s4624_s30 + $0xac] sm:$0xf] }
 0x121   : > { %v3954_v55 = vcombine.low %v1195_v13, %v1205_v18  ;;  %v1181_v51 = vsel %vm4692_vm5, %v1176_v48, %v1180_v44  ;;  %v1415_v59 = vsel %vm4648_vm2, %v1413_v47, %v1414_v56  ;;  %v3037_v45 = vsel %vm3025_vm14, %v3004_v14, %v5701_v16 }
 0x122   : > { %v5827_v46 = vpop.permute.xlu0 %2598  ;;  %v1795_v62 = vshrl.u32 %v5819_v53, 16  ;;  %v3953_v61 = vcombine.low %v1171_v58, %v1181_v51  ;;  %v2799_v52 = vsel %vm2778_vm6, %v3883_v21, %v5680_v32  ;;  %v3970_v7 = vcombine.low %v1412_v3, %v1415_v59  ;;  %4241 = vmatmul.mubr.msk.bf16.gmra.mrb[8].mxu0 %vm3078_vm15, %v3037_v45 }
 0x123   : > { %2436 = vrot.lane.b32.xlu1 %v3954_v55, %s4537_s8  ;;  %v1408_v33 = vsel %vm4648_vm2, %v1406_v22, %v1407_v37  ;;  %v2802_v34 = vsel %vm2778_vm6, %v3884_v26, %v5706_v24  ;;  %v1798_v14 = vshll.u32 %v5819_v53, 16  ;;  %v1808_v23 = vshrl.u32 %v5834_v15, 16 }
 0x124   : > { %v1797_v16 = vrot.slane %v1795_v62, 4  ;;  %2434 = vrot.lane.b32.xlu0 %v3953_v61, %s4537_s8  ;;  %v3969_v11 = vcombine.low %v1405_v30, %v1408_v33  ;;  %v1771_v63 = vshrl.u32 %v3821_v4, 16  ;;  %v1774_v32 = vshll.u32 %v3821_v4, 16  ;;  %v5892_v30 = vld [vmem:[%s4624_s30 + $0xb0] sm:$0x1] }
 0x125   : > { %v1784_v8 = vshrl.u32 %v5845_v6, 16  ;;  %v1800_v24 = vrot.slane %v1798_v14, 5  ;;  %v3986_v9 = vcombine.low %v5819_v53, %v5834_v15  ;;  %v3985_v29 = vcombine.low %v3821_v4, %v5845_v6  ;;  %v5872_v21 = vpop.permute.xlu1 %2680 }
 0x126   : > { %v5862_v54 = vpop.permute.xlu0 %2678  ;;  %v2843_v42 = vsel %vm2827_vm7, %v2802_v34, %v5724_v57  ;;  %v1773_v0 = vrot.slane %v1771_v63, 4  ;;  %v1776_v38 = vrot.slane %v1774_v32, 5  ;;  %v1804_v13 = vshll.u32 %v5834_v15, 16  ;;  %v5879_v57 = vld [vmem:[%s4624_s30 + $0xa8] sm:$0xf] }
 0x127   : > { %2516 = vrot.lane.b32.xlu1 %v3970_v7, %s4534_s5  ;;  %v1810_v28 = vrot.slane %v1808_v23, 4  ;;  %v1801_v44 = vor.u32 %v1800_v24, %v1797_v16  ;;  %v1814_v12 = vshll.u32 %v5860_v20, 16  ;;  %v1780_v1 = vshll.u32 %v5845_v6, 16 }
 0x128   : > { %v1786_v50 = vrot.slane %v1784_v8, 4  ;;  %2514 = vrot.lane.b32.xlu0 %v3969_v11, %s4534_s5  ;;  %v2841_v43 = vsel %vm2827_vm7, %v2799_v52, %v5717_v2  ;;  %v1806_v56 = vrot.slane %v1804_v13, 5  ;;  %v1777_v58 = vor.u32 %v1776_v38, %v1773_v0 }
 0x129   : > { %v1790_v36 = vshll.u32 %v5870_v35, 16  ;;  %v1802_v37 = vrot.slane %v1801_v44, 4  ;;  %v1816_v53 = vrot.slane %v1814_v12, 5  ;;  %v1782_v18 = vrot.slane %v1780_v1, 5 }
 0x12a   : > { %v2876_v48 = vsel %vm2860_vm8, %v2843_v42, %v5746_v10  ;;  %v1811_v3 = vor.u32 %v1810_v28, %v1806_v56  ;;  %v1778_v47 = vrot.slane %v1777_v58, 4  ;;  %v592_v2 = vshrl.u32 %v5879_v57, 16  ;;  %v3857_v10 = vld [vmem:[%s4624_s30 + $0xa8] sm:$0xe]  ;;  %v5923_v28 = vld [vmem:[%s4624_s30 + $0xbc] sm:$0x1] }
 0x12b   : > { %2612 = vrot.lane.b32.xlu1 %v3986_v9, %s4538_s9  ;;  %v1792_v55 = vrot.slane %v1790_v36, 5  ;;  %v1807_v49 = vsel %vm4692_vm5, %v1802_v37, %v1806_v56  ;;  %v1787_v27 = vor.u32 %v1786_v50, %v1782_v18  ;;  %v595_v26 = vshll.u32 %v5879_v57, 16  ;;  %v5902_v59 = vpop.permute.xlu1 %2170  ;;  %v5917_v9 = vld [vmem:[%s4624_s30 + $0xb4] sm:$0xf] }
 0x12c   : > { %v5895_v22 = vpop.permute.xlu0 %2758  ;;  %v601_v51 = vshll.u32 %v5886_v5, 16  ;;  %2610 = vrot.lane.b32.xlu0 %v3985_v29, %s4538_s9  ;;  %v1812_v45 = vrot.slane %v1811_v3, 4  ;;  %v1783_v62 = vsel %vm4692_vm5, %v1778_v47, %v1782_v18  ;;  %v594_v4 = vrot.slane %v592_v2, 4  ;;  %v5920_v29 = vld [vmem:[%s4624_s30 + $0xb8] sm:$0xf] }
 0x12d   : > { %v605_v61 = vshrl.u32 %v5886_v5, 16  ;;  %v1788_v52 = vrot.slane %v1787_v27, 4  ;;  %v597_v7 = vrot.slane %v595_v26, 5  ;;  %v611_v34 = vshll.u32 %v5892_v30, 16  ;;  %v3858_v18 = vld [vmem:[%s4624_s30 + $0xb4] sm:$0xe] }
 0x12e   : > { %v603_v33 = vrot.slane %v601_v51, 5  ;;  %v1817_v16 = vsel %vm4692_vm5, %v1812_v45, %v1816_v53  ;;  %v3873_v23 = vrot.slane %v3857_v10, 9  ;;  %v2016_v11 = vrot.slane %v5845_v6, 5  ;;  %v654_v2 = vld [vmem:[%s4624_s30 + $0xb4] sm:$0xe] }
 0x12f   : > { %v607_v14 = vrot.slane %v605_v61, 4  ;;  %v4002_v63 = vcombine.low %v1807_v49, %v1817_v16  ;;  %v1793_v32 = vsel %vm4692_vm5, %v1788_v52, %v1792_v55  ;;  %v2874_v8 = vsel %vm2860_vm8, %v2841_v43, %v5748_v60  ;;  %v653_v52 = vld [vmem:[%s4624_s30 + $0xa8] sm:$0xe] }
 0x130   : > { %v598_v24 = vor.u32 %v597_v7, %v594_v4  ;;  %v4001_v42 = vcombine.low %v1783_v62, %v1793_v32  ;;  %v613_v38 = vrot.slane %v611_v34, 5  ;;  %v2018_v13 = vrot.slane %v2016_v11, 4 }
 0x131   : > { %v608_v0 = vor.u32 %v607_v14, %v603_v33  ;;  %v5925_v44 = vpop.permute.xlu0 %2760  ;;  %2692 = vrot.lane.b32.xlu1 %v4002_v63, %s4539_s10  ;;  %v2017_v60 = vsel %vm4648_vm2, %v3873_v23, %v2016_v11  ;;  %v2019_v12 = vrot.slane %v5870_v35, 5  ;;  %v2909_v1 = vsel %vm2893_vm9, %v2876_v48, %v5776_v31 }
 0x132   : > { %v599_v6 = vrot.slane %v598_v24, 4  ;;  %2690 = vrot.lane.b32.xlu0 %v4001_v42, %s4539_s10  ;;  %v616_v56 = vshrl.u32 %v5917_v9, 16  ;;  %v619_v58 = vshll.u32 %v5917_v9, 16  ;;  %v625_v36 = vshll.u32 %v5920_v29, 16 }
 0x133   : > { %v609_v43 = vrot.slane %v608_v0, 4  ;;  %v2020_v35 = vsel %vm4648_vm2, %v2018_v13, %v2019_v12  ;;  %v629_v31 = vshrl.u32 %v5920_v29, 16  ;;  %v635_v53 = vshll.u32 %v5923_v28, 16  ;;  %v5981_v12 = vld [vmem:[%s4624_s30 + $0xc4] sm:$0xf] }
 0x134   : > { %v5933_v50 = vpop.permute.xlu1 %2172  ;;  %v604_v37 = vsel %vm4692_vm5, %v599_v6, %v603_v33  ;;  %v4017_v3 = vcombine.low %v2017_v60, %v2020_v35  ;;  %v618_v47 = vrot.slane %v616_v56, 4  ;;  %v621_v55 = vrot.slane %v619_v58, 5 }
 0x135   : > { %v614_v48 = vsel %vm4692_vm5, %v609_v43, %v613_v38  ;;  %v2907_v27 = vsel %vm2893_vm9, %v2874_v8, %v5788_v41  ;;  %v627_v26 = vrot.slane %v625_v36, 5  ;;  %v631_v51 = vrot.slane %v629_v31, 4  ;;  %v5974_v38 = vld [vmem:[%s4624_s30 + $0xc0] sm:$0xf] }
 0x136   : > { %v3907_v49 = vcombine.low %v604_v37, %v614_v48  ;;  %2770 = vrot.lane.b32.xlu0 %v4017_v3, %s4540_s19  ;;  %v622_v45 = vor.u32 %v621_v55, %v618_v47  ;;  %v3874_v62 = vrot.slane %v3858_v18, 9  ;;  %v2023_v4 = vrot.slane %v5834_v15, 5  ;;  %v5957_v7 = vpop.permute.xlu0 %2250  ;;  %v5999_v48 = vld [vmem:[%s4624_s30 + $0xb8] sm:$0xf] }
 0x137   : > { %v2026_v61 = vrot.slane %v5860_v20, 5  ;;  %v632_v33 = vor.u32 %v631_v51, %v627_v26  ;;  %v637_v41 = vrot.slane %v635_v53, 5  ;;  %v2942_v34 = vsel %vm2926_vm10, %v2909_v1, %v5796_v25  ;;  %v3745_v1 = vld [vmem:[%s4624_s30 + $0xb4] sm:$0xf] }
 0x138   : > { %v5951_v10 = vpop.permute.xlu1 %2252  ;;  %2182 = vrot.lane.b32.xlu1 %v3907_v49, %s4536_s7  ;;  %v3716_v16 = vrot.slane %v654_v2, 9  ;;  %v623_v14 = vrot.slane %v622_v45, 4  ;;  %v2024_v23 = vsel %vm4648_vm2, %v3874_v62, %v2023_v4  ;;  %v2025_v15 = vrot.slane %v2023_v4, 4 }
 0x139   : > { %v813_v20 = vrot.slane %v5920_v29, 5  ;;  %v633_v11 = vrot.slane %v632_v33, 4  ;;  %v816_v63 = vrot.slane %v5923_v28, 5  ;;  %v3715_v32 = vrot.slane %v653_v52, 9 }
 0x13a   : > { %v806_v8 = vrot.slane %v5886_v5, 5  ;;  %v628_v24 = vsel %vm4692_vm5, %v623_v14, %v627_v26  ;;  %v2027_v25 = vsel %vm4648_vm2, %v2025_v15, %v2026_v61  ;;  %v2940_v28 = vsel %vm2926_vm10, %v2907_v27, %v5805_v39  ;;  %v5991_v35 = vpop.permute.xlu0 %2346  ;;  %v3764_v26 = vld [vmem:[%s4624_s30 + $0xc8] sm:$0x1]  ;;  %v6013_v61 = vld [vmem:[%s4624_s30 + $0xbc] sm:$0x1] }
 0x13b   : > { %v814_v42 = vsel %vm4648_vm2, %v3716_v16, %v813_v20  ;;  %v815_v0 = vrot.slane %v813_v20, 4  ;;  %v638_v13 = vsel %vm4692_vm5, %v633_v11, %v637_v41  ;;  %v4018_v6 = vcombine.low %v2024_v23, %v2027_v25 }
 0x13c   : > { %v808_v60 = vrot.slane %v806_v8, 4  ;;  %v5984_v43 = vpop.permute.xlu1 %2348  ;;  %v3908_v56 = vcombine.low %v628_v24, %v638_v13  ;;  %v807_v36 = vsel %vm4648_vm2, %v3715_v32, %v806_v8  ;;  %v809_v37 = vrot.slane %v5892_v30, 5  ;;  %v3780_v8 = vld [vmem:[%s4624_s30 + $0xc0] sm:$0xe] }
 0x13d   : > { %v817_v58 = vsel %vm4648_vm2, %v815_v0, %v816_v63  ;;  %2772 = vrot.lane.b32.xlu0 %v4018_v6, %s4540_s19  ;;  %v2975_v31 = vsel %vm2959_vm11, %v2942_v34, %v5825_v40  ;;  %v1231_v53 = vshrl.u32 %v5974_v38, 16  ;;  %v1234_v18 = vshll.u32 %v5974_v38, 16  ;;  %v3779_v0 = vld [vmem:[%s4624_s30 + $0xb4] sm:$0xe] }
 0x13e   : > { %v3924_v39 = vcombine.low %v814_v42, %v817_v58  ;;  %2184 = vrot.lane.b32.xlu1 %v3908_v56, %s4536_s7  ;;  %v810_v30 = vsel %vm4648_vm2, %v808_v60, %v809_v37  ;;  %v2973_v3 = vsel %vm2959_vm11, %v2940_v28, %v5827_v46  ;;  %v1244_v47 = vshrl.u32 %v5981_v12, 16  ;;  %v4409_v28 = vld [vmem:[%s4624_s30 + $0x60] sm:$0xf]  ;;  %v4410_v60 = vld [vmem:[%s4624_s30 + $0x64] sm:$0xf] }
 0x13f   : > { %v1207_v55 = vshrl.u32 %v3745_v1, 16  ;;  %v3923_v2 = vcombine.low %v807_v36, %v810_v30  ;;  %v1233_v40 = vrot.slane %v1231_v53, 4  ;;  %v1236_v49 = vrot.slane %v1234_v18, 5 }
 0x140   : > { %v1210_v27 = vshll.u32 %v3745_v1, 16  ;;  %v3940_v51 = vcombine.low %v5974_v38, %v5981_v12  ;;  %v1220_v62 = vshrl.u32 %v5999_v48, 16  ;;  %v3939_v4 = vcombine.low %v3745_v1, %v5999_v48 }
 0x141   : > { %v1209_v45 = vrot.slane %v1207_v55, 4  ;;  %2262 = vrot.lane.b32.xlu0 %v3923_v2, %s4535_s6  ;;  %v3006_v52 = vsel %vm2992_vm12, %v2973_v3, %v5862_v54  ;;  %v1237_v33 = vor.u32 %v1236_v49, %v1233_v40  ;;  %v1240_v41 = vshll.u32 %v5981_v12, 16 }
 0x142   : > { %v1212_v46 = vrot.slane %v1210_v27, 5  ;;  %v6019_v34 = vpop.permute.xlu1 %2428  ;;  %2264 = vrot.lane.b32.xlu1 %v3924_v39, %s4535_s6  ;;  %v1246_v16 = vrot.slane %v1244_v47, 4  ;;  %v1250_v14 = vshll.u32 %v3764_v26, 16  ;;  %v1216_v23 = vshll.u32 %v5999_v48, 16  ;;  %v3827_v27 = vld [vmem:[%s4624_s30 + $0xcc] sm:$0xf] }
 0x143   : > { %v1222_v15 = vrot.slane %v1220_v62, 4  ;;  %v6023_v20 = vpop.permute.xlu0 %2426  ;;  %v1238_v11 = vrot.slane %v1237_v33, 4  ;;  %v1242_v63 = vrot.slane %v1240_v41, 5  ;;  %v1226_v32 = vshll.u32 %v6013_v61, 16  ;;  %v4411_v62 = vld [vmem:[%s4624_s30 + $0x6c] sm:$0xf] }
 0x144   : > { %v1213_v54 = vor.u32 %v1212_v46, %v1209_v45  ;;  %v3008_v24 = vsel %vm2992_vm12, %v2975_v31, %v5872_v21  ;;  %v1218_v25 = vrot.slane %v1216_v23, 5  ;;  %v3039_v42 = vsel %vm3025_vm14, %v3006_v52, %v5895_v22  ;;  %v3825_v52 = vld [vmem:[%s4624_s30 + $0xc0] sm:$0xf]  ;;  %v6066_v33 = vld [vmem:[%s4624_s30 + $0xc4] sm:$0xf] }
 0x145   : > { %2358 = vrot.lane.b32.xlu0 %v3939_v4, %s4533_s4  ;;  %v1247_v38 = vor.u32 %v1246_v16, %v1242_v63  ;;  %v1252_v13 = vrot.slane %v1250_v14, 5  ;;  %v3885_v1 = vcombine.low %v4409_v28, %v4410_v60  ;;  %4244 = vmatprep.mubr.msk.bf16.mxu0 %vm3078_vm15, %v3039_v42  ;;  %v1228_v58 = vrot.slane %v1226_v32, 5  ;;  %v4412_v4 = vld [vmem:[%s4624_s30 + $0x70] sm:$0xf] }
 0x146   : > { %v1214_v6 = vrot.slane %v1213_v54, 4  ;;  %v6036_v56 = vpop.permute.xlu1 %2508  ;;  %2360 = vrot.lane.b32.xlu1 %v3940_v51, %s4533_s4  ;;  %v1223_v21 = vor.u32 %v1222_v15, %v1218_v25  ;;  %v3796_v36 = vrot.slane %v3780_v8, 9  ;;  %v1425_v22 = vrot.slane %v5981_v12, 5  ;;  %s4111_s4 = sshll.u32 %s4523_s15, 11 }
 0x147   : > { %v6040_v37 = vpop.permute.xlu0 %2506  ;;  %v1243_v39 = vsel %vm4692_vm5, %v1238_v11, %v1242_v63  ;;  %v1248_v31 = vrot.slane %v1247_v38, 4  ;;  %v1428_v53 = vrot.slane %v3764_v26, 5  ;;  %v3795_v18 = vrot.slane %v3779_v0, 9  ;;  %v6056_v26 = vld [vmem:[%s4624_s30 + $0xd0] sm:$0xf] }
 0x148   : > { %v1219_v30 = vsel %vm4692_vm5, %v1214_v6, %v1218_v25  ;;  %v1224_v3 = vrot.slane %v1223_v21, 4  ;;  %v1427_v47 = vrot.slane %v1425_v22, 4  ;;  %v1418_v55 = vrot.slane %v5999_v48, 5  ;;  %v3844_v25 = vld [vmem:[%s4624_s30 + $0xd4] sm:$0x1] }
 0x149   : > { %v1253_v12 = vsel %vm4692_vm5, %v1248_v31, %v1252_v13  ;;  %v1426_v2 = vsel %vm4648_vm2, %v3796_v36, %v1425_v22  ;;  %v1421_v40 = vrot.slane %v6013_v61, 5  ;;  %v3041_v49 = vsel %vm3025_vm14, %v3008_v24, %v5925_v44  ;;  %v3843_v6 = vld [vmem:[%s4624_s30 + $0xc8] sm:$0x1] }
 0x14a   : > { %v3956_v51 = vcombine.low %v1243_v39, %v1253_v12  ;;  %v1229_v45 = vsel %vm4692_vm5, %v1224_v3, %v1228_v58  ;;  %v1429_v48 = vsel %vm4648_vm2, %v1427_v47, %v1428_v53  ;;  %v3886_v46 = vcombine.low %v4411_v62, %v4412_v4  ;;  %4245 = vmatmul.mubr.msk.bf16.gmra.mrb[12].mxu0 %vm3078_vm15, %v3041_v49  ;;  %v6073_v14 = vpop.permute.xlu1 %2604  ;;  %v3859_v49 = vld [vmem:[%s4624_s30 + $0xc0] sm:$0xe] }
 0x14b   : > { %v3955_v61 = vcombine.low %v1219_v30, %v1229_v45  ;;  %v2805_v44 = vsel %vm2778_vm6, %v3885_v1, %v5902_v59  ;;  %v1419_v41 = vsel %vm4648_vm2, %v3795_v18, %v1418_v55  ;;  %v1420_v16 = vrot.slane %v1418_v55, 4  ;;  %v6075_v23 = vpop.permute.xlu0 %2602  ;;  %v3860_v30 = vld [vmem:[%s4624_s30 + $0xcc] sm:$0xe] }
 0x14c   : > { %2440 = vrot.lane.b32.xlu1 %v3956_v51, %s4537_s8  ;;  %v3972_v15 = vcombine.low %v1426_v2, %v1429_v48  ;;  %v1843_v11 = vshrl.u32 %v3827_v27, 16  ;;  %v1846_v63 = vshll.u32 %v3827_v27, 16  ;;  %v1856_v54 = vshrl.u32 %v6056_v26, 16 }
 0x14d   : > { %2438 = vrot.lane.b32.xlu0 %v3955_v61, %s4537_s8  ;;  %v1422_v59 = vsel %vm4648_vm2, %v1420_v16, %v1421_v40  ;;  %v1819_v32 = vshrl.u32 %v3825_v52, 16  ;;  %v1822_v8 = vshll.u32 %v3825_v52, 16  ;;  %v1832_v24 = vshrl.u32 %v6066_v33, 16 }
 0x14e   : > { %v3971_v42 = vcombine.low %v1419_v41, %v1422_v59  ;;  %v2808_v0 = vsel %vm2778_vm6, %v3886_v46, %v5933_v50  ;;  %v1845_v38 = vrot.slane %v1843_v11, 4  ;;  %v1848_v13 = vrot.slane %v1846_v63, 5 }
 0x14f   : > { %v3988_v28 = vcombine.low %v3827_v27, %v6056_v26  ;;  %v1821_v60 = vrot.slane %v1819_v32, 4  ;;  %v1824_v1 = vrot.slane %v1822_v8, 5  ;;  %v3987_v21 = vcombine.low %v3825_v52, %v6066_v33 }
 0x150   : > { %2520 = vrot.lane.b32.xlu1 %v3972_v15, %s4534_s5  ;;  %v1849_v58 = vor.u32 %v1848_v13, %v1845_v38  ;;  %v1852_v36 = vshll.u32 %v6056_v26, 16  ;;  %v1858_v22 = vrot.slane %v1856_v54, 4  ;;  %v1862_v39 = vshll.u32 %v3844_v25, 16  ;;  %v2685_v3 = vpop.permute.xlu1 %2684 }
 0x151   : > { %2518 = vrot.lane.b32.xlu0 %v3971_v42, %s4534_s5  ;;  %v1825_v50 = vor.u32 %v1824_v1, %v1821_v60  ;;  %v1828_v31 = vshll.u32 %v6066_v33, 16  ;;  %v1834_v53 = vrot.slane %v1832_v24, 4  ;;  %v1838_v18 = vshll.u32 %v3843_v6, 16  ;;  %v2683_v47 = vpop.permute.xlu0 %2682 }
 0x152   : > { %v2847_v55 = vsel %vm2827_vm7, %v2808_v0, %v5951_v10  ;;  %v2845_v12 = vsel %vm2827_vm7, %v2805_v44, %v5957_v7  ;;  %v1850_v2 = vrot.slane %v1849_v58, 4  ;;  %v1854_v40 = vrot.slane %v1852_v36, 5 }
 0x153   : > { %v1864_v27 = vrot.slane %v1862_v39, 5  ;;  %v1826_v51 = vrot.slane %v1825_v50, 4  ;;  %v1830_v45 = vrot.slane %v1828_v31, 5  ;;  %v2880_v48 = vsel %vm2860_vm8, %v2847_v55, %v5984_v43  ;;  %v4414_v55 = vld [vmem:[%s4624_s30 + $0x7c] sm:$0xf] }
 0x154   : > { %2616 = vrot.lane.b32.xlu1 %v3988_v28, %s4538_s9  ;;  %v1859_v62 = vor.u32 %v1858_v22, %v1854_v40  ;;  %v1840_v4 = vrot.slane %v1838_v18, 5  ;;  %v3876_v46 = vrot.slane %v3860_v30, 9  ;;  %v2037_v52 = vrot.slane %v6056_v26, 5 }
 0x155   : > { %2614 = vrot.lane.b32.xlu0 %v3987_v21, %s4538_s9  ;;  %v1835_v10 = vor.u32 %v1834_v53, %v1830_v45  ;;  %v2878_v7 = vsel %vm2860_vm8, %v2845_v12, %v5991_v35  ;;  %v2040_v61 = vrot.slane %v3844_v25, 5  ;;  %v3875_v44 = vrot.slane %v3859_v49, 9  ;;  %v2763_v11 = vpop.permute.xlu0 %2762  ;;  %s6242_s9 = scalar_lea.hbm %s6328_s2, %s4111_s4 }
 0x156   : > { %v1855_v41 = vsel %vm4692_vm5, %v1850_v2, %v1854_v40  ;;  %v1860_v16 = vrot.slane %v1859_v62, 4  ;;  %v2039_v43 = vrot.slane %v2037_v52, 4  ;;  %v2030_v15 = vrot.slane %v6066_v33, 5  ;;  %v4415_v62 = vld [vmem:[%s4624_s30 + $0x84] sm:$0xf] }
 0x157   : > { %v1831_v63 = vsel %vm4692_vm5, %v1826_v51, %v1830_v45  ;;  %v1836_v26 = vrot.slane %v1835_v10, 4  ;;  %v2038_v54 = vsel %vm4648_vm2, %v3876_v46, %v2037_v52  ;;  %v2033_v59 = vrot.slane %v3843_v6, 5  ;;  %v2175_v32 = vpop.permute.xlu1 %2174 }
 0x158   : > { %v1865_v35 = vsel %vm4692_vm5, %v1860_v16, %v1864_v27  ;;  %v2041_v8 = vsel %vm4648_vm2, %v2039_v43, %v2040_v61  ;;  %v2032_v24 = vrot.slane %v2030_v15, 4  ;;  %v2913_v33 = vsel %vm2893_vm9, %v2880_v48, %v6019_v34 }
 0x159   : > { %v4004_v25 = vcombine.low %v1855_v41, %v1865_v35  ;;  %v1841_v42 = vsel %vm4692_vm5, %v1836_v26, %v1840_v4  ;;  %v2031_v0 = vsel %vm4648_vm2, %v3875_v44, %v2030_v15  ;;  %v2911_v38 = vsel %vm2893_vm9, %v2878_v7, %v6023_v20  ;;  %v4416_v4 = vld [vmem:[%s4624_s30 + $0x88] sm:$0xf] }
 0x15a   : > { %v4003_v13 = vcombine.low %v1831_v63, %v1841_v42  ;;  %v2034_v6 = vsel %vm4648_vm2, %v2032_v24, %v2033_v59  ;;  %v2946_v28 = vsel %vm2926_vm10, %v2913_v33, %v6036_v56  ;;  %v2944_v34 = vsel %vm2926_vm10, %v2911_v38, %v6040_v37 }
 0x15b   : > { %2696 = vrot.lane.b32.xlu1 %v4004_v25, %s4539_s10  ;;  %v4020_v19 = vcombine.low %v2038_v54, %v2041_v8  ;;  %v2979_v60 = vsel %vm2959_vm11, %v2946_v28, %v6073_v14  ;;  %v2977_v1 = vsel %vm2959_vm11, %v2944_v34, %v6075_v23  ;;  %v4019_v20 = vcombine.low %v2031_v0, %v2034_v6  ;;  %v4417_v28 = vld [vmem:[%s4624_s30 + $0x90] sm:$0xf]  ;;  %v4418_v34 = vld [vmem:[%s4624_s30 + $0x94] sm:$0xf] }
 0x15c   : > { %2694 = vrot.lane.b32.xlu0 %v4003_v13, %s4539_s10  ;;  %v3012_v17 = vsel %vm2992_vm12, %v2979_v60, %v2685_v3  ;;  %v3010_v21 = vsel %vm2992_vm12, %v2977_v1, %v2683_v47  ;;  %v2765_v56 = vpop.permute.xlu0 %2764  ;;  %v3891_v14 = vcombine.low %v5879_v57, %v5886_v5  ;;  %v3892_v23 = vcombine.low %v5917_v9, %v5920_v29  ;;  %v4413_v47 = vld [vmem:[%s4624_s30 + $0x78] sm:$0xf]  ;;  %s3546_s10 = scalar_lea.sflag [#allocation3], %s6174_s28 }
 0x15d   : > { %v3043_v58 = vsel %vm3025_vm14, %v3010_v21, %v2763_v11  ;;  %v2177_v37 = vpop.permute.xlu1 %2176  ;;  %v3045_v36 = vsel %vm3025_vm14, %v3012_v17, %v2765_v56  ;;  %v3887_v12 = vcombine.low %v4413_v47, %v4414_v55  ;;  %v3888_v46 = vcombine.low %v4415_v62, %v4416_v4  ;;  %v4419_v21 = vld [vmem:[%s4624_s30 + $0x9c] sm:$0xf]  ;;  %v4420_v56 = vld [vmem:[%s4624_s30 + $0xa0] sm:$0xf]  ;;  %s6190_s30 = scalar_lea.vmem [#allocation2], %s3698_s29 }
 0x15e   : > { %4248 = vmatprep.mubr.msk.bf16.mxu1 %vm3078_vm15, %v3043_v58  ;;  %v3890_v58 = vcombine.low %v4419_v21, %v4420_v56  ;;  %s3565_s5 = sshll.u32 %s6190_s30, 4  ;;  %s6244_s5 = int_to_ptr.vmem [resolvable:$true] %s3565_s5 }
 0x15f   : > { %2776 = vrot.lane.b32.xlu1 %v4020_v19, %s4540_s19  ;;  %4249 = vmatmul.mubr.msk.bf16.vlgmr.msra.gmra.mrb[0].mxu1 %vm3078_vm15, %v3045_v36  ;;  %v2811_v49 = vsel %vm2778_vm6, %v3887_v12, %v2175_v32  ;;  %v2814_v41 = vsel %vm2778_vm6, %v3888_v46, %v2177_v37  ;;  %v3889_v19 = vcombine.low %v4417_v28, %v4418_v34  ;;  %s4421_s11 = scalar_lea.vmem %s6244_s5, 2048 }
 0x160   : > { %2774 = vrot.lane.b32.xlu0 %v4019_v20, %s4540_s19  ;;  %v2255_v22 = vpop.permute.xlu0 %2254  ;;  %p4422_p12 = scmp.ne.s32.totalorder %s6244_s5, %s4421_s11  ;;  %s4425_s19 = sshll.u32 %s4541_s18, 4  ;;  %s4426_s19 = int_to_ptr.vmem [resolvable:$false] %s4425_s19 }
 0x161   : > { %v2257_v39 = vpop.permute.xlu1 %2256  ;;  %v2849_v27 = vsel %vm2827_vm7, %v2811_v49, %v2255_v22  ;;  %s4427_s21 = scalar_lea.vmem %s4426_s19, 4096  ;;  %p4428_p1 = scmp.lt.s32.totalorder %s6244_s5, %s4426_s19 }
 0x162   : > { %v2851_v43 = vsel %vm2827_vm7, %v2814_v41, %v2257_v39  ;;  %p4423_p13 = pnand %p4422_p12, %p4604_p4  ;;  %p4429_p2 = scmp.lt.s32.totalorder %s4427_s21, %s4421_s11 }
 0x164   : > { %v2351_v31 = vpop.permute.xlu0 %2350  ;;  %p4424_p0 = pneg %p4423_p13  ;;  %p4430_p3 = por %p4429_p2, %p4428_p1 }
 0x165   : > { %v2353_v50 = vpop.permute.xlu1 %2352  ;;  %v2882_v51 = vsel %vm2860_vm8, %v2849_v27, %v2351_v31 }
 0x166   : > { %v2884_v11 = vsel %vm2860_vm8, %v2851_v43, %v2353_v50  ;;  %p4431_p5 = pnand %p4430_p3, %p4424_p0 }
 0x16b   : > { %v2433_v53 = vpop.permute.xlu1 %2432 }
 0x16c   : > { %v2431_v18 = vpop.permute.xlu0 %2430  ;;  %v2917_v63 = vsel %vm2893_vm9, %v2884_v11, %v2433_v53 }
 0x16d   : > { %v2915_v52 = vsel %vm2893_vm9, %v2882_v51, %v2431_v18 }
 0x16f   : > { %v2513_v30 = vpop.permute.xlu1 %2512 }
 0x170   : > { %v2511_v3 = vpop.permute.xlu0 %2510  ;;  %v2950_v26 = vsel %vm2926_vm10, %v2917_v63, %v2513_v30 }
 0x171   : > { %v2948_v10 = vsel %vm2926_vm10, %v2915_v52, %v2511_v3 }
 0x173   : > { %v2609_v2 = vpop.permute.xlu1 %2608 }
 0x174   : > { %v2607_v40 = vpop.permute.xlu0 %2606  ;;  %v2983_v54 = vsel %vm2959_vm11, %v2950_v26, %v2609_v2 }
 0x175   : > { %v2981_v7 = vsel %vm2959_vm11, %v2948_v10, %v2607_v40 }
 0x17a   : > { %v2689_v45 = vpop.permute.xlu1 %2688 }
 0x17b   : > { %v2687_v48 = vpop.permute.xlu0 %2686  ;;  %v3016_v59 = vsel %vm2992_vm12, %v2983_v54, %v2689_v45 }
 0x17c   : > { %v3014_v61 = vsel %vm2992_vm12, %v2981_v7, %v2687_v48 }
 0x17f   : > { %v2767_v44 = vpop.permute.xlu0 %2766 }
 0x180   : > { %v3047_v16 = vsel %vm3025_vm14, %v3014_v61, %v2767_v44  ;;  %v2179_v15 = vpop.permute.xlu1 %2178 }
 0x181   : > { %4252 = vmatprep.mubr.msk.bf16.mxu1 %vm3078_vm15, %v3047_v16  ;;  %v2817_v20 = vsel %vm2778_vm6, %v3889_v19, %v2179_v15 }
 0x186   : > { %v2769_v32 = vpop.permute.xlu0 %2768 }
 0x187   : > { %v2181_v35 = vpop.permute.xlu1 %2180  ;;  %v3049_v8 = vsel %vm3025_vm14, %v3016_v59, %v2769_v32 }
 0x188   : > { %4253 = vmatmul.mubr.msk.bf16.gmra.mrb[4].mxu1 %vm3078_vm15, %v3049_v8  ;;  %v2820_v3 = vsel %vm2778_vm6, %v3890_v58, %v2181_v35 }
 0x18a   : > { %v2259_v24 = vpop.permute.xlu0 %2258 }
 0x18b   : > { %v2261_v33 = vpop.permute.xlu1 %2260  ;;  %v2853_v17 = vsel %vm2827_vm7, %v2817_v20, %v2259_v24 }
 0x18c   : > { %v2855_v48 = vsel %vm2827_vm7, %v2820_v3, %v2261_v33 }
 0x18e   : > { %v2355_v42 = vpop.permute.xlu0 %2354 }
 0x18f   : > { %v2357_v25 = vpop.permute.xlu1 %2356  ;;  %v2886_v37 = vsel %vm2860_vm8, %v2853_v17, %v2355_v42 }
 0x190   : > { %v2888_v4 = vsel %vm2860_vm8, %v2855_v48, %v2357_v25 }
 0x195   : > { %v2437_v0 = vpop.permute.xlu1 %2436 }
 0x196   : > { %v2435_v38 = vpop.permute.xlu0 %2434  ;;  %v2921_v7 = vsel %vm2893_vm9, %v2888_v4, %v2437_v0 }
 0x197   : > { %v2919_v39 = vsel %vm2893_vm9, %v2886_v37, %v2435_v38 }
 0x199   : > { %v2517_v13 = vpop.permute.xlu1 %2516 }
 0x19a   : > { %v2515_v6 = vpop.permute.xlu0 %2514  ;;  %v2954_v61 = vsel %vm2926_vm10, %v2921_v7, %v2517_v13 }
 0x19b   : > { %v2952_v31 = vsel %vm2926_vm10, %v2919_v39, %v2515_v6 }
 0x19d   : > { %v2613_v60 = vpop.permute.xlu1 %2612 }
 0x19e   : > { %v2611_v1 = vpop.permute.xlu0 %2610  ;;  %v2987_v43 = vsel %vm2959_vm11, %v2954_v61, %v2613_v60 }
 0x19f   : > { %v2985_v18 = vsel %vm2959_vm11, %v2952_v31, %v2611_v1 }
 0x1a3   : > { %v2693_v36 = vpop.permute.xlu1 %2692 }
 0x1a4   : > { %v2691_v22 = vpop.permute.xlu0 %2690  ;;  %v4234_v50 = vpop.f32.mrb[0].mxu0  ;;  %v3020_v15 = vsel %vm2992_vm12, %v2987_v43, %v2693_v36 }
 0x1a5   : > { %v3149_v53 = vpop.f32.mrb[1].mxu0  ;;  %v3018_v47 = vsel %vm2992_vm12, %v2985_v18, %v2691_v22  ;;  %v3315_v46 = vmul.f32 %v4234_v50, %v4234_v50 }
 0x1a6   : > { %v4235_v30 = vpop.f32.mrb[2].mxu0  ;;  %v3313_v12 = vmul.f32 %v3149_v53, %v3149_v53 }
 0x1a7   : > { %v4120_v2 = vpack.c.bf16 %v4235_v30, %v4234_v50  ;;  %v3152_v40 = vpop.f32.mrb[3].mxu0  ;;  %v3316_v44 = vmul.f32 %v4235_v30, %v4235_v30 }
 0x1a8   : > { %v2771_v55 = vpop.permute.xlu0 %2770  ;;  %v3276_v27 = vadd.f32 %v3152_v40, %v3149_v53  ;;  %v3314_v51 = vmul.f32 %v3152_v40, %v3152_v40  ;;  %v4115_v45 = vpack.c.bf16 %v3152_v40, %v3149_v53 }
 0x1a9   : > { %v3051_v49 = vsel %vm3025_vm14, %v3018_v47, %v2771_v55  ;;  %4192 = vst [vmem:[%s6190_s30 + $0x8] sm:$0xff] %v4120_v2  }
 0x1aa   : > { %v2183_v62 = vpop.permute.xlu1 %2182  ;;  %4256 = vmatprep.mubr.msk.bf16.mxu1 %vm3078_vm15, %v3051_v49  ;;  %v3277_v52 = vadd.f32 %v4234_v50, %v3276_v27  ;;  %v3345_v10 = vadd.f32 %v3314_v51, %v3313_v12  ;;  %4116 = vst [vmem:[%s6190_s30] sm:$0xff] %v4115_v45  }
 0x1ab   : > { %v2823_v28 = vsel %vm2778_vm6, %v3891_v14, %v2183_v62 }
 0x1ac   : > { %v3346_v41 = vadd.f32 %v3345_v10, %v3315_v46  ;;  %v3278_v16 = vadd.f32 %v4235_v30, %v3277_v52 }
 0x1ae   : > { %v3347_v63 = vadd.f32 %v3346_v41, %v3316_v44 }
 0x1af   : > { %v2773_v11 = vpop.permute.xlu0 %2772 }
 0x1b0   : > { %v2185_v26 = vpop.permute.xlu1 %2184  ;;  %v3053_v54 = vsel %vm3025_vm14, %v3020_v15, %v2773_v11 }
 0x1b1   : > { %4257 = vmatmul.mubr.msk.bf16.gmra.mrb[8].mxu1 %vm3078_vm15, %v3053_v54  ;;  %v2826_v13 = vsel %vm2778_vm6, %v3892_v23, %v2185_v26 }
 0x1b3   : > { %v2263_v59 = vpop.permute.xlu0 %2262 }
 0x1b4   : > { %v2265_v32 = vpop.permute.xlu1 %2264  ;;  %v2857_v60 = vsel %vm2827_vm7, %v2823_v28, %v2263_v59 }
 0x1b5   : > { %v2859_v34 = vsel %vm2827_vm7, %v2826_v13, %v2265_v32 }
 0x1b7   : > { %v2359_v8 = vpop.permute.xlu0 %2358 }
 0x1b8   : > { %v2361_v35 = vpop.permute.xlu1 %2360  ;;  %v2890_v9 = vsel %vm2860_vm8, %v2857_v60, %v2359_v8 }
 0x1b9   : > { %v2892_v1 = vsel %vm2860_vm8, %v2859_v34, %v2361_v35 }
 0x1be   : > { %v2441_v24 = vpop.permute.xlu1 %2440 }
 0x1bf   : > { %v2439_v33 = vpop.permute.xlu0 %2438  ;;  %v2925_v29 = vsel %vm2893_vm9, %v2892_v1, %v2441_v24 }
 0x1c0   : > { %v2923_v5 = vsel %vm2893_vm9, %v2890_v9, %v2439_v33 }
 0x1c2   : > { %v2521_v25 = vpop.permute.xlu1 %2520 }
 0x1c3   : > { %v2519_v42 = vpop.permute.xlu0 %2518  ;;  %v2958_v22 = vsel %vm2926_vm10, %v2925_v29, %v2521_v25 }
 0x1c4   : > { %v2956_v39 = vsel %vm2926_vm10, %v2923_v5, %v2519_v42 }
 0x1c6   : > { %v2617_v0 = vpop.permute.xlu1 %2616 }
 0x1c7   : > { %v2615_v38 = vpop.permute.xlu0 %2614  ;;  %v2991_v31 = vsel %vm2959_vm11, %v2958_v22, %v2617_v0 }
 0x1c8   : > { %v2989_v3 = vsel %vm2959_vm11, %v2956_v39, %v2615_v38 }
 0x1cb   : > { %v4238_v6 = vpop.f32.mrb[4].mxu0 }
 0x1cc   : > { %v3165_v19 = vpop.f32.mrb[5].mxu0  ;;  %v3319_v53 = vmul.f32 %v4238_v6, %v4238_v6 }
 0x1cd   : > { %v3279_v20 = vadd.f32 %v3278_v16, %v3165_v19  ;;  %v3317_v17 = vmul.f32 %v3165_v19, %v3165_v19  ;;  %v4239_v21 = vpop.f32.mrb[6].mxu0  ;;  %v2697_v23 = vpop.permute.xlu1 %2696 }
 0x1ce   : > { %v4130_v56 = vpack.c.bf16 %v4239_v21, %v4238_v6  ;;  %v3168_v57 = vpop.f32.mrb[7].mxu0  ;;  %v2695_v14 = vpop.permute.xlu0 %2694  ;;  %v3024_v47 = vsel %vm2992_vm12, %v2991_v31, %v2697_v23  ;;  %v3320_v12 = vmul.f32 %v4239_v21, %v4239_v21 }
 0x1cf   : > { %v3348_v58 = vadd.f32 %v3347_v63, %v3317_v17  ;;  %v3280_v37 = vadd.f32 %v3279_v20, %v3168_v57  ;;  %v3318_v36 = vmul.f32 %v3168_v57, %v3168_v57  ;;  %v4125_v50 = vpack.c.bf16 %v3168_v57, %v3165_v19 }
 0x1d0   : > { %4194 = vst [vmem:[%s6190_s30 + $0x18] sm:$0xff] %v4130_v56   ;;  %v3022_v2 = vsel %vm2992_vm12, %v2989_v3, %v2695_v14 }
 0x1d1   : > { %v3281_v18 = vadd.f32 %v4238_v6, %v3280_v37  ;;  %v3349_v30 = vadd.f32 %v3348_v58, %v3318_v36  ;;  %v2777_v55 = vpop.permute.xlu1 %2776  ;;  %4193 = vst [vmem:[%s6190_s30 + $0x10] sm:$0xff] %v4125_v50  }
 0x1d2   : > { %v3057_v40 = vsel %vm3025_vm14, %v3024_v47, %v2777_v55  ;;  %v2775_v49 = vpop.permute.xlu0 %2774 }
 0x1d3   : > { %v3350_v27 = vadd.f32 %v3349_v30, %v3319_v53  ;;  %v3282_v51 = vadd.f32 %v4239_v21, %v3281_v18  ;;  %v3055_v45 = vsel %vm3025_vm14, %v3022_v2, %v2775_v49 }
 0x1d4   : > { %4260 = vmatprep.mubr.msk.bf16.mxu1 %vm3078_vm15, %v3055_v45 }
 0x1d5   : > { %v3351_v48 = vadd.f32 %v3350_v27, %v3320_v12  ;;  %4261 = vmatmul.mubr.msk.bf16.gmra.mrb[12].mxu1 %vm3078_vm15, %v3057_v40 }
 0x1f5   : > { %v4242_v62 = vpop.f32.mrb[8].mxu0 }
 0x1f6   : > { %v3181_v4 = vpop.f32.mrb[9].mxu0  ;;  %v3323_v15 = vmul.f32 %v4242_v62, %v4242_v62 }
 0x1f7   : > { %v3283_v46 = vadd.f32 %v3282_v51, %v3181_v4  ;;  %v3321_v52 = vmul.f32 %v3181_v4, %v3181_v4  ;;  %v4243_v10 = vpop.f32.mrb[10].mxu0 }
 0x1f8   : > { %v4140_v7 = vpack.c.bf16 %v4243_v10, %v4242_v62  ;;  %v3184_v61 = vpop.f32.mrb[11].mxu0  ;;  %v3324_v26 = vmul.f32 %v4243_v10, %v4243_v10 }
 0x1f9   : > { %v3352_v44 = vadd.f32 %v3351_v48, %v3321_v52  ;;  %v3284_v41 = vadd.f32 %v3283_v46, %v3184_v61  ;;  %v3322_v16 = vmul.f32 %v3184_v61, %v3184_v61  ;;  %v4135_v43 = vpack.c.bf16 %v3184_v61, %v3181_v4 }
 0x1fa   : > { %4196 = vst [vmem:[%s6190_s30 + $0x28] sm:$0xff] %v4140_v7  }
 0x1fb   : > { %v3285_v11 = vadd.f32 %v4242_v62, %v3284_v41  ;;  %v3353_v63 = vadd.f32 %v3352_v44, %v3322_v16  ;;  %4195 = vst [vmem:[%s6190_s30 + $0x20] sm:$0xff] %v4135_v43  }
 0x1fd   : > { %v3354_v54 = vadd.f32 %v3353_v63, %v3323_v15  ;;  %v3286_v59 = vadd.f32 %v4243_v10, %v3285_v11 }
 0x1ff   : > { %v3355_v32 = vadd.f32 %v3354_v54, %v3324_v26 }
 0x21d   : > { %v4246_v35 = vpop.f32.mrb[12].mxu0 }
 0x21e   : > { %v3197_v8 = vpop.f32.mrb[13].mxu0  ;;  %v3327_v34 = vmul.f32 %v4246_v35, %v4246_v35 }
 0x21f   : > { %v3287_v24 = vadd.f32 %v3286_v59, %v3197_v8  ;;  %v3325_v33 = vmul.f32 %v3197_v8, %v3197_v8  ;;  %v4247_v25 = vpop.f32.mrb[14].mxu0 }
 0x220   : > { %v4150_v42 = vpack.c.bf16 %v4247_v25, %v4246_v35  ;;  %v3200_v0 = vpop.f32.mrb[15].mxu0  ;;  %v3328_v1 = vmul.f32 %v4247_v25, %v4247_v25 }
 0x221   : > { %v3356_v38 = vadd.f32 %v3355_v32, %v3325_v33  ;;  %v3288_v13 = vadd.f32 %v3287_v24, %v3200_v0  ;;  %v3326_v6 = vmul.f32 %v3200_v0, %v3200_v0  ;;  %v4145_v28 = vpack.c.bf16 %v3200_v0, %v3197_v8 }
 0x222   : > { %4198 = vst [vmem:[%s6190_s30 + $0x38] sm:$0xff] %v4150_v42  }
 0x223   : > { %v3289_v19 = vadd.f32 %v4246_v35, %v3288_v13  ;;  %v3357_v60 = vadd.f32 %v3356_v38, %v3326_v6  ;;  %4197 = vst [vmem:[%s6190_s30 + $0x30] sm:$0xff] %v4145_v28  }
 0x225   : > { %v3358_v20 = vadd.f32 %v3357_v60, %v3327_v34  ;;  %v3290_v17 = vadd.f32 %v4247_v25, %v3289_v19 }
 0x227   : > { %v3359_v21 = vadd.f32 %v3358_v20, %v3328_v1 }
 0x232   : > { %v4250_v9 = vpop.f32.mrb[0].mxu1 }
 0x233   : > { %v3213_v29 = vpop.f32.mrb[1].mxu1  ;;  %v3331_v39 = vmul.f32 %v4250_v9, %v4250_v9 }
 0x234   : > { %v3291_v23 = vadd.f32 %v3290_v17, %v3213_v29  ;;  %v3329_v56 = vmul.f32 %v3213_v29, %v3213_v29  ;;  %v4251_v57 = vpop.f32.mrb[2].mxu1 }
 0x235   : > { %v4160_v5 = vpack.c.bf16 %v4251_v57, %v4250_v9  ;;  %v3216_v14 = vpop.f32.mrb[3].mxu1  ;;  %v3332_v53 = vmul.f32 %v4251_v57, %v4251_v57 }
 0x236   : > { %v3360_v58 = vadd.f32 %v3359_v21, %v3329_v56  ;;  %v3292_v37 = vadd.f32 %v3291_v23, %v3216_v14  ;;  %v3330_v36 = vmul.f32 %v3216_v14, %v3216_v14  ;;  %v4155_v22 = vpack.c.bf16 %v3216_v14, %v3213_v29 }
 0x237   : > { %4200 = vst [vmem:[%s6190_s30 + $0x48] sm:$0xff] %v4160_v5  }
 0x238   : > { %v3293_v50 = vadd.f32 %v4250_v9, %v3292_v37  ;;  %v3361_v31 = vadd.f32 %v3360_v58, %v3330_v36  ;;  %4199 = vst [vmem:[%s6190_s30 + $0x40] sm:$0xff] %v4155_v22  }
 0x23a   : > { %v3362_v18 = vadd.f32 %v3361_v31, %v3331_v39  ;;  %v3294_v30 = vadd.f32 %v4251_v57, %v3293_v50 }
 0x23c   : > { %v3363_v3 = vadd.f32 %v3362_v18, %v3332_v53 }
 0x25b   : > { %v4254_v47 = vpop.f32.mrb[4].mxu1 }
 0x25c   : > { %v3229_v55 = vpop.f32.mrb[5].mxu1  ;;  %v3335_v4 = vmul.f32 %v4254_v47, %v4254_v47 }
 0x25d   : > { %v3295_v12 = vadd.f32 %v3294_v30, %v3229_v55  ;;  %v3333_v2 = vmul.f32 %v3229_v55, %v3229_v55  ;;  %v4255_v40 = vpop.f32.mrb[6].mxu1 }
 0x25e   : > { %v4170_v49 = vpack.c.bf16 %v4255_v40, %v4254_v47  ;;  %v3232_v27 = vpop.f32.mrb[7].mxu1  ;;  %v3336_v10 = vmul.f32 %v4255_v40, %v4255_v40 }
 0x25f   : > { %v3364_v51 = vadd.f32 %v3363_v3, %v3333_v2  ;;  %v3296_v45 = vadd.f32 %v3295_v12, %v3232_v27  ;;  %v3334_v48 = vmul.f32 %v3232_v27, %v3232_v27  ;;  %v4165_v62 = vpack.c.bf16 %v3232_v27, %v3229_v55 }
 0x260   : > { %4202 = vst [vmem:[%s6190_s30 + $0x58] sm:$0xff] %v4170_v49  }
 0x261   : > { %v3297_v46 = vadd.f32 %v4254_v47, %v3296_v45  ;;  %v3365_v52 = vadd.f32 %v3364_v51, %v3334_v48  ;;  %4201 = vst [vmem:[%s6190_s30 + $0x50] sm:$0xff] %v4165_v62  }
 0x263   : > { %v3366_v7 = vadd.f32 %v3365_v52, %v3335_v4  ;;  %v3298_v61 = vadd.f32 %v4255_v40, %v3297_v46 }
 0x265   : > { %v3367_v44 = vadd.f32 %v3366_v7, %v3336_v10 }
 0x284   : > { %v4258_v41 = vpop.f32.mrb[8].mxu1 }
 0x285   : > { %v3245_v16 = vpop.f32.mrb[9].mxu1  ;;  %v3339_v8 = vmul.f32 %v4258_v41, %v4258_v41 }
 0x286   : > { %v3299_v43 = vadd.f32 %v3298_v61, %v3245_v16  ;;  %v3337_v15 = vmul.f32 %v3245_v16, %v3245_v16  ;;  %v4259_v11 = vpop.f32.mrb[10].mxu1 }
 0x287   : > { %v4180_v63 = vpack.c.bf16 %v4259_v11, %v4258_v41  ;;  %v3248_v26 = vpop.f32.mrb[11].mxu1  ;;  %v3340_v25 = vmul.f32 %v4259_v11, %v4259_v11 }
 0x288   : > { %v3368_v54 = vadd.f32 %v3367_v44, %v3337_v15  ;;  %v3300_v59 = vadd.f32 %v3299_v43, %v3248_v26  ;;  %v3338_v32 = vmul.f32 %v3248_v26, %v3248_v26  ;;  %v4175_v35 = vpack.c.bf16 %v3248_v26, %v3245_v16 }
 0x289   : > { %4204 = vst [vmem:[%s6190_s30 + $0x68] sm:$0xff] %v4180_v63  }
 0x28a   : > { %v3301_v24 = vadd.f32 %v4258_v41, %v3300_v59  ;;  %v3369_v33 = vadd.f32 %v3368_v54, %v3338_v32  ;;  %4203 = vst [vmem:[%s6190_s30 + $0x60] sm:$0xff] %v4175_v35  }
 0x28c   : > { %v3370_v42 = vadd.f32 %v3369_v33, %v3339_v8  ;;  %v3302_v0 = vadd.f32 %v4259_v11, %v3301_v24 }
 0x28e   : > { %v3371_v38 = vadd.f32 %v3370_v42, %v3340_v25 }
 0x2a8   : > { %v4262_v13 = vpop.f32.mrb[12].mxu1 }
 0x2a9   : > { %v3261_v6 = vpop.f32.mrb[13].mxu1  ;;  %v3343_v29 = vmul.f32 %v4262_v13, %v4262_v13 }
 0x2aa   : > { %v3303_v28 = vadd.f32 %v3302_v0, %v3261_v6  ;;  %v3341_v34 = vmul.f32 %v3261_v6, %v3261_v6  ;;  %v4263_v19 = vpop.f32.mrb[14].mxu1 }
 0x2ab   : > { %v4190_v60 = vpack.c.bf16 %v4263_v19, %v4262_v13  ;;  %v3264_v1 = vpop.f32.mrb[15].mxu1 }
 0x2ac   : > { %v3372_v20 = vadd.f32 %v3371_v38, %v3341_v34  ;;  %v3304_v17 = vadd.f32 %v3303_v28, %v3264_v1  ;;  %v3342_v21 = vmul.f32 %v3264_v1, %v3264_v1  ;;  %v4185_v9 = vpack.c.bf16 %v3264_v1, %v3261_v6 }
 0x2ad   : > { %4206 = vst [vmem:[%s6190_s30 + $0x78] sm:$0xff] %v4190_v60  }
 0x2ae   : > { %v3305_v23 = vadd.f32 %v4262_v13, %v3304_v17  ;;  %v3373_v56 = vadd.f32 %v3372_v20, %v3342_v21  ;;  %4205 = vst [vmem:[%s6190_s30 + $0x70] sm:$0xff] %v4185_v9  }
 0x2af   : > { %4434 = shalt.err (!%p4431_p5)
}
 0x2b0   : > { %s4435_s23 = scalar_lea.hbm %s6242_s9, 2048  ;;  %s4439_s29 = scalar_lea.hbm %s6328_s2, 4096 }
 0x2b1   : > { %p4436_p6 = scmp.ne.s32.totalorder %s6242_s9, %s4435_s23  ;;  %p4440_p10 = scmp.lt.u32.totalorder %s6242_s9, %s6328_s2 }
 0x2b2   : > { %p4441_p11 = scmp.lt.u32.totalorder %s4439_s29, %s4435_s23  ;;  %p4443_p13 = scmp.lt.u32.totalorder %s4435_s23, %s6242_s9 }
 0x2b3   : > { %p4437_p7 = pnand %p4436_p6, %p4604_p4 }
 0x2b4   : > { %p4442_p12 = por %p4441_p11, %p4440_p10 }
 0x2b5   : > { %p4438_p9 = pneg %p4437_p7 }
 0x2b6   : > { %p4444_p0 = por %p4443_p13, %p4442_p12 }
 0x2b8   : > { %p4445_p1 = pnand %p4444_p0, %p4438_p9 }
 0x2ba   : > { %4448 = shalt.err (!%p4445_p1)
}
 0x2bb   : > { %s4542_s6 = smov 64   ;;  %v3344_v57 = vmul.f32 %v4263_v19, %v4263_v19  ;;  %v3306_v5 = vadd.f32 %v4263_v19, %v3305_v23  ;;  %v3374_v14 = vadd.f32 %v3373_v56, %v3343_v29  ;;  %s3699_s8 = sshll.u32 %s6174_s28, 1  ;;  %vm3382_vm0 = vcmask 1040384  }
 0x2bc   : > { %4273 = dma.vmem_to_hbm [thread:$0]  (%p4604_p4), %s6244_s5, 2048, %s6242_s9, %s3546_s10, %s4542_s6, %s4542_s6, %s4536_s7  }
 0x2bd   : > { %v3307_v58 = vrot.slane %v3306_v5, 4  ;;  %v3375_v37 = vadd.f32 %v3374_v14, %v3344_v57  ;;  %s4076_s11 = sshll.u32 %s4523_s15, 5  ;;  %s190_s7 = scalar_lea.vmem [#allocation4], %s3699_s8 }
 0x2be   : > { %s3582_s5 = sshll.u32 %s190_s7, 4  ;;  %s6278_s18 = scalar_lea.hbm %s6329_s3, %s4076_s11  ;;  %s6280_s5 = int_to_ptr.vmem [resolvable:$true] %s3582_s5 }
 0x2bf   : > { %v3308_v36 = vadd.f32 %v3307_v58, %v3306_v5  ;;  %v3376_v22 = vrot.slane %v3375_v37, 4  ;;  %s3551_s19 = scalar_lea.sflag [#allocation5], %s6174_s28  ;;  %s4449_s21 = scalar_lea.vmem %s6280_s5, 32 }
 0x2c0   : > { %p4450_p2 = scmp.ne.s32.totalorder %s6280_s5, %s4449_s21  ;;  %s4543_s15 = smov [#allocation4]  }
 0x2c1   : > { %v3309_v39 = vrot.slane %v3308_v36, 2  ;;  %v3377_v50 = vadd.f32 %v3376_v22, %v3375_v37  ;;  %s4453_s23 = sshll.u32 %s4543_s15, 4  ;;  %s4454_s23 = int_to_ptr.vmem [resolvable:$false] %s4453_s23 }
 0x2c2   : > { %p4451_p3 = pnand %p4450_p2, %p4604_p4  ;;  %s4455_s26 = scalar_lea.vmem %s4454_s23, 64 }
 0x2c3   : > { %v3310_v31 = vadd.f32 %v3309_v39, %v3308_v36  ;;  %v3378_v53 = vrot.slane %v3377_v50, 2  ;;  %p4456_p6 = scmp.lt.s32.totalorder %s6280_s5, %s4454_s23  ;;  %p4457_p7 = scmp.lt.s32.totalorder %s4455_s26, %s4449_s21 }
 0x2c4   : > { %p4452_p5 = pneg %p4451_p3 }
 0x2c5   : > { %v3311_v18 = vrot.slane %v3310_v31, 1  ;;  %v3379_v30 = vadd.f32 %v3378_v53, %v3377_v50  ;;  %p4458_p9 = por %p4457_p7, %p4456_p6 }
 0x2c7   : > { %v3380_v3 = vrot.slane %v3379_v30, 1  ;;  %v3312_v47 = vadd.f32 %v3311_v18, %v3310_v31  ;;  %p4459_p10 = pnand %p4458_p9, %p4452_p5 }
 0x2c9   : > { %v3381_v55 = vadd.f32 %v3380_v3, %v3379_v30 }
 0x2cb   : > { %v3383_v12 = vsel %vm3382_vm0, %v3312_v47, %v3381_v55 }
 0x2cc   : > { %3384 = vst [vmem:[%s190_s7] sm:$0x3] %v3383_v12 }
 0x2cd   : > { %4462 = shalt.err (!%p4459_p10)
}
 0x2ce   : > { %s4463_s28 = scalar_lea.hbm %s6278_s18, 32  ;;  %s4467_s30 = scalar_lea.hbm %s6329_s3, 64 }
 0x2cf   : > { %p4464_p11 = scmp.ne.s32.totalorder %s6278_s18, %s4463_s28  ;;  %p4468_p0 = scmp.lt.u32.totalorder %s6278_s18, %s6329_s3 }
 0x2d0   : > { %p4469_p1 = scmp.lt.u32.totalorder %s4467_s30, %s4463_s28  ;;  %p4471_p3 = scmp.lt.u32.totalorder %s4463_s28, %s6278_s18 }
 0x2d1   : > { %p4465_p12 = pnand %p4464_p11, %p4604_p4 }
 0x2d2   : > { %p4470_p2 = por %p4469_p1, %p4468_p0 }
 0x2d3   : > { %p4466_p13 = pneg %p4465_p12 }
 0x2d4   : > { %p4472_p5 = por %p4471_p3, %p4470_p2 }
 0x2d6   : > { %p4473_p6 = pnand %p4472_p5, %p4466_p13 }
 0x2d8   : > { %4476 = shalt.err (!%p4473_p6)
}
 0x2d9   : > { %4274 = dma.vmem_to_hbm [thread:$0]  (%p4604_p4), %s6280_s5, 32, %s6278_s18, %s3551_s19  }
 0x2da PF: > { %p4284_p7 = scmp.ge.s32.totalorder %s4531_s17, 2  ;;  %s3594_s8 = sand.u32 1, %s4511_s12  }
 0x2db   : > { %s3595_s11 = scalar_lea.sflag [#allocation3], %s3594_s8 }
 0x2dc   : > { %p4278_p9 = pnand %p4284_p7, %p4611_p8 }
 0x2de   : > { %4502 = dma.done.wait (!%p4278_p9), %s3595_s11, 2048  }
 0x2df   : > { %4504 = vsyncadd (!%p4278_p9), %s3595_s11, 4294965248  ;;  %s3604_s7 = scalar_lea.sflag [#allocation5], %s3594_s8 }
 0x2e0   : > { %4506 = dma.done.wait (!%p4278_p9), %s3604_s7, 32  }
 0x2e1   : > { %4508 = vsyncadd (!%p4278_p9), %s3604_s7, 4294967264  ;;  %s20_s17 = sadd.s32 1, %s4531_s17   ;;  %s6336_s12 = smov %s4515_s13 }
 0x2e2   : > { %p17_p10 = scmp.ge.s32.totalorder %s20_s17, 4   ;;  %s6337_s13 = smov %s4519_s14 }
 0x2e3   : > { %s6338_s14 = smov %s4617_s25  ;;  %s6339_s15 = smov %s4527_s16 }
 0x2e4   : > { %s6340_s16 = smov %s6342_s20  ;;  %19 = sbr.rel (!%p17_p10) target bundleno = 6 (0x6), region = 83 }
 0x2eb   :  { %3609 = vsyncpa [#allocation3], 1 }
 0x2ec   :  { %3611 = vsyncpa [#allocation3 + $0x1], 1 }
 0x2ed   :  { %3612 = vsyncpa [#allocation5], 1 }
 0x2ee   :  { %3614 = vsyncpa [#allocation5 + $0x1], 1 }

</bundles_post_ra>
